<compile_context>
chip_gen: v7x
topology: tpu7x:2x2x1
jax: 0.10.0
libtpu: 0.0.40
codegen_flags: <defaults>
</compile_context>

<pallas_src>
import math

import jax
import jax.numpy as jnp
from jax import lax
from jax.experimental import pallas as pl
from jax.experimental.pallas import tpu as pltpu

# ---------------- small synthetic RoBERTa config ----------------
B = 2              # batch
S = 8              # sequence length
BS = B * S         # fused rows
H = 128            # hidden size
NH = 8             # attention heads
HD = H // NH       # head dim
FF = 4 * H         # intermediate (FFN) size
NUM_LAYERS = 2     # encoder layers
VOCAB = 50         # logical vocab
VOCAB_PAD = 64     # embedding table padded rows (alignment)
MAX_POS = 64
PAD_ID = 1         # RoBERTa padding_idx
NUM_LABELS = 8
LN_EPS = 1e-5
MASK_VALUE = -1e9  # large finite additive mask (safer than finfo.min)


# ---------------- in-kernel helpers ----------------
def _layer_norm(x, gamma, beta, eps=LN_EPS):
    mu = jnp.mean(x, axis=-1, keepdims=True)
    var = jnp.mean(jnp.square(x - mu), axis=-1, keepdims=True)
    return (x - mu) * lax.rsqrt(var + eps) * gamma + beta


def _gelu_exact(x):
    # exact (erf) GELU, matching HF RoBERTa "gelu"
    return 0.5 * x * (1.0 + lax.erf(x * (1.0 / math.sqrt(2.0))))


def _softmax_lastdim(scores):
    m = jnp.max(scores, axis=-1, keepdims=True)
    e = jnp.exp(scores - m)
    return e / jnp.sum(e, axis=-1, keepdims=True)   # exact divide (parity)


def _bce_with_logits(lg, tgt):
    # elementwise binary_cross_entropy_with_logits (reduction='none')
    return jnp.maximum(lg, 0.0) - lg * tgt + jnp.log(1.0 + jnp.exp(-jnp.abs(lg)))


def _mean_all(a):
    s = jnp.sum(jnp.sum(a, axis=1, keepdims=True), axis=0, keepdims=True)
    return s / float(a.shape[0] * a.shape[1])


# ---------------- single fused kernel ----------------
def fused_forward_kernel(
        ids_ref, pos_ref, amask_ref, labels_ref,
        wemb_ref, pemb_ref, temb_ref, embg_ref, embb_ref,
        wqkv_ref, bqkv_ref, wo_ref, bo_ref,
        ln1g_ref, ln1b_ref, w1_ref, b1_ref, w2_ref, b2_ref,
        ln2g_ref, ln2b_ref, wc_ref, bc_ref,
        logits_ref, loss_ref,
        ctx_ref):
    # ---- embedding gather via one-hot matmuls (exact row selection) ----
    ids = ids_ref[...]                                               # (BS, 1) int32
    pos = pos_ref[...]                                               # (BS, 1) int32
    onehot_w = (lax.broadcasted_iota(jnp.int32, (BS, VOCAB_PAD), 1) == ids
                ).astype(jnp.float32)                                # (BS, 64)
    onehot_p = (lax.broadcasted_iota(jnp.int32, (BS, MAX_POS), 1) == pos
                ).astype(jnp.float32)                                # (BS, 64)
    emb = (jnp.dot(onehot_w, wemb_ref[...], preferred_element_type=jnp.float32)
           + jnp.dot(onehot_p, pemb_ref[...], preferred_element_type=jnp.float32)
           + temb_ref[...])                                          # (BS, H)
    x = _layer_norm(emb, embg_ref[...], embb_ref[...])               # (BS, H) f32

    # additive attention mask, built once: 0 where attended, -1e9 where masked
    add_mask = (1.0 - amask_ref[...].astype(jnp.float32)) * MASK_VALUE   # (B,1,S)
    scale = jnp.float32(1.0 / math.sqrt(HD))

    # ---- encoder layers: static unroll, all weights VMEM-resident ----
    for l in range(NUM_LAYERS):
        xb = x.astype(jnp.bfloat16)
        # fused QKV projection: one (16,128)x(128,384) MXU launch
        qkv = (jnp.dot(xb, wqkv_ref[l], preferred_element_type=jnp.float32)
               + bqkv_ref[l])                                        # (BS, 3H) f32

        # per-head attention (B-batched einsums, bf16 MXU inputs); each head's
        # context lands at lane offset h*HD in the shared VMEM scratch.
        for h in range(NH):
            qh = qkv[:, h * HD:(h + 1) * HD].reshape(B, S, HD).astype(jnp.bfloat16)
            kh = qkv[:, H + h * HD:H + (h + 1) * HD].reshape(B, S, HD).astype(jnp.bfloat16)
            vh = qkv[:, 2 * H + h * HD:2 * H + (h + 1) * HD].reshape(B, S, HD).astype(jnp.bfloat16)
            sc = jnp.einsum('bqd,bkd->bqk', qh, kh,
                            preferred_element_type=jnp.float32) * scale
            probs = _softmax_lastdim(sc + add_mask)                  # f32
            ctx_h = jnp.einsum('bqk,bkd->bqd', probs.astype(jnp.bfloat16), vh,
                               preferred_element_type=jnp.float32)   # (B,S,HD)
            ctx_ref[:, h * HD:(h + 1) * HD] = ctx_h.reshape(BS, HD)

        # single full-width output projection per layer
        attn_out = (jnp.dot(ctx_ref[...].astype(jnp.bfloat16), wo_ref[l],
                            preferred_element_type=jnp.float32) + bo_ref[l])
        h1 = _layer_norm(x + attn_out, ln1g_ref[l], ln1b_ref[l])

        ff = _gelu_exact(
            jnp.dot(h1.astype(jnp.bfloat16), w1_ref[l],
                    preferred_element_type=jnp.float32) + b1_ref[l])
        ff_out = jnp.dot(ff.astype(jnp.bfloat16), w2_ref[l],
                         preferred_element_type=jnp.float32) + b2_ref[l]
        x = _layer_norm(h1 + ff_out, ln2g_ref[l], ln2b_ref[l])

    # ---- CLS pooling (selection matmul; exact, no tile-crossing concat) ----
    cls_sel = (lax.broadcasted_iota(jnp.int32, (B, BS), 1) ==
               lax.broadcasted_iota(jnp.int32, (B, BS), 0) * S).astype(jnp.float32)
    pooled = jnp.dot(cls_sel, x, preferred_element_type=jnp.float32)     # (B, H)
    # dropout = identity in eval mode
    logits = jnp.dot(pooled, wc_ref[...], preferred_element_type=jnp.float32) + bc_ref[...]
    logits_ref[...] = logits

    # ---- 0.7 * FocalLoss(alpha=1, gamma=2) + 0.3 * LabelSmoothing(0.1) ----
    z = labels_ref[...]                                              # (B, NUM_LABELS)
    bce = _bce_with_logits(logits, z)
    pt = jnp.exp(-bce)
    focal = _mean_all(1.0 * (1.0 - pt) ** 2 * bce)                   # (1, 1)
    z_smooth = z * (1.0 - 0.1) + 0.1 / 2.0
    smooth = _mean_all(_bce_with_logits(logits, z_smooth))           # (1, 1)
    loss_ref[...] = 0.7 * focal + 0.3 * smooth


def fused_forward(ids_col, pos_col, amask, labels, p):
    args = (
        ids_col, pos_col, amask, labels,
        p["word_emb"], p["pos_emb"], p["type_emb"], p["emb_ln_g"], p["emb_ln_b"],
        p["wqkv"], p["bqkv"], p["wo"], p["bo"],
        p["ln1_g"], p["ln1_b"], p["w1"], p["b1"], p["w2"], p["b2"],
        p["ln2_g"], p["ln2_b"], p["wc"], p["bc"],
    )
    vmem = pl.BlockSpec(memory_space=pltpu.MemorySpace.VMEM)
    logits, loss = pl.pallas_call(
        fused_forward_kernel,
        out_shape=(jax.ShapeDtypeStruct((B, NUM_LABELS), jnp.float32),
                   jax.ShapeDtypeStruct((1, 1), jnp.float32)),
        in_specs=[vmem] * len(args),
        out_specs=(vmem, vmem),
        scratch_shapes=[pltpu.VMEM((BS, H), jnp.float32)],   # per-head ctx slab
        compiler_params=pltpu.CompilerParams(vmem_limit_bytes=32 * 1024 * 1024),
        cost_estimate=pl.CostEstimate(flops=13_300_000,
                                      transcendentals=19_000,
                                      bytes_accessed=900_000),
    )(*args)
    return logits, loss[0, 0]


# ---------------- parameter init (deterministic, synthetic) ----------------
def init_params(key):
    ks = iter(jax.random.split(key, 64))

    def nrm(shape, std=0.02, dtype=jnp.float32):
        return (std * jax.random.normal(next(ks), shape, jnp.float32)).astype(dtype)

    return {
        # embedding tables stay f32 (one-hot gather is exact)
        "word_emb": nrm((VOCAB_PAD, H)),          # rows >= VOCAB are never selected
        "pos_emb": nrm((MAX_POS, H)),
        "type_emb": nrm((1, H)),
        "emb_ln_g": jnp.ones((1, H), jnp.float32),
        "emb_ln_b": jnp.zeros((1, H), jnp.float32),
        # per-layer weights stacked on a leading NUM_LAYERS axis;
        # matmul weights in bf16 (MXU inputs), biases / LN params in f32.
        "wqkv": nrm((NUM_LAYERS, H, 3 * H), dtype=jnp.bfloat16),   # fused Q|K|V
        "bqkv": jnp.zeros((NUM_LAYERS, 1, 3 * H), jnp.float32),
        "wo": nrm((NUM_LAYERS, H, H), dtype=jnp.bfloat16),
        "bo": jnp.zeros((NUM_LAYERS, 1, H), jnp.float32),
        "ln1_g": jnp.ones((NUM_LAYERS, 1, H), jnp.float32),
        "ln1_b": jnp.zeros((NUM_LAYERS, 1, H), jnp.float32),
        "w1": nrm((NUM_LAYERS, H, FF), dtype=jnp.bfloat16),
        "b1": jnp.zeros((NUM_LAYERS, 1, FF), jnp.float32),
        "w2": nrm((NUM_LAYERS, FF, H), dtype=jnp.bfloat16),
        "b2": jnp.zeros((NUM_LAYERS, 1, H), jnp.float32),
        "ln2_g": jnp.ones((NUM_LAYERS, 1, H), jnp.float32),
        "ln2_b": jnp.zeros((NUM_LAYERS, 1, H), jnp.float32),
        "wc": nrm((H, NUM_LABELS)),
        "bc": jnp.zeros((1, NUM_LABELS), jnp.float32),
    }


# ---------------- full forward (only int-id glue outside the kernel) ----------
def model_forward(input_ids, attention_mask, labels, params):
    # RoBERTa position ids: cumsum over non-pad tokens, offset by padding_idx
    not_pad = (input_ids != PAD_ID).astype(jnp.int32)
    position_ids = jnp.cumsum(not_pad, axis=1) * not_pad + PAD_ID

    ids_col = input_ids.reshape(BS, 1).astype(jnp.int32)
    pos_col = position_ids.reshape(BS, 1).astype(jnp.int32)
    amask = attention_mask.astype(jnp.int32).reshape(B, 1, S)

    logits, loss = fused_forward(ids_col, pos_col, amask, labels, params)
    return logits, loss


forward = jax.jit(model_forward)


if __name__ == "__main__":
    key = jax.random.PRNGKey(0)
    k_ids, k_lab, k_par = jax.random.split(key, 3)

    input_ids = jax.random.randint(k_ids, (B, S), 2, VOCAB, dtype=jnp.int32)
    input_ids = input_ids.at[1, -1].set(PAD_ID)                 # one padded token
    attention_mask = jnp.ones((B, S), jnp.int32).at[1, -1].set(0)
    labels = jax.random.bernoulli(k_lab, 0.3, (B, NUM_LABELS)).astype(jnp.float32)

    params = init_params(k_par)

    logits, loss = forward(input_ids, attention_mask, labels, params)
    jax.block_until_ready((logits, loss))

    assert logits.shape == (B, NUM_LABELS)
    assert bool(jnp.all(jnp.isfinite(logits)))
    assert bool(jnp.isfinite(loss))
    print("KERNEL_OK")
</pallas_src>

<mosaic_0001>
module attributes {stable_mosaic.version = 11 : i64} {
  func.func @fused_forward_kernel(%arg0: memref<16x1xi32, #tpu.memory_space<vmem>>, %arg1: memref<16x1xi32, #tpu.memory_space<vmem>>, %arg2: memref<2x1x8xi32, #tpu.memory_space<vmem>>, %arg3: memref<2x8xf32, #tpu.memory_space<vmem>>, %arg4: memref<64x128xf32, #tpu.memory_space<vmem>>, %arg5: memref<64x128xf32, #tpu.memory_space<vmem>>, %arg6: memref<1x128xf32, #tpu.memory_space<vmem>>, %arg7: memref<1x128xf32, #tpu.memory_space<vmem>>, %arg8: memref<1x128xf32, #tpu.memory_space<vmem>>, %arg9: memref<2x128x384xbf16, #tpu.memory_space<vmem>>, %arg10: memref<2x1x384xf32, #tpu.memory_space<vmem>>, %arg11: memref<2x128x128xbf16, #tpu.memory_space<vmem>>, %arg12: memref<2x1x128xf32, #tpu.memory_space<vmem>>, %arg13: memref<2x1x128xf32, #tpu.memory_space<vmem>>, %arg14: memref<2x1x128xf32, #tpu.memory_space<vmem>>, %arg15: memref<2x128x512xbf16, #tpu.memory_space<vmem>>, %arg16: memref<2x1x512xf32, #tpu.memory_space<vmem>>, %arg17: memref<2x512x128xbf16, #tpu.memory_space<vmem>>, %arg18: memref<2x1x128xf32, #tpu.memory_space<vmem>>, %arg19: memref<2x1x128xf32, #tpu.memory_space<vmem>>, %arg20: memref<2x1x128xf32, #tpu.memory_space<vmem>>, %arg21: memref<128x8xf32, #tpu.memory_space<vmem>>, %arg22: memref<1x8xf32, #tpu.memory_space<vmem>>, %arg23: memref<2x8xf32, #tpu.memory_space<vmem>>, %arg24: memref<1x1xf32, #tpu.memory_space<vmem>>, %arg25: memref<16x128xf32, #tpu.memory_space<vmem>>) attributes {dimension_semantics = [], scalar_prefetch = 0 : i64, scratch_operands = 1 : i64, tpu.core_type = #tpu.core_type<tc>} {
    %c0 = arith.constant 0 : index
    %c0_0 = arith.constant 0 : index
    %0 = vector.load %arg0[%c0, %c0_0] : memref<16x1xi32, #tpu.memory_space<vmem>>, vector<16x1xi32>
    %c0_1 = arith.constant 0 : index
    %c0_2 = arith.constant 0 : index
    %1 = vector.load %arg1[%c0_1, %c0_2] : memref<16x1xi32, #tpu.memory_space<vmem>>, vector<16x1xi32>
    %2 = tpu.iota {dimensions = array<i32: 1>} : vector<16x64xi32>
    %3 = vector.broadcast %0 : vector<16x1xi32> to vector<16x64xi32>
    %4 = arith.cmpi eq, %2, %3 : vector<16x64xi32>
    %5 = arith.extui %4 : vector<16x64xi1> to vector<16x64xi32>
    %6 = arith.sitofp %5 : vector<16x64xi32> to vector<16x64xf32>
    %7 = tpu.iota {dimensions = array<i32: 1>} : vector<16x64xi32>
    %8 = vector.broadcast %1 : vector<16x1xi32> to vector<16x64xi32>
    %9 = arith.cmpi eq, %7, %8 : vector<16x64xi32>
    %10 = arith.extui %9 : vector<16x64xi1> to vector<16x64xi32>
    %11 = arith.sitofp %10 : vector<16x64xi32> to vector<16x64xf32>
    %c0_3 = arith.constant 0 : index
    %c0_4 = arith.constant 0 : index
    %12 = vector.load %arg4[%c0_3, %c0_4] : memref<64x128xf32, #tpu.memory_space<vmem>>, vector<64x128xf32>
    %cst = arith.constant dense<0.000000e+00> : vector<16x128xf32>
    %13 = tpu.matmul %6, %12, %cst {dimension_numbers = #tpu.dot_dimension_numbers<[1], [0], [0], [1], [0, 0, 1, 1], [], []>} : vector<16x64xf32>, vector<64x128xf32>, vector<16x128xf32> -> vector<16x128xf32>
    %c0_5 = arith.constant 0 : index
    %c0_6 = arith.constant 0 : index
    %14 = vector.load %arg5[%c0_5, %c0_6] : memref<64x128xf32, #tpu.memory_space<vmem>>, vector<64x128xf32>
    %cst_7 = arith.constant dense<0.000000e+00> : vector<16x128xf32>
    %15 = tpu.matmul %11, %14, %cst_7 {dimension_numbers = #tpu.dot_dimension_numbers<[1], [0], [0], [1], [0, 0, 1, 1], [], []>} : vector<16x64xf32>, vector<64x128xf32>, vector<16x128xf32> -> vector<16x128xf32>
    %16 = arith.addf %13, %15 : vector<16x128xf32>
    %c0_8 = arith.constant 0 : index
    %c0_9 = arith.constant 0 : index
    %17 = vector.load %arg6[%c0_8, %c0_9] : memref<1x128xf32, #tpu.memory_space<vmem>>, vector<1x128xf32>
    %18 = vector.broadcast %17 : vector<1x128xf32> to vector<16x128xf32>
    %19 = arith.addf %16, %18 : vector<16x128xf32>
    %c0_10 = arith.constant 0 : index
    %c0_11 = arith.constant 0 : index
    %20 = vector.load %arg7[%c0_10, %c0_11] : memref<1x128xf32, #tpu.memory_space<vmem>>, vector<1x128xf32>
    %c0_12 = arith.constant 0 : index
    %c0_13 = arith.constant 0 : index
    %21 = vector.load %arg8[%c0_12, %c0_13] : memref<1x128xf32, #tpu.memory_space<vmem>>, vector<1x128xf32>
    %cst_14 = arith.constant dense<0.000000e+00> : vector<16xf32>
    %22 = vector.multi_reduction <add>, %19, %cst_14 [1] : vector<16x128xf32> to vector<16xf32>
    %23 = vector.shape_cast %22 : vector<16xf32> to vector<16x1xf32>
    %cst_15 = arith.constant 1.280000e+02 : f32
    %24 = vector.broadcast %cst_15 : f32 to vector<16x1xf32>
    %25 = arith.divf %23, %24 : vector<16x1xf32>
    %26 = vector.broadcast %25 : vector<16x1xf32> to vector<16x128xf32>
    %27 = arith.subf %19, %26 : vector<16x128xf32>
    %28 = arith.mulf %27, %27 : vector<16x128xf32>
    %cst_16 = arith.constant dense<0.000000e+00> : vector<16xf32>
    %29 = vector.multi_reduction <add>, %28, %cst_16 [1] : vector<16x128xf32> to vector<16xf32>
    %30 = vector.shape_cast %29 : vector<16xf32> to vector<16x1xf32>
    %cst_17 = arith.constant 1.280000e+02 : f32
    %31 = vector.broadcast %cst_17 : f32 to vector<16x1xf32>
    %32 = arith.divf %30, %31 : vector<16x1xf32>
    %33 = vector.broadcast %25 : vector<16x1xf32> to vector<16x128xf32>
    %34 = arith.subf %19, %33 : vector<16x128xf32>
    %cst_18 = arith.constant 9.99999974E-6 : f32
    %35 = vector.broadcast %cst_18 : f32 to vector<16x1xf32>
    %36 = arith.addf %32, %35 : vector<16x1xf32>
    %37 = math.rsqrt %36 : vector<16x1xf32>
    %38 = vector.broadcast %37 : vector<16x1xf32> to vector<16x128xf32>
    %39 = arith.mulf %34, %38 : vector<16x128xf32>
    %40 = vector.broadcast %20 : vector<1x128xf32> to vector<16x128xf32>
    %41 = arith.mulf %39, %40 : vector<16x128xf32>
    %42 = vector.broadcast %21 : vector<1x128xf32> to vector<16x128xf32>
    %43 = arith.addf %41, %42 : vector<16x128xf32>
    %c0_19 = arith.constant 0 : index
    %c0_20 = arith.constant 0 : index
    %c0_21 = arith.constant 0 : index
    %44 = vector.load %arg2[%c0_19, %c0_20, %c0_21] : memref<2x1x8xi32, #tpu.memory_space<vmem>>, vector<2x1x8xi32>
    %45 = arith.sitofp %44 : vector<2x1x8xi32> to vector<2x1x8xf32>
    %cst_22 = arith.constant 1.000000e+00 : f32
    %46 = vector.broadcast %cst_22 : f32 to vector<2x1x8xf32>
    %47 = arith.subf %46, %45 : vector<2x1x8xf32>
    %cst_23 = arith.constant -1.000000e+09 : f32
    %48 = vector.broadcast %cst_23 : f32 to vector<2x1x8xf32>
    %49 = arith.mulf %47, %48 : vector<2x1x8xf32>
    %50 = arith.truncf %43 : vector<16x128xf32> to vector<16x128xbf16>
    %c0_24 = arith.constant 0 : index
    %c0_25 = arith.constant 0 : index
    %c0_26 = arith.constant 0 : index
    %51 = vector.load %arg9[%c0_24, %c0_25, %c0_26] : memref<2x128x384xbf16, #tpu.memory_space<vmem>>, vector<1x128x384xbf16>
    %52 = vector.shape_cast %51 : vector<1x128x384xbf16> to vector<128x384xbf16>
    %cst_27 = arith.constant dense<0.000000e+00> : vector<16x384xf32>
    %53 = tpu.matmul %50, %52, %cst_27 {dimension_numbers = #tpu.dot_dimension_numbers<[1], [0], [0], [1], [0, 0, 1, 1], [], []>} : vector<16x128xbf16>, vector<128x384xbf16>, vector<16x384xf32> -> vector<16x384xf32>
    %c0_28 = arith.constant 0 : index
    %c0_29 = arith.constant 0 : index
    %c0_30 = arith.constant 0 : index
    %54 = vector.load %arg10[%c0_28, %c0_29, %c0_30] : memref<2x1x384xf32, #tpu.memory_space<vmem>>, vector<1x1x384xf32>
    %55 = vector.shape_cast %54 : vector<1x1x384xf32> to vector<1x384xf32>
    %56 = vector.broadcast %55 : vector<1x384xf32> to vector<16x384xf32>
    %57 = arith.addf %53, %56 : vector<16x384xf32>
    %58 = vector.extract_strided_slice %57 {offsets = [0, 0], sizes = [16, 16], strides = [1, 1]} : vector<16x384xf32> to vector<16x16xf32>
    %59 = vector.shape_cast %58 : vector<16x16xf32> to vector<2x8x16xf32>
    %60 = arith.truncf %59 : vector<2x8x16xf32> to vector<2x8x16xbf16>
    %61 = vector.extract_strided_slice %57 {offsets = [0, 128], sizes = [16, 16], strides = [1, 1]} : vector<16x384xf32> to vector<16x16xf32>
    %62 = vector.shape_cast %61 : vector<16x16xf32> to vector<2x8x16xf32>
    %63 = arith.truncf %62 : vector<2x8x16xf32> to vector<2x8x16xbf16>
    %64 = vector.extract_strided_slice %57 {offsets = [0, 256], sizes = [16, 16], strides = [1, 1]} : vector<16x384xf32> to vector<16x16xf32>
    %65 = vector.shape_cast %64 : vector<16x16xf32> to vector<2x8x16xf32>
    %66 = arith.truncf %65 : vector<2x8x16xf32> to vector<2x8x16xbf16>
    "tpu.trace_start"() <{level = 10 : i32, message = "bqd,bkd->bqk"}> : () -> ()
    %cst_31 = arith.constant dense<0.000000e+00> : vector<2x8x8xf32>
    %67 = tpu.matmul %60, %63, %cst_31 {dimension_numbers = #tpu.dot_dimension_numbers<[2], [2], [1], [1], [0, 0, 0, 1, 1, 1], [0], [0]>} : vector<2x8x16xbf16>, vector<2x8x16xbf16>, vector<2x8x8xf32> -> vector<2x8x8xf32>
    "tpu.trace_stop"() : () -> ()
    %cst_32 = arith.constant 2.500000e-01 : f32
    %68 = vector.broadcast %cst_32 : f32 to vector<2x8x8xf32>
    %69 = arith.mulf %67, %68 : vector<2x8x8xf32>
    %70 = vector.broadcast %49 : vector<2x1x8xf32> to vector<2x8x8xf32>
    %71 = arith.addf %69, %70 : vector<2x8x8xf32>
    %cst_33 = arith.constant dense<0xFF800000> : vector<2x8xf32>
    %72 = vector.multi_reduction <maximumf>, %71, %cst_33 [2] : vector<2x8x8xf32> to vector<2x8xf32>
    %73 = vector.shape_cast %72 : vector<2x8xf32> to vector<2x8x1xf32>
    %74 = vector.broadcast %73 : vector<2x8x1xf32> to vector<2x8x8xf32>
    %75 = arith.subf %71, %74 : vector<2x8x8xf32>
    %76 = math.exp %75 : vector<2x8x8xf32>
    %cst_34 = arith.constant dense<0.000000e+00> : vector<2x8xf32>
    %77 = vector.multi_reduction <add>, %76, %cst_34 [2] : vector<2x8x8xf32> to vector<2x8xf32>
    %78 = vector.shape_cast %77 : vector<2x8xf32> to vector<2x8x1xf32>
    %79 = vector.broadcast %78 : vector<2x8x1xf32> to vector<2x8x8xf32>
    %80 = arith.divf %76, %79 : vector<2x8x8xf32>
    %81 = arith.truncf %80 : vector<2x8x8xf32> to vector<2x8x8xbf16>
    "tpu.trace_start"() <{level = 10 : i32, message = "bqk,bkd->bqd"}> : () -> ()
    %cst_35 = arith.constant dense<0.000000e+00> : vector<2x8x16xf32>
    %82 = tpu.matmul %81, %66, %cst_35 {dimension_numbers = #tpu.dot_dimension_numbers<[2], [1], [1], [2], [0, 0, 0, 1, 1, 2], [0], [0]>} : vector<2x8x8xbf16>, vector<2x8x16xbf16>, vector<2x8x16xf32> -> vector<2x8x16xf32>
    "tpu.trace_stop"() : () -> ()
    %83 = vector.shape_cast %82 : vector<2x8x16xf32> to vector<16x16xf32>
    %c0_36 = arith.constant 0 : index
    %c0_37 = arith.constant 0 : index
    %84 = vector.load %arg25[%c0_36, %c0_37] : memref<16x128xf32, #tpu.memory_space<vmem>>, vector<16x16xf32>
    tpu.vector_store %arg25[%c0_36, %c0_37], %83 {strides = array<i32>} : memref<16x128xf32, #tpu.memory_space<vmem>>, vector<16x16xf32>,
    %85 = vector.extract_strided_slice %57 {offsets = [0, 16], sizes = [16, 16], strides = [1, 1]} : vector<16x384xf32> to vector<16x16xf32>
    %86 = vector.shape_cast %85 : vector<16x16xf32> to vector<2x8x16xf32>
    %87 = arith.truncf %86 : vector<2x8x16xf32> to vector<2x8x16xbf16>
    %88 = vector.extract_strided_slice %57 {offsets = [0, 144], sizes = [16, 16], strides = [1, 1]} : vector<16x384xf32> to vector<16x16xf32>
    %89 = vector.shape_cast %88 : vector<16x16xf32> to vector<2x8x16xf32>
    %90 = arith.truncf %89 : vector<2x8x16xf32> to vector<2x8x16xbf16>
    %91 = vector.extract_strided_slice %57 {offsets = [0, 272], sizes = [16, 16], strides = [1, 1]} : vector<16x384xf32> to vector<16x16xf32>
    %92 = vector.shape_cast %91 : vector<16x16xf32> to vector<2x8x16xf32>
    %93 = arith.truncf %92 : vector<2x8x16xf32> to vector<2x8x16xbf16>
    "tpu.trace_start"() <{level = 10 : i32, message = "bqd,bkd->bqk"}> : () -> ()
    %cst_38 = arith.constant dense<0.000000e+00> : vector<2x8x8xf32>
    %94 = tpu.matmul %87, %90, %cst_38 {dimension_numbers = #tpu.dot_dimension_numbers<[2], [2], [1], [1], [0, 0, 0, 1, 1, 1], [0], [0]>} : vector<2x8x16xbf16>, vector<2x8x16xbf16>, vector<2x8x8xf32> -> vector<2x8x8xf32>
    "tpu.trace_stop"() : () -> ()
    %cst_39 = arith.constant 2.500000e-01 : f32
    %95 = vector.broadcast %cst_39 : f32 to vector<2x8x8xf32>
    %96 = arith.mulf %94, %95 : vector<2x8x8xf32>
    %97 = vector.broadcast %49 : vector<2x1x8xf32> to vector<2x8x8xf32>
    %98 = arith.addf %96, %97 : vector<2x8x8xf32>
    %cst_40 = arith.constant dense<0xFF800000> : vector<2x8xf32>
    %99 = vector.multi_reduction <maximumf>, %98, %cst_40 [2] : vector<2x8x8xf32> to vector<2x8xf32>
    %100 = vector.shape_cast %99 : vector<2x8xf32> to vector<2x8x1xf32>
    %101 = vector.broadcast %100 : vector<2x8x1xf32> to vector<2x8x8xf32>
    %102 = arith.subf %98, %101 : vector<2x8x8xf32>
    %103 = math.exp %102 : vector<2x8x8xf32>
    %cst_41 = arith.constant dense<0.000000e+00> : vector<2x8xf32>
    %104 = vector.multi_reduction <add>, %103, %cst_41 [2] : vector<2x8x8xf32> to vector<2x8xf32>
    %105 = vector.shape_cast %104 : vector<2x8xf32> to vector<2x8x1xf32>
    %106 = vector.broadcast %105 : vector<2x8x1xf32> to vector<2x8x8xf32>
    %107 = arith.divf %103, %106 : vector<2x8x8xf32>
    %108 = arith.truncf %107 : vector<2x8x8xf32> to vector<2x8x8xbf16>
    "tpu.trace_start"() <{level = 10 : i32, message = "bqk,bkd->bqd"}> : () -> ()
    %cst_42 = arith.constant dense<0.000000e+00> : vector<2x8x16xf32>
    %109 = tpu.matmul %108, %93, %cst_42 {dimension_numbers = #tpu.dot_dimension_numbers<[2], [1], [1], [2], [0, 0, 0, 1, 1, 2], [0], [0]>} : vector<2x8x8xbf16>, vector<2x8x16xbf16>, vector<2x8x16xf32> -> vector<2x8x16xf32>
    "tpu.trace_stop"() : () -> ()
    %110 = vector.shape_cast %109 : vector<2x8x16xf32> to vector<16x16xf32>
    %c0_43 = arith.constant 0 : index
    %c16 = arith.constant 16 : index
    %111 = vector.load %arg25[%c0_43, %c16] : memref<16x128xf32, #tpu.memory_space<vmem>>, vector<16x16xf32>
    tpu.vector_store %arg25[%c0_43, %c16], %110 {strides = array<i32>} : memref<16x128xf32, #tpu.memory_space<vmem>>, vector<16x16xf32>,
    %112 = vector.extract_strided_slice %57 {offsets = [0, 32], sizes = [16, 16], strides = [1, 1]} : vector<16x384xf32> to vector<16x16xf32>
    %113 = vector.shape_cast %112 : vector<16x16xf32> to vector<2x8x16xf32>
    %114 = arith.truncf %113 : vector<2x8x16xf32> to vector<2x8x16xbf16>
    %115 = vector.extract_strided_slice %57 {offsets = [0, 160], sizes = [16, 16], strides = [1, 1]} : vector<16x384xf32> to vector<16x16xf32>
    %116 = vector.shape_cast %115 : vector<16x16xf32> to vector<2x8x16xf32>
    %117 = arith.truncf %116 : vector<2x8x16xf32> to vector<2x8x16xbf16>
    %118 = vector.extract_strided_slice %57 {offsets = [0, 288], sizes = [16, 16], strides = [1, 1]} : vector<16x384xf32> to vector<16x16xf32>
    %119 = vector.shape_cast %118 : vector<16x16xf32> to vector<2x8x16xf32>
    %120 = arith.truncf %119 : vector<2x8x16xf32> to vector<2x8x16xbf16>
    "tpu.trace_start"() <{level = 10 : i32, message = "bqd,bkd->bqk"}> : () -> ()
    %cst_44 = arith.constant dense<0.000000e+00> : vector<2x8x8xf32>
    %121 = tpu.matmul %114, %117, %cst_44 {dimension_numbers = #tpu.dot_dimension_numbers<[2], [2], [1], [1], [0, 0, 0, 1, 1, 1], [0], [0]>} : vector<2x8x16xbf16>, vector<2x8x16xbf16>, vector<2x8x8xf32> -> vector<2x8x8xf32>
    "tpu.trace_stop"() : () -> ()
    %cst_45 = arith.constant 2.500000e-01 : f32
    %122 = vector.broadcast %cst_45 : f32 to vector<2x8x8xf32>
    %123 = arith.mulf %121, %122 : vector<2x8x8xf32>
    %124 = vector.broadcast %49 : vector<2x1x8xf32> to vector<2x8x8xf32>
    %125 = arith.addf %123, %124 : vector<2x8x8xf32>
    %cst_46 = arith.constant dense<0xFF800000> : vector<2x8xf32>
    %126 = vector.multi_reduction <maximumf>, %125, %cst_46 [2] : vector<2x8x8xf32> to vector<2x8xf32>
    %127 = vector.shape_cast %126 : vector<2x8xf32> to vector<2x8x1xf32>
    %128 = vector.broadcast %127 : vector<2x8x1xf32> to vector<2x8x8xf32>
    %129 = arith.subf %125, %128 : vector<2x8x8xf32>
    %130 = math.exp %129 : vector<2x8x8xf32>
    %cst_47 = arith.constant dense<0.000000e+00> : vector<2x8xf32>
    %131 = vector.multi_reduction <add>, %130, %cst_47 [2] : vector<2x8x8xf32> to vector<2x8xf32>
    %132 = vector.shape_cast %131 : vector<2x8xf32> to vector<2x8x1xf32>
    %133 = vector.broadcast %132 : vector<2x8x1xf32> to vector<2x8x8xf32>
    %134 = arith.divf %130, %133 : vector<2x8x8xf32>
    %135 = arith.truncf %134 : vector<2x8x8xf32> to vector<2x8x8xbf16>
    "tpu.trace_start"() <{level = 10 : i32, message = "bqk,bkd->bqd"}> : () -> ()
    %cst_48 = arith.constant dense<0.000000e+00> : vector<2x8x16xf32>
    %136 = tpu.matmul %135, %120, %cst_48 {dimension_numbers = #tpu.dot_dimension_numbers<[2], [1], [1], [2], [0, 0, 0, 1, 1, 2], [0], [0]>} : vector<2x8x8xbf16>, vector<2x8x16xbf16>, vector<2x8x16xf32> -> vector<2x8x16xf32>
    "tpu.trace_stop"() : () -> ()
    %137 = vector.shape_cast %136 : vector<2x8x16xf32> to vector<16x16xf32>
    %c0_49 = arith.constant 0 : index
    %c32 = arith.constant 32 : index
    %138 = vector.load %arg25[%c0_49, %c32] : memref<16x128xf32, #tpu.memory_space<vmem>>, vector<16x16xf32>
    tpu.vector_store %arg25[%c0_49, %c32], %137 {strides = array<i32>} : memref<16x128xf32, #tpu.memory_space<vmem>>, vector<16x16xf32>,
    %139 = vector.extract_strided_slice %57 {offsets = [0, 48], sizes = [16, 16], strides = [1, 1]} : vector<16x384xf32> to vector<16x16xf32>
    %140 = vector.shape_cast %139 : vector<16x16xf32> to vector<2x8x16xf32>
    %141 = arith.truncf %140 : vector<2x8x16xf32> to vector<2x8x16xbf16>
    %142 = vector.extract_strided_slice %57 {offsets = [0, 176], sizes = [16, 16], strides = [1, 1]} : vector<16x384xf32> to vector<16x16xf32>
    %143 = vector.shape_cast %142 : vector<16x16xf32> to vector<2x8x16xf32>
    %144 = arith.truncf %143 : vector<2x8x16xf32> to vector<2x8x16xbf16>
    %145 = vector.extract_strided_slice %57 {offsets = [0, 304], sizes = [16, 16], strides = [1, 1]} : vector<16x384xf32> to vector<16x16xf32>
    %146 = vector.shape_cast %145 : vector<16x16xf32> to vector<2x8x16xf32>
    %147 = arith.truncf %146 : vector<2x8x16xf32> to vector<2x8x16xbf16>
    "tpu.trace_start"() <{level = 10 : i32, message = "bqd,bkd->bqk"}> : () -> ()
    %cst_50 = arith.constant dense<0.000000e+00> : vector<2x8x8xf32>
    %148 = tpu.matmul %141, %144, %cst_50 {dimension_numbers = #tpu.dot_dimension_numbers<[2], [2], [1], [1], [0, 0, 0, 1, 1, 1], [0], [0]>} : vector<2x8x16xbf16>, vector<2x8x16xbf16>, vector<2x8x8xf32> -> vector<2x8x8xf32>
    "tpu.trace_stop"() : () -> ()
    %cst_51 = arith.constant 2.500000e-01 : f32
    %149 = vector.broadcast %cst_51 : f32 to vector<2x8x8xf32>
    %150 = arith.mulf %148, %149 : vector<2x8x8xf32>
    %151 = vector.broadcast %49 : vector<2x1x8xf32> to vector<2x8x8xf32>
    %152 = arith.addf %150, %151 : vector<2x8x8xf32>
    %cst_52 = arith.constant dense<0xFF800000> : vector<2x8xf32>
    %153 = vector.multi_reduction <maximumf>, %152, %cst_52 [2] : vector<2x8x8xf32> to vector<2x8xf32>
    %154 = vector.shape_cast %153 : vector<2x8xf32> to vector<2x8x1xf32>
    %155 = vector.broadcast %154 : vector<2x8x1xf32> to vector<2x8x8xf32>
    %156 = arith.subf %152, %155 : vector<2x8x8xf32>
    %157 = math.exp %156 : vector<2x8x8xf32>
    %cst_53 = arith.constant dense<0.000000e+00> : vector<2x8xf32>
    %158 = vector.multi_reduction <add>, %157, %cst_53 [2] : vector<2x8x8xf32> to vector<2x8xf32>
    %159 = vector.shape_cast %158 : vector<2x8xf32> to vector<2x8x1xf32>
    %160 = vector.broadcast %159 : vector<2x8x1xf32> to vector<2x8x8xf32>
    %161 = arith.divf %157, %160 : vector<2x8x8xf32>
    %162 = arith.truncf %161 : vector<2x8x8xf32> to vector<2x8x8xbf16>
    "tpu.trace_start"() <{level = 10 : i32, message = "bqk,bkd->bqd"}> : () -> ()
    %cst_54 = arith.constant dense<0.000000e+00> : vector<2x8x16xf32>
    %163 = tpu.matmul %162, %147, %cst_54 {dimension_numbers = #tpu.dot_dimension_numbers<[2], [1], [1], [2], [0, 0, 0, 1, 1, 2], [0], [0]>} : vector<2x8x8xbf16>, vector<2x8x16xbf16>, vector<2x8x16xf32> -> vector<2x8x16xf32>
    "tpu.trace_stop"() : () -> ()
    %164 = vector.shape_cast %163 : vector<2x8x16xf32> to vector<16x16xf32>
    %c0_55 = arith.constant 0 : index
    %c48 = arith.constant 48 : index
    %165 = vector.load %arg25[%c0_55, %c48] : memref<16x128xf32, #tpu.memory_space<vmem>>, vector<16x16xf32>
    tpu.vector_store %arg25[%c0_55, %c48], %164 {strides = array<i32>} : memref<16x128xf32, #tpu.memory_space<vmem>>, vector<16x16xf32>,
    %166 = vector.extract_strided_slice %57 {offsets = [0, 64], sizes = [16, 16], strides = [1, 1]} : vector<16x384xf32> to vector<16x16xf32>
    %167 = vector.shape_cast %166 : vector<16x16xf32> to vector<2x8x16xf32>
    %168 = arith.truncf %167 : vector<2x8x16xf32> to vector<2x8x16xbf16>
    %169 = vector.extract_strided_slice %57 {offsets = [0, 192], sizes = [16, 16], strides = [1, 1]} : vector<16x384xf32> to vector<16x16xf32>
    %170 = vector.shape_cast %169 : vector<16x16xf32> to vector<2x8x16xf32>
    %171 = arith.truncf %170 : vector<2x8x16xf32> to vector<2x8x16xbf16>
    %172 = vector.extract_strided_slice %57 {offsets = [0, 320], sizes = [16, 16], strides = [1, 1]} : vector<16x384xf32> to vector<16x16xf32>
    %173 = vector.shape_cast %172 : vector<16x16xf32> to vector<2x8x16xf32>
    %174 = arith.truncf %173 : vector<2x8x16xf32> to vector<2x8x16xbf16>
    "tpu.trace_start"() <{level = 10 : i32, message = "bqd,bkd->bqk"}> : () -> ()
    %cst_56 = arith.constant dense<0.000000e+00> : vector<2x8x8xf32>
    %175 = tpu.matmul %168, %171, %cst_56 {dimension_numbers = #tpu.dot_dimension_numbers<[2], [2], [1], [1], [0, 0, 0, 1, 1, 1], [0], [0]>} : vector<2x8x16xbf16>, vector<2x8x16xbf16>, vector<2x8x8xf32> -> vector<2x8x8xf32>
    "tpu.trace_stop"() : () -> ()
    %cst_57 = arith.constant 2.500000e-01 : f32
    %176 = vector.broadcast %cst_57 : f32 to vector<2x8x8xf32>
    %177 = arith.mulf %175, %176 : vector<2x8x8xf32>
    %178 = vector.broadcast %49 : vector<2x1x8xf32> to vector<2x8x8xf32>
    %179 = arith.addf %177, %178 : vector<2x8x8xf32>
    %cst_58 = arith.constant dense<0xFF800000> : vector<2x8xf32>
    %180 = vector.multi_reduction <maximumf>, %179, %cst_58 [2] : vector<2x8x8xf32> to vector<2x8xf32>
    %181 = vector.shape_cast %180 : vector<2x8xf32> to vector<2x8x1xf32>
    %182 = vector.broadcast %181 : vector<2x8x1xf32> to vector<2x8x8xf32>
    %183 = arith.subf %179, %182 : vector<2x8x8xf32>
    %184 = math.exp %183 : vector<2x8x8xf32>
    %cst_59 = arith.constant dense<0.000000e+00> : vector<2x8xf32>
    %185 = vector.multi_reduction <add>, %184, %cst_59 [2] : vector<2x8x8xf32> to vector<2x8xf32>
    %186 = vector.shape_cast %185 : vector<2x8xf32> to vector<2x8x1xf32>
    %187 = vector.broadcast %186 : vector<2x8x1xf32> to vector<2x8x8xf32>
    %188 = arith.divf %184, %187 : vector<2x8x8xf32>
    %189 = arith.truncf %188 : vector<2x8x8xf32> to vector<2x8x8xbf16>
    "tpu.trace_start"() <{level = 10 : i32, message = "bqk,bkd->bqd"}> : () -> ()
    %cst_60 = arith.constant dense<0.000000e+00> : vector<2x8x16xf32>
    %190 = tpu.matmul %189, %174, %cst_60 {dimension_numbers = #tpu.dot_dimension_numbers<[2], [1], [1], [2], [0, 0, 0, 1, 1, 2], [0], [0]>} : vector<2x8x8xbf16>, vector<2x8x16xbf16>, vector<2x8x16xf32> -> vector<2x8x16xf32>
    "tpu.trace_stop"() : () -> ()
    %191 = vector.shape_cast %190 : vector<2x8x16xf32> to vector<16x16xf32>
    %c0_61 = arith.constant 0 : index
    %c64 = arith.constant 64 : index
    %192 = vector.load %arg25[%c0_61, %c64] : memref<16x128xf32, #tpu.memory_space<vmem>>, vector<16x16xf32>
    tpu.vector_store %arg25[%c0_61, %c64], %191 {strides = array<i32>} : memref<16x128xf32, #tpu.memory_space<vmem>>, vector<16x16xf32>,
    %193 = vector.extract_strided_slice %57 {offsets = [0, 80], sizes = [16, 16], strides = [1, 1]} : vector<16x384xf32> to vector<16x16xf32>
    %194 = vector.shape_cast %193 : vector<16x16xf32> to vector<2x8x16xf32>
    %195 = arith.truncf %194 : vector<2x8x16xf32> to vector<2x8x16xbf16>
    %196 = vector.extract_strided_slice %57 {offsets = [0, 208], sizes = [16, 16], strides = [1, 1]} : vector<16x384xf32> to vector<16x16xf32>
    %197 = vector.shape_cast %196 : vector<16x16xf32> to vector<2x8x16xf32>
    %198 = arith.truncf %197 : vector<2x8x16xf32> to vector<2x8x16xbf16>
    %199 = vector.extract_strided_slice %57 {offsets = [0, 336], sizes = [16, 16], strides = [1, 1]} : vector<16x384xf32> to vector<16x16xf32>
    %200 = vector.shape_cast %199 : vector<16x16xf32> to vector<2x8x16xf32>
    %201 = arith.truncf %200 : vector<2x8x16xf32> to vector<2x8x16xbf16>
    "tpu.trace_start"() <{level = 10 : i32, message = "bqd,bkd->bqk"}> : () -> ()
    %cst_62 = arith.constant dense<0.000000e+00> : vector<2x8x8xf32>
    %202 = tpu.matmul %195, %198, %cst_62 {dimension_numbers = #tpu.dot_dimension_numbers<[2], [2], [1], [1], [0, 0, 0, 1, 1, 1], [0], [0]>} : vector<2x8x16xbf16>, vector<2x8x16xbf16>, vector<2x8x8xf32> -> vector<2x8x8xf32>
    "tpu.trace_stop"() : () -> ()
    %cst_63 = arith.constant 2.500000e-01 : f32
    %203 = vector.broadcast %cst_63 : f32 to vector<2x8x8xf32>
    %204 = arith.mulf %202, %203 : vector<2x8x8xf32>
    %205 = vector.broadcast %49 : vector<2x1x8xf32> to vector<2x8x8xf32>
    %206 = arith.addf %204, %205 : vector<2x8x8xf32>
    %cst_64 = arith.constant dense<0xFF800000> : vector<2x8xf32>
    %207 = vector.multi_reduction <maximumf>, %206, %cst_64 [2] : vector<2x8x8xf32> to vector<2x8xf32>
    %208 = vector.shape_cast %207 : vector<2x8xf32> to vector<2x8x1xf32>
    %209 = vector.broadcast %208 : vector<2x8x1xf32> to vector<2x8x8xf32>
    %210 = arith.subf %206, %209 : vector<2x8x8xf32>
    %211 = math.exp %210 : vector<2x8x8xf32>
    %cst_65 = arith.constant dense<0.000000e+00> : vector<2x8xf32>
    %212 = vector.multi_reduction <add>, %211, %cst_65 [2] : vector<2x8x8xf32> to vector<2x8xf32>
    %213 = vector.shape_cast %212 : vector<2x8xf32> to vector<2x8x1xf32>
    %214 = vector.broadcast %213 : vector<2x8x1xf32> to vector<2x8x8xf32>
    %215 = arith.divf %211, %214 : vector<2x8x8xf32>
    %216 = arith.truncf %215 : vector<2x8x8xf32> to vector<2x8x8xbf16>
    "tpu.trace_start"() <{level = 10 : i32, message = "bqk,bkd->bqd"}> : () -> ()
    %cst_66 = arith.constant dense<0.000000e+00> : vector<2x8x16xf32>
    %217 = tpu.matmul %216, %201, %cst_66 {dimension_numbers = #tpu.dot_dimension_numbers<[2], [1], [1], [2], [0, 0, 0, 1, 1, 2], [0], [0]>} : vector<2x8x8xbf16>, vector<2x8x16xbf16>, vector<2x8x16xf32> -> vector<2x8x16xf32>
    "tpu.trace_stop"() : () -> ()
    %218 = vector.shape_cast %217 : vector<2x8x16xf32> to vector<16x16xf32>
    %c0_67 = arith.constant 0 : index
    %c80 = arith.constant 80 : index
    %219 = vector.load %arg25[%c0_67, %c80] : memref<16x128xf32, #tpu.memory_space<vmem>>, vector<16x16xf32>
    tpu.vector_store %arg25[%c0_67, %c80], %218 {strides = array<i32>} : memref<16x128xf32, #tpu.memory_space<vmem>>, vector<16x16xf32>,
    %220 = vector.extract_strided_slice %57 {offsets = [0, 96], sizes = [16, 16], strides = [1, 1]} : vector<16x384xf32> to vector<16x16xf32>
    %221 = vector.shape_cast %220 : vector<16x16xf32> to vector<2x8x16xf32>
    %222 = arith.truncf %221 : vector<2x8x16xf32> to vector<2x8x16xbf16>
    %223 = vector.extract_strided_slice %57 {offsets = [0, 224], sizes = [16, 16], strides = [1, 1]} : vector<16x384xf32> to vector<16x16xf32>
    %224 = vector.shape_cast %223 : vector<16x16xf32> to vector<2x8x16xf32>
    %225 = arith.truncf %224 : vector<2x8x16xf32> to vector<2x8x16xbf16>
    %226 = vector.extract_strided_slice %57 {offsets = [0, 352], sizes = [16, 16], strides = [1, 1]} : vector<16x384xf32> to vector<16x16xf32>
    %227 = vector.shape_cast %226 : vector<16x16xf32> to vector<2x8x16xf32>
    %228 = arith.truncf %227 : vector<2x8x16xf32> to vector<2x8x16xbf16>
    "tpu.trace_start"() <{level = 10 : i32, message = "bqd,bkd->bqk"}> : () -> ()
    %cst_68 = arith.constant dense<0.000000e+00> : vector<2x8x8xf32>
    %229 = tpu.matmul %222, %225, %cst_68 {dimension_numbers = #tpu.dot_dimension_numbers<[2], [2], [1], [1], [0, 0, 0, 1, 1, 1], [0], [0]>} : vector<2x8x16xbf16>, vector<2x8x16xbf16>, vector<2x8x8xf32> -> vector<2x8x8xf32>
    "tpu.trace_stop"() : () -> ()
    %cst_69 = arith.constant 2.500000e-01 : f32
    %230 = vector.broadcast %cst_69 : f32 to vector<2x8x8xf32>
    %231 = arith.mulf %229, %230 : vector<2x8x8xf32>
    %232 = vector.broadcast %49 : vector<2x1x8xf32> to vector<2x8x8xf32>
    %233 = arith.addf %231, %232 : vector<2x8x8xf32>
    %cst_70 = arith.constant dense<0xFF800000> : vector<2x8xf32>
    %234 = vector.multi_reduction <maximumf>, %233, %cst_70 [2] : vector<2x8x8xf32> to vector<2x8xf32>
    %235 = vector.shape_cast %234 : vector<2x8xf32> to vector<2x8x1xf32>
    %236 = vector.broadcast %235 : vector<2x8x1xf32> to vector<2x8x8xf32>
    %237 = arith.subf %233, %236 : vector<2x8x8xf32>
    %238 = math.exp %237 : vector<2x8x8xf32>
    %cst_71 = arith.constant dense<0.000000e+00> : vector<2x8xf32>
    %239 = vector.multi_reduction <add>, %238, %cst_71 [2] : vector<2x8x8xf32> to vector<2x8xf32>
    %240 = vector.shape_cast %239 : vector<2x8xf32> to vector<2x8x1xf32>
    %241 = vector.broadcast %240 : vector<2x8x1xf32> to vector<2x8x8xf32>
    %242 = arith.divf %238, %241 : vector<2x8x8xf32>
    %243 = arith.truncf %242 : vector<2x8x8xf32> to vector<2x8x8xbf16>
    "tpu.trace_start"() <{level = 10 : i32, message = "bqk,bkd->bqd"}> : () -> ()
    %cst_72 = arith.constant dense<0.000000e+00> : vector<2x8x16xf32>
    %244 = tpu.matmul %243, %228, %cst_72 {dimension_numbers = #tpu.dot_dimension_numbers<[2], [1], [1], [2], [0, 0, 0, 1, 1, 2], [0], [0]>} : vector<2x8x8xbf16>, vector<2x8x16xbf16>, vector<2x8x16xf32> -> vector<2x8x16xf32>
    "tpu.trace_stop"() : () -> ()
    %245 = vector.shape_cast %244 : vector<2x8x16xf32> to vector<16x16xf32>
    %c0_73 = arith.constant 0 : index
    %c96 = arith.constant 96 : index
    %246 = vector.load %arg25[%c0_73, %c96] : memref<16x128xf32, #tpu.memory_space<vmem>>, vector<16x16xf32>
    tpu.vector_store %arg25[%c0_73, %c96], %245 {strides = array<i32>} : memref<16x128xf32, #tpu.memory_space<vmem>>, vector<16x16xf32>,
    %247 = vector.extract_strided_slice %57 {offsets = [0, 112], sizes = [16, 16], strides = [1, 1]} : vector<16x384xf32> to vector<16x16xf32>
    %248 = vector.shape_cast %247 : vector<16x16xf32> to vector<2x8x16xf32>
    %249 = arith.truncf %248 : vector<2x8x16xf32> to vector<2x8x16xbf16>
    %250 = vector.extract_strided_slice %57 {offsets = [0, 240], sizes = [16, 16], strides = [1, 1]} : vector<16x384xf32> to vector<16x16xf32>
    %251 = vector.shape_cast %250 : vector<16x16xf32> to vector<2x8x16xf32>
    %252 = arith.truncf %251 : vector<2x8x16xf32> to vector<2x8x16xbf16>
    %253 = vector.extract_strided_slice %57 {offsets = [0, 368], sizes = [16, 16], strides = [1, 1]} : vector<16x384xf32> to vector<16x16xf32>
    %254 = vector.shape_cast %253 : vector<16x16xf32> to vector<2x8x16xf32>
    %255 = arith.truncf %254 : vector<2x8x16xf32> to vector<2x8x16xbf16>
    "tpu.trace_start"() <{level = 10 : i32, message = "bqd,bkd->bqk"}> : () -> ()
    %cst_74 = arith.constant dense<0.000000e+00> : vector<2x8x8xf32>
    %256 = tpu.matmul %249, %252, %cst_74 {dimension_numbers = #tpu.dot_dimension_numbers<[2], [2], [1], [1], [0, 0, 0, 1, 1, 1], [0], [0]>} : vector<2x8x16xbf16>, vector<2x8x16xbf16>, vector<2x8x8xf32> -> vector<2x8x8xf32>
    "tpu.trace_stop"() : () -> ()
    %cst_75 = arith.constant 2.500000e-01 : f32
    %257 = vector.broadcast %cst_75 : f32 to vector<2x8x8xf32>
    %258 = arith.mulf %256, %257 : vector<2x8x8xf32>
    %259 = vector.broadcast %49 : vector<2x1x8xf32> to vector<2x8x8xf32>
    %260 = arith.addf %258, %259 : vector<2x8x8xf32>
    %cst_76 = arith.constant dense<0xFF800000> : vector<2x8xf32>
    %261 = vector.multi_reduction <maximumf>, %260, %cst_76 [2] : vector<2x8x8xf32> to vector<2x8xf32>
    %262 = vector.shape_cast %261 : vector<2x8xf32> to vector<2x8x1xf32>
    %263 = vector.broadcast %262 : vector<2x8x1xf32> to vector<2x8x8xf32>
    %264 = arith.subf %260, %263 : vector<2x8x8xf32>
    %265 = math.exp %264 : vector<2x8x8xf32>
    %cst_77 = arith.constant dense<0.000000e+00> : vector<2x8xf32>
    %266 = vector.multi_reduction <add>, %265, %cst_77 [2] : vector<2x8x8xf32> to vector<2x8xf32>
    %267 = vector.shape_cast %266 : vector<2x8xf32> to vector<2x8x1xf32>
    %268 = vector.broadcast %267 : vector<2x8x1xf32> to vector<2x8x8xf32>
    %269 = arith.divf %265, %268 : vector<2x8x8xf32>
    %270 = arith.truncf %269 : vector<2x8x8xf32> to vector<2x8x8xbf16>
    "tpu.trace_start"() <{level = 10 : i32, message = "bqk,bkd->bqd"}> : () -> ()
    %cst_78 = arith.constant dense<0.000000e+00> : vector<2x8x16xf32>
    %271 = tpu.matmul %270, %255, %cst_78 {dimension_numbers = #tpu.dot_dimension_numbers<[2], [1], [1], [2], [0, 0, 0, 1, 1, 2], [0], [0]>} : vector<2x8x8xbf16>, vector<2x8x16xbf16>, vector<2x8x16xf32> -> vector<2x8x16xf32>
    "tpu.trace_stop"() : () -> ()
    %272 = vector.shape_cast %271 : vector<2x8x16xf32> to vector<16x16xf32>
    %c0_79 = arith.constant 0 : index
    %c112 = arith.constant 112 : index
    %273 = vector.load %arg25[%c0_79, %c112] : memref<16x128xf32, #tpu.memory_space<vmem>>, vector<16x16xf32>
    tpu.vector_store %arg25[%c0_79, %c112], %272 {strides = array<i32>} : memref<16x128xf32, #tpu.memory_space<vmem>>, vector<16x16xf32>,
    %c0_80 = arith.constant 0 : index
    %c0_81 = arith.constant 0 : index
    %274 = vector.load %arg25[%c0_80, %c0_81] : memref<16x128xf32, #tpu.memory_space<vmem>>, vector<16x128xf32>
    %275 = arith.truncf %274 : vector<16x128xf32> to vector<16x128xbf16>
    %c0_82 = arith.constant 0 : index
    %c0_83 = arith.constant 0 : index
    %c0_84 = arith.constant 0 : index
    %276 = vector.load %arg11[%c0_82, %c0_83, %c0_84] : memref<2x128x128xbf16, #tpu.memory_space<vmem>>, vector<1x128x128xbf16>
    %277 = vector.shape_cast %276 : vector<1x128x128xbf16> to vector<128x128xbf16>
    %cst_85 = arith.constant dense<0.000000e+00> : vector<16x128xf32>
    %278 = tpu.matmul %275, %277, %cst_85 {dimension_numbers = #tpu.dot_dimension_numbers<[1], [0], [0], [1], [0, 0, 1, 1], [], []>} : vector<16x128xbf16>, vector<128x128xbf16>, vector<16x128xf32> -> vector<16x128xf32>
    %c0_86 = arith.constant 0 : index
    %c0_87 = arith.constant 0 : index
    %c0_88 = arith.constant 0 : index
    %279 = vector.load %arg12[%c0_86, %c0_87, %c0_88] : memref<2x1x128xf32, #tpu.memory_space<vmem>>, vector<1x1x128xf32>
    %280 = vector.shape_cast %279 : vector<1x1x128xf32> to vector<1x128xf32>
    %281 = vector.broadcast %280 : vector<1x128xf32> to vector<16x128xf32>
    %282 = arith.addf %278, %281 : vector<16x128xf32>
    %283 = arith.addf %43, %282 : vector<16x128xf32>
    %c0_89 = arith.constant 0 : index
    %c0_90 = arith.constant 0 : index
    %c0_91 = arith.constant 0 : index
    %284 = vector.load %arg13[%c0_89, %c0_90, %c0_91] : memref<2x1x128xf32, #tpu.memory_space<vmem>>, vector<1x1x128xf32>
    %285 = vector.shape_cast %284 : vector<1x1x128xf32> to vector<1x128xf32>
    %c0_92 = arith.constant 0 : index
    %c0_93 = arith.constant 0 : index
    %c0_94 = arith.constant 0 : index
    %286 = vector.load %arg14[%c0_92, %c0_93, %c0_94] : memref<2x1x128xf32, #tpu.memory_space<vmem>>, vector<1x1x128xf32>
    %287 = vector.shape_cast %286 : vector<1x1x128xf32> to vector<1x128xf32>
    %cst_95 = arith.constant dense<0.000000e+00> : vector<16xf32>
    %288 = vector.multi_reduction <add>, %283, %cst_95 [1] : vector<16x128xf32> to vector<16xf32>
    %289 = vector.shape_cast %288 : vector<16xf32> to vector<16x1xf32>
    %cst_96 = arith.constant 1.280000e+02 : f32
    %290 = vector.broadcast %cst_96 : f32 to vector<16x1xf32>
    %291 = arith.divf %289, %290 : vector<16x1xf32>
    %292 = vector.broadcast %291 : vector<16x1xf32> to vector<16x128xf32>
    %293 = arith.subf %283, %292 : vector<16x128xf32>
    %294 = arith.mulf %293, %293 : vector<16x128xf32>
    %cst_97 = arith.constant dense<0.000000e+00> : vector<16xf32>
    %295 = vector.multi_reduction <add>, %294, %cst_97 [1] : vector<16x128xf32> to vector<16xf32>
    %296 = vector.shape_cast %295 : vector<16xf32> to vector<16x1xf32>
    %cst_98 = arith.constant 1.280000e+02 : f32
    %297 = vector.broadcast %cst_98 : f32 to vector<16x1xf32>
    %298 = arith.divf %296, %297 : vector<16x1xf32>
    %299 = vector.broadcast %291 : vector<16x1xf32> to vector<16x128xf32>
    %300 = arith.subf %283, %299 : vector<16x128xf32>
    %cst_99 = arith.constant 9.99999974E-6 : f32
    %301 = vector.broadcast %cst_99 : f32 to vector<16x1xf32>
    %302 = arith.addf %298, %301 : vector<16x1xf32>
    %303 = math.rsqrt %302 : vector<16x1xf32>
    %304 = vector.broadcast %303 : vector<16x1xf32> to vector<16x128xf32>
    %305 = arith.mulf %300, %304 : vector<16x128xf32>
    %306 = vector.broadcast %285 : vector<1x128xf32> to vector<16x128xf32>
    %307 = arith.mulf %305, %306 : vector<16x128xf32>
    %308 = vector.broadcast %287 : vector<1x128xf32> to vector<16x128xf32>
    %309 = arith.addf %307, %308 : vector<16x128xf32>
    %310 = arith.truncf %309 : vector<16x128xf32> to vector<16x128xbf16>
    %c0_100 = arith.constant 0 : index
    %c0_101 = arith.constant 0 : index
    %c0_102 = arith.constant 0 : index
    %311 = vector.load %arg15[%c0_100, %c0_101, %c0_102] : memref<2x128x512xbf16, #tpu.memory_space<vmem>>, vector<1x128x512xbf16>
    %312 = vector.shape_cast %311 : vector<1x128x512xbf16> to vector<128x512xbf16>
    %cst_103 = arith.constant dense<0.000000e+00> : vector<16x512xf32>
    %313 = tpu.matmul %310, %312, %cst_103 {dimension_numbers = #tpu.dot_dimension_numbers<[1], [0], [0], [1], [0, 0, 1, 1], [], []>} : vector<16x128xbf16>, vector<128x512xbf16>, vector<16x512xf32> -> vector<16x512xf32>
    %c0_104 = arith.constant 0 : index
    %c0_105 = arith.constant 0 : index
    %c0_106 = arith.constant 0 : index
    %314 = vector.load %arg16[%c0_104, %c0_105, %c0_106] : memref<2x1x512xf32, #tpu.memory_space<vmem>>, vector<1x1x512xf32>
    %315 = vector.shape_cast %314 : vector<1x1x512xf32> to vector<1x512xf32>
    %316 = vector.broadcast %315 : vector<1x512xf32> to vector<16x512xf32>
    %317 = arith.addf %313, %316 : vector<16x512xf32>
    %cst_107 = arith.constant 5.000000e-01 : f32
    %318 = vector.broadcast %cst_107 : f32 to vector<16x512xf32>
    %319 = arith.mulf %318, %317 : vector<16x512xf32>
    %cst_108 = arith.constant 0.707106769 : f32
    %320 = vector.broadcast %cst_108 : f32 to vector<16x512xf32>
    %321 = arith.mulf %317, %320 : vector<16x512xf32>
    %322 = math.erf %321 : vector<16x512xf32>
    %cst_109 = arith.constant 1.000000e+00 : f32
    %323 = vector.broadcast %cst_109 : f32 to vector<16x512xf32>
    %324 = arith.addf %323, %322 : vector<16x512xf32>
    %325 = arith.mulf %319, %324 : vector<16x512xf32>
    %326 = arith.truncf %325 : vector<16x512xf32> to vector<16x512xbf16>
    %c0_110 = arith.constant 0 : index
    %c0_111 = arith.constant 0 : index
    %c0_112 = arith.constant 0 : index
    %327 = vector.load %arg17[%c0_110, %c0_111, %c0_112] : memref<2x512x128xbf16, #tpu.memory_space<vmem>>, vector<1x512x128xbf16>
    %328 = vector.shape_cast %327 : vector<1x512x128xbf16> to vector<512x128xbf16>
    %cst_113 = arith.constant dense<0.000000e+00> : vector<16x128xf32>
    %329 = tpu.matmul %326, %328, %cst_113 {dimension_numbers = #tpu.dot_dimension_numbers<[1], [0], [0], [1], [0, 0, 1, 1], [], []>} : vector<16x512xbf16>, vector<512x128xbf16>, vector<16x128xf32> -> vector<16x128xf32>
    %c0_114 = arith.constant 0 : index
    %c0_115 = arith.constant 0 : index
    %c0_116 = arith.constant 0 : index
    %330 = vector.load %arg18[%c0_114, %c0_115, %c0_116] : memref<2x1x128xf32, #tpu.memory_space<vmem>>, vector<1x1x128xf32>
    %331 = vector.shape_cast %330 : vector<1x1x128xf32> to vector<1x128xf32>
    %332 = vector.broadcast %331 : vector<1x128xf32> to vector<16x128xf32>
    %333 = arith.addf %329, %332 : vector<16x128xf32>
    %334 = arith.addf %309, %333 : vector<16x128xf32>
    %c0_117 = arith.constant 0 : index
    %c0_118 = arith.constant 0 : index
    %c0_119 = arith.constant 0 : index
    %335 = vector.load %arg19[%c0_117, %c0_118, %c0_119] : memref<2x1x128xf32, #tpu.memory_space<vmem>>, vector<1x1x128xf32>
    %336 = vector.shape_cast %335 : vector<1x1x128xf32> to vector<1x128xf32>
    %c0_120 = arith.constant 0 : index
    %c0_121 = arith.constant 0 : index
    %c0_122 = arith.constant 0 : index
    %337 = vector.load %arg20[%c0_120, %c0_121, %c0_122] : memref<2x1x128xf32, #tpu.memory_space<vmem>>, vector<1x1x128xf32>
    %338 = vector.shape_cast %337 : vector<1x1x128xf32> to vector<1x128xf32>
    %cst_123 = arith.constant dense<0.000000e+00> : vector<16xf32>
    %339 = vector.multi_reduction <add>, %334, %cst_123 [1] : vector<16x128xf32> to vector<16xf32>
    %340 = vector.shape_cast %339 : vector<16xf32> to vector<16x1xf32>
    %cst_124 = arith.constant 1.280000e+02 : f32
    %341 = vector.broadcast %cst_124 : f32 to vector<16x1xf32>
    %342 = arith.divf %340, %341 : vector<16x1xf32>
    %343 = vector.broadcast %342 : vector<16x1xf32> to vector<16x128xf32>
    %344 = arith.subf %334, %343 : vector<16x128xf32>
    %345 = arith.mulf %344, %344 : vector<16x128xf32>
    %cst_125 = arith.constant dense<0.000000e+00> : vector<16xf32>
    %346 = vector.multi_reduction <add>, %345, %cst_125 [1] : vector<16x128xf32> to vector<16xf32>
    %347 = vector.shape_cast %346 : vector<16xf32> to vector<16x1xf32>
    %cst_126 = arith.constant 1.280000e+02 : f32
    %348 = vector.broadcast %cst_126 : f32 to vector<16x1xf32>
    %349 = arith.divf %347, %348 : vector<16x1xf32>
    %350 = vector.broadcast %342 : vector<16x1xf32> to vector<16x128xf32>
    %351 = arith.subf %334, %350 : vector<16x128xf32>
    %cst_127 = arith.constant 9.99999974E-6 : f32
    %352 = vector.broadcast %cst_127 : f32 to vector<16x1xf32>
    %353 = arith.addf %349, %352 : vector<16x1xf32>
    %354 = math.rsqrt %353 : vector<16x1xf32>
    %355 = vector.broadcast %354 : vector<16x1xf32> to vector<16x128xf32>
    %356 = arith.mulf %351, %355 : vector<16x128xf32>
    %357 = vector.broadcast %336 : vector<1x128xf32> to vector<16x128xf32>
    %358 = arith.mulf %356, %357 : vector<16x128xf32>
    %359 = vector.broadcast %338 : vector<1x128xf32> to vector<16x128xf32>
    %360 = arith.addf %358, %359 : vector<16x128xf32>
    %361 = arith.truncf %360 : vector<16x128xf32> to vector<16x128xbf16>
    %c1 = arith.constant 1 : index
    %c0_128 = arith.constant 0 : index
    %c0_129 = arith.constant 0 : index
    %362 = vector.load %arg9[%c1, %c0_128, %c0_129] : memref<2x128x384xbf16, #tpu.memory_space<vmem>>, vector<1x128x384xbf16>
    %363 = vector.shape_cast %362 : vector<1x128x384xbf16> to vector<128x384xbf16>
    %cst_130 = arith.constant dense<0.000000e+00> : vector<16x384xf32>
    %364 = tpu.matmul %361, %363, %cst_130 {dimension_numbers = #tpu.dot_dimension_numbers<[1], [0], [0], [1], [0, 0, 1, 1], [], []>} : vector<16x128xbf16>, vector<128x384xbf16>, vector<16x384xf32> -> vector<16x384xf32>
    %c1_131 = arith.constant 1 : index
    %c0_132 = arith.constant 0 : index
    %c0_133 = arith.constant 0 : index
    %365 = vector.load %arg10[%c1_131, %c0_132, %c0_133] : memref<2x1x384xf32, #tpu.memory_space<vmem>>, vector<1x1x384xf32>
    %366 = vector.shape_cast %365 : vector<1x1x384xf32> to vector<1x384xf32>
    %367 = vector.broadcast %366 : vector<1x384xf32> to vector<16x384xf32>
    %368 = arith.addf %364, %367 : vector<16x384xf32>
    %369 = vector.extract_strided_slice %368 {offsets = [0, 0], sizes = [16, 16], strides = [1, 1]} : vector<16x384xf32> to vector<16x16xf32>
    %370 = vector.shape_cast %369 : vector<16x16xf32> to vector<2x8x16xf32>
    %371 = arith.truncf %370 : vector<2x8x16xf32> to vector<2x8x16xbf16>
    %372 = vector.extract_strided_slice %368 {offsets = [0, 128], sizes = [16, 16], strides = [1, 1]} : vector<16x384xf32> to vector<16x16xf32>
    %373 = vector.shape_cast %372 : vector<16x16xf32> to vector<2x8x16xf32>
    %374 = arith.truncf %373 : vector<2x8x16xf32> to vector<2x8x16xbf16>
    %375 = vector.extract_strided_slice %368 {offsets = [0, 256], sizes = [16, 16], strides = [1, 1]} : vector<16x384xf32> to vector<16x16xf32>
    %376 = vector.shape_cast %375 : vector<16x16xf32> to vector<2x8x16xf32>
    %377 = arith.truncf %376 : vector<2x8x16xf32> to vector<2x8x16xbf16>
    "tpu.trace_start"() <{level = 10 : i32, message = "bqd,bkd->bqk"}> : () -> ()
    %cst_134 = arith.constant dense<0.000000e+00> : vector<2x8x8xf32>
    %378 = tpu.matmul %371, %374, %cst_134 {dimension_numbers = #tpu.dot_dimension_numbers<[2], [2], [1], [1], [0, 0, 0, 1, 1, 1], [0], [0]>} : vector<2x8x16xbf16>, vector<2x8x16xbf16>, vector<2x8x8xf32> -> vector<2x8x8xf32>
    "tpu.trace_stop"() : () -> ()
    %cst_135 = arith.constant 2.500000e-01 : f32
    %379 = vector.broadcast %cst_135 : f32 to vector<2x8x8xf32>
    %380 = arith.mulf %378, %379 : vector<2x8x8xf32>
    %381 = vector.broadcast %49 : vector<2x1x8xf32> to vector<2x8x8xf32>
    %382 = arith.addf %380, %381 : vector<2x8x8xf32>
    %cst_136 = arith.constant dense<0xFF800000> : vector<2x8xf32>
    %383 = vector.multi_reduction <maximumf>, %382, %cst_136 [2] : vector<2x8x8xf32> to vector<2x8xf32>
    %384 = vector.shape_cast %383 : vector<2x8xf32> to vector<2x8x1xf32>
    %385 = vector.broadcast %384 : vector<2x8x1xf32> to vector<2x8x8xf32>
    %386 = arith.subf %382, %385 : vector<2x8x8xf32>
    %387 = math.exp %386 : vector<2x8x8xf32>
    %cst_137 = arith.constant dense<0.000000e+00> : vector<2x8xf32>
    %388 = vector.multi_reduction <add>, %387, %cst_137 [2] : vector<2x8x8xf32> to vector<2x8xf32>
    %389 = vector.shape_cast %388 : vector<2x8xf32> to vector<2x8x1xf32>
    %390 = vector.broadcast %389 : vector<2x8x1xf32> to vector<2x8x8xf32>
    %391 = arith.divf %387, %390 : vector<2x8x8xf32>
    %392 = arith.truncf %391 : vector<2x8x8xf32> to vector<2x8x8xbf16>
    "tpu.trace_start"() <{level = 10 : i32, message = "bqk,bkd->bqd"}> : () -> ()
    %cst_138 = arith.constant dense<0.000000e+00> : vector<2x8x16xf32>
    %393 = tpu.matmul %392, %377, %cst_138 {dimension_numbers = #tpu.dot_dimension_numbers<[2], [1], [1], [2], [0, 0, 0, 1, 1, 2], [0], [0]>} : vector<2x8x8xbf16>, vector<2x8x16xbf16>, vector<2x8x16xf32> -> vector<2x8x16xf32>
    "tpu.trace_stop"() : () -> ()
    %394 = vector.shape_cast %393 : vector<2x8x16xf32> to vector<16x16xf32>
    %c0_139 = arith.constant 0 : index
    %c0_140 = arith.constant 0 : index
    %395 = vector.load %arg25[%c0_139, %c0_140] : memref<16x128xf32, #tpu.memory_space<vmem>>, vector<16x16xf32>
    tpu.vector_store %arg25[%c0_139, %c0_140], %394 {strides = array<i32>} : memref<16x128xf32, #tpu.memory_space<vmem>>, vector<16x16xf32>,
    %396 = vector.extract_strided_slice %368 {offsets = [0, 16], sizes = [16, 16], strides = [1, 1]} : vector<16x384xf32> to vector<16x16xf32>
    %397 = vector.shape_cast %396 : vector<16x16xf32> to vector<2x8x16xf32>
    %398 = arith.truncf %397 : vector<2x8x16xf32> to vector<2x8x16xbf16>
    %399 = vector.extract_strided_slice %368 {offsets = [0, 144], sizes = [16, 16], strides = [1, 1]} : vector<16x384xf32> to vector<16x16xf32>
    %400 = vector.shape_cast %399 : vector<16x16xf32> to vector<2x8x16xf32>
    %401 = arith.truncf %400 : vector<2x8x16xf32> to vector<2x8x16xbf16>
    %402 = vector.extract_strided_slice %368 {offsets = [0, 272], sizes = [16, 16], strides = [1, 1]} : vector<16x384xf32> to vector<16x16xf32>
    %403 = vector.shape_cast %402 : vector<16x16xf32> to vector<2x8x16xf32>
    %404 = arith.truncf %403 : vector<2x8x16xf32> to vector<2x8x16xbf16>
    "tpu.trace_start"() <{level = 10 : i32, message = "bqd,bkd->bqk"}> : () -> ()
    %cst_141 = arith.constant dense<0.000000e+00> : vector<2x8x8xf32>
    %405 = tpu.matmul %398, %401, %cst_141 {dimension_numbers = #tpu.dot_dimension_numbers<[2], [2], [1], [1], [0, 0, 0, 1, 1, 1], [0], [0]>} : vector<2x8x16xbf16>, vector<2x8x16xbf16>, vector<2x8x8xf32> -> vector<2x8x8xf32>
    "tpu.trace_stop"() : () -> ()
    %cst_142 = arith.constant 2.500000e-01 : f32
    %406 = vector.broadcast %cst_142 : f32 to vector<2x8x8xf32>
    %407 = arith.mulf %405, %406 : vector<2x8x8xf32>
    %408 = vector.broadcast %49 : vector<2x1x8xf32> to vector<2x8x8xf32>
    %409 = arith.addf %407, %408 : vector<2x8x8xf32>
    %cst_143 = arith.constant dense<0xFF800000> : vector<2x8xf32>
    %410 = vector.multi_reduction <maximumf>, %409, %cst_143 [2] : vector<2x8x8xf32> to vector<2x8xf32>
    %411 = vector.shape_cast %410 : vector<2x8xf32> to vector<2x8x1xf32>
    %412 = vector.broadcast %411 : vector<2x8x1xf32> to vector<2x8x8xf32>
    %413 = arith.subf %409, %412 : vector<2x8x8xf32>
    %414 = math.exp %413 : vector<2x8x8xf32>
    %cst_144 = arith.constant dense<0.000000e+00> : vector<2x8xf32>
    %415 = vector.multi_reduction <add>, %414, %cst_144 [2] : vector<2x8x8xf32> to vector<2x8xf32>
    %416 = vector.shape_cast %415 : vector<2x8xf32> to vector<2x8x1xf32>
    %417 = vector.broadcast %416 : vector<2x8x1xf32> to vector<2x8x8xf32>
    %418 = arith.divf %414, %417 : vector<2x8x8xf32>
    %419 = arith.truncf %418 : vector<2x8x8xf32> to vector<2x8x8xbf16>
    "tpu.trace_start"() <{level = 10 : i32, message = "bqk,bkd->bqd"}> : () -> ()
    %cst_145 = arith.constant dense<0.000000e+00> : vector<2x8x16xf32>
    %420 = tpu.matmul %419, %404, %cst_145 {dimension_numbers = #tpu.dot_dimension_numbers<[2], [1], [1], [2], [0, 0, 0, 1, 1, 2], [0], [0]>} : vector<2x8x8xbf16>, vector<2x8x16xbf16>, vector<2x8x16xf32> -> vector<2x8x16xf32>
    "tpu.trace_stop"() : () -> ()
    %421 = vector.shape_cast %420 : vector<2x8x16xf32> to vector<16x16xf32>
    %c0_146 = arith.constant 0 : index
    %c16_147 = arith.constant 16 : index
    %422 = vector.load %arg25[%c0_146, %c16_147] : memref<16x128xf32, #tpu.memory_space<vmem>>, vector<16x16xf32>
    tpu.vector_store %arg25[%c0_146, %c16_147], %421 {strides = array<i32>} : memref<16x128xf32, #tpu.memory_space<vmem>>, vector<16x16xf32>,
    %423 = vector.extract_strided_slice %368 {offsets = [0, 32], sizes = [16, 16], strides = [1, 1]} : vector<16x384xf32> to vector<16x16xf32>
    %424 = vector.shape_cast %423 : vector<16x16xf32> to vector<2x8x16xf32>
    %425 = arith.truncf %424 : vector<2x8x16xf32> to vector<2x8x16xbf16>
    %426 = vector.extract_strided_slice %368 {offsets = [0, 160], sizes = [16, 16], strides = [1, 1]} : vector<16x384xf32> to vector<16x16xf32>
    %427 = vector.shape_cast %426 : vector<16x16xf32> to vector<2x8x16xf32>
    %428 = arith.truncf %427 : vector<2x8x16xf32> to vector<2x8x16xbf16>
    %429 = vector.extract_strided_slice %368 {offsets = [0, 288], sizes = [16, 16], strides = [1, 1]} : vector<16x384xf32> to vector<16x16xf32>
    %430 = vector.shape_cast %429 : vector<16x16xf32> to vector<2x8x16xf32>
    %431 = arith.truncf %430 : vector<2x8x16xf32> to vector<2x8x16xbf16>
    "tpu.trace_start"() <{level = 10 : i32, message = "bqd,bkd->bqk"}> : () -> ()
    %cst_148 = arith.constant dense<0.000000e+00> : vector<2x8x8xf32>
    %432 = tpu.matmul %425, %428, %cst_148 {dimension_numbers = #tpu.dot_dimension_numbers<[2], [2], [1], [1], [0, 0, 0, 1, 1, 1], [0], [0]>} : vector<2x8x16xbf16>, vector<2x8x16xbf16>, vector<2x8x8xf32> -> vector<2x8x8xf32>
    "tpu.trace_stop"() : () -> ()
    %cst_149 = arith.constant 2.500000e-01 : f32
    %433 = vector.broadcast %cst_149 : f32 to vector<2x8x8xf32>
    %434 = arith.mulf %432, %433 : vector<2x8x8xf32>
    %435 = vector.broadcast %49 : vector<2x1x8xf32> to vector<2x8x8xf32>
    %436 = arith.addf %434, %435 : vector<2x8x8xf32>
    %cst_150 = arith.constant dense<0xFF800000> : vector<2x8xf32>
    %437 = vector.multi_reduction <maximumf>, %436, %cst_150 [2] : vector<2x8x8xf32> to vector<2x8xf32>
    %438 = vector.shape_cast %437 : vector<2x8xf32> to vector<2x8x1xf32>
    %439 = vector.broadcast %438 : vector<2x8x1xf32> to vector<2x8x8xf32>
    %440 = arith.subf %436, %439 : vector<2x8x8xf32>
    %441 = math.exp %440 : vector<2x8x8xf32>
    %cst_151 = arith.constant dense<0.000000e+00> : vector<2x8xf32>
    %442 = vector.multi_reduction <add>, %441, %cst_151 [2] : vector<2x8x8xf32> to vector<2x8xf32>
    %443 = vector.shape_cast %442 : vector<2x8xf32> to vector<2x8x1xf32>
    %444 = vector.broadcast %443 : vector<2x8x1xf32> to vector<2x8x8xf32>
    %445 = arith.divf %441, %444 : vector<2x8x8xf32>
    %446 = arith.truncf %445 : vector<2x8x8xf32> to vector<2x8x8xbf16>
    "tpu.trace_start"() <{level = 10 : i32, message = "bqk,bkd->bqd"}> : () -> ()
    %cst_152 = arith.constant dense<0.000000e+00> : vector<2x8x16xf32>
    %447 = tpu.matmul %446, %431, %cst_152 {dimension_numbers = #tpu.dot_dimension_numbers<[2], [1], [1], [2], [0, 0, 0, 1, 1, 2], [0], [0]>} : vector<2x8x8xbf16>, vector<2x8x16xbf16>, vector<2x8x16xf32> -> vector<2x8x16xf32>
    "tpu.trace_stop"() : () -> ()
    %448 = vector.shape_cast %447 : vector<2x8x16xf32> to vector<16x16xf32>
    %c0_153 = arith.constant 0 : index
    %c32_154 = arith.constant 32 : index
    %449 = vector.load %arg25[%c0_153, %c32_154] : memref<16x128xf32, #tpu.memory_space<vmem>>, vector<16x16xf32>
    tpu.vector_store %arg25[%c0_153, %c32_154], %448 {strides = array<i32>} : memref<16x128xf32, #tpu.memory_space<vmem>>, vector<16x16xf32>,
    %450 = vector.extract_strided_slice %368 {offsets = [0, 48], sizes = [16, 16], strides = [1, 1]} : vector<16x384xf32> to vector<16x16xf32>
    %451 = vector.shape_cast %450 : vector<16x16xf32> to vector<2x8x16xf32>
    %452 = arith.truncf %451 : vector<2x8x16xf32> to vector<2x8x16xbf16>
    %453 = vector.extract_strided_slice %368 {offsets = [0, 176], sizes = [16, 16], strides = [1, 1]} : vector<16x384xf32> to vector<16x16xf32>
    %454 = vector.shape_cast %453 : vector<16x16xf32> to vector<2x8x16xf32>
    %455 = arith.truncf %454 : vector<2x8x16xf32> to vector<2x8x16xbf16>
    %456 = vector.extract_strided_slice %368 {offsets = [0, 304], sizes = [16, 16], strides = [1, 1]} : vector<16x384xf32> to vector<16x16xf32>
    %457 = vector.shape_cast %456 : vector<16x16xf32> to vector<2x8x16xf32>
    %458 = arith.truncf %457 : vector<2x8x16xf32> to vector<2x8x16xbf16>
    "tpu.trace_start"() <{level = 10 : i32, message = "bqd,bkd->bqk"}> : () -> ()
    %cst_155 = arith.constant dense<0.000000e+00> : vector<2x8x8xf32>
    %459 = tpu.matmul %452, %455, %cst_155 {dimension_numbers = #tpu.dot_dimension_numbers<[2], [2], [1], [1], [0, 0, 0, 1, 1, 1], [0], [0]>} : vector<2x8x16xbf16>, vector<2x8x16xbf16>, vector<2x8x8xf32> -> vector<2x8x8xf32>
    "tpu.trace_stop"() : () -> ()
    %cst_156 = arith.constant 2.500000e-01 : f32
    %460 = vector.broadcast %cst_156 : f32 to vector<2x8x8xf32>
    %461 = arith.mulf %459, %460 : vector<2x8x8xf32>
    %462 = vector.broadcast %49 : vector<2x1x8xf32> to vector<2x8x8xf32>
    %463 = arith.addf %461, %462 : vector<2x8x8xf32>
    %cst_157 = arith.constant dense<0xFF800000> : vector<2x8xf32>
    %464 = vector.multi_reduction <maximumf>, %463, %cst_157 [2] : vector<2x8x8xf32> to vector<2x8xf32>
    %465 = vector.shape_cast %464 : vector<2x8xf32> to vector<2x8x1xf32>
    %466 = vector.broadcast %465 : vector<2x8x1xf32> to vector<2x8x8xf32>
    %467 = arith.subf %463, %466 : vector<2x8x8xf32>
    %468 = math.exp %467 : vector<2x8x8xf32>
    %cst_158 = arith.constant dense<0.000000e+00> : vector<2x8xf32>
    %469 = vector.multi_reduction <add>, %468, %cst_158 [2] : vector<2x8x8xf32> to vector<2x8xf32>
    %470 = vector.shape_cast %469 : vector<2x8xf32> to vector<2x8x1xf32>
    %471 = vector.broadcast %470 : vector<2x8x1xf32> to vector<2x8x8xf32>
    %472 = arith.divf %468, %471 : vector<2x8x8xf32>
    %473 = arith.truncf %472 : vector<2x8x8xf32> to vector<2x8x8xbf16>
    "tpu.trace_start"() <{level = 10 : i32, message = "bqk,bkd->bqd"}> : () -> ()
    %cst_159 = arith.constant dense<0.000000e+00> : vector<2x8x16xf32>
    %474 = tpu.matmul %473, %458, %cst_159 {dimension_numbers = #tpu.dot_dimension_numbers<[2], [1], [1], [2], [0, 0, 0, 1, 1, 2], [0], [0]>} : vector<2x8x8xbf16>, vector<2x8x16xbf16>, vector<2x8x16xf32> -> vector<2x8x16xf32>
    "tpu.trace_stop"() : () -> ()
    %475 = vector.shape_cast %474 : vector<2x8x16xf32> to vector<16x16xf32>
    %c0_160 = arith.constant 0 : index
    %c48_161 = arith.constant 48 : index
    %476 = vector.load %arg25[%c0_160, %c48_161] : memref<16x128xf32, #tpu.memory_space<vmem>>, vector<16x16xf32>
    tpu.vector_store %arg25[%c0_160, %c48_161], %475 {strides = array<i32>} : memref<16x128xf32, #tpu.memory_space<vmem>>, vector<16x16xf32>,
    %477 = vector.extract_strided_slice %368 {offsets = [0, 64], sizes = [16, 16], strides = [1, 1]} : vector<16x384xf32> to vector<16x16xf32>
    %478 = vector.shape_cast %477 : vector<16x16xf32> to vector<2x8x16xf32>
    %479 = arith.truncf %478 : vector<2x8x16xf32> to vector<2x8x16xbf16>
    %480 = vector.extract_strided_slice %368 {offsets = [0, 192], sizes = [16, 16], strides = [1, 1]} : vector<16x384xf32> to vector<16x16xf32>
    %481 = vector.shape_cast %480 : vector<16x16xf32> to vector<2x8x16xf32>
    %482 = arith.truncf %481 : vector<2x8x16xf32> to vector<2x8x16xbf16>
    %483 = vector.extract_strided_slice %368 {offsets = [0, 320], sizes = [16, 16], strides = [1, 1]} : vector<16x384xf32> to vector<16x16xf32>
    %484 = vector.shape_cast %483 : vector<16x16xf32> to vector<2x8x16xf32>
    %485 = arith.truncf %484 : vector<2x8x16xf32> to vector<2x8x16xbf16>
    "tpu.trace_start"() <{level = 10 : i32, message = "bqd,bkd->bqk"}> : () -> ()
    %cst_162 = arith.constant dense<0.000000e+00> : vector<2x8x8xf32>
    %486 = tpu.matmul %479, %482, %cst_162 {dimension_numbers = #tpu.dot_dimension_numbers<[2], [2], [1], [1], [0, 0, 0, 1, 1, 1], [0], [0]>} : vector<2x8x16xbf16>, vector<2x8x16xbf16>, vector<2x8x8xf32> -> vector<2x8x8xf32>
    "tpu.trace_stop"() : () -> ()
    %cst_163 = arith.constant 2.500000e-01 : f32
    %487 = vector.broadcast %cst_163 : f32 to vector<2x8x8xf32>
    %488 = arith.mulf %486, %487 : vector<2x8x8xf32>
    %489 = vector.broadcast %49 : vector<2x1x8xf32> to vector<2x8x8xf32>
    %490 = arith.addf %488, %489 : vector<2x8x8xf32>
    %cst_164 = arith.constant dense<0xFF800000> : vector<2x8xf32>
    %491 = vector.multi_reduction <maximumf>, %490, %cst_164 [2] : vector<2x8x8xf32> to vector<2x8xf32>
    %492 = vector.shape_cast %491 : vector<2x8xf32> to vector<2x8x1xf32>
    %493 = vector.broadcast %492 : vector<2x8x1xf32> to vector<2x8x8xf32>
    %494 = arith.subf %490, %493 : vector<2x8x8xf32>
    %495 = math.exp %494 : vector<2x8x8xf32>
    %cst_165 = arith.constant dense<0.000000e+00> : vector<2x8xf32>
    %496 = vector.multi_reduction <add>, %495, %cst_165 [2] : vector<2x8x8xf32> to vector<2x8xf32>
    %497 = vector.shape_cast %496 : vector<2x8xf32> to vector<2x8x1xf32>
    %498 = vector.broadcast %497 : vector<2x8x1xf32> to vector<2x8x8xf32>
    %499 = arith.divf %495, %498 : vector<2x8x8xf32>
    %500 = arith.truncf %499 : vector<2x8x8xf32> to vector<2x8x8xbf16>
    "tpu.trace_start"() <{level = 10 : i32, message = "bqk,bkd->bqd"}> : () -> ()
    %cst_166 = arith.constant dense<0.000000e+00> : vector<2x8x16xf32>
    %501 = tpu.matmul %500, %485, %cst_166 {dimension_numbers = #tpu.dot_dimension_numbers<[2], [1], [1], [2], [0, 0, 0, 1, 1, 2], [0], [0]>} : vector<2x8x8xbf16>, vector<2x8x16xbf16>, vector<2x8x16xf32> -> vector<2x8x16xf32>
    "tpu.trace_stop"() : () -> ()
    %502 = vector.shape_cast %501 : vector<2x8x16xf32> to vector<16x16xf32>
    %c0_167 = arith.constant 0 : index
    %c64_168 = arith.constant 64 : index
    %503 = vector.load %arg25[%c0_167, %c64_168] : memref<16x128xf32, #tpu.memory_space<vmem>>, vector<16x16xf32>
    tpu.vector_store %arg25[%c0_167, %c64_168], %502 {strides = array<i32>} : memref<16x128xf32, #tpu.memory_space<vmem>>, vector<16x16xf32>,
    %504 = vector.extract_strided_slice %368 {offsets = [0, 80], sizes = [16, 16], strides = [1, 1]} : vector<16x384xf32> to vector<16x16xf32>
    %505 = vector.shape_cast %504 : vector<16x16xf32> to vector<2x8x16xf32>
    %506 = arith.truncf %505 : vector<2x8x16xf32> to vector<2x8x16xbf16>
    %507 = vector.extract_strided_slice %368 {offsets = [0, 208], sizes = [16, 16], strides = [1, 1]} : vector<16x384xf32> to vector<16x16xf32>
    %508 = vector.shape_cast %507 : vector<16x16xf32> to vector<2x8x16xf32>
    %509 = arith.truncf %508 : vector<2x8x16xf32> to vector<2x8x16xbf16>
    %510 = vector.extract_strided_slice %368 {offsets = [0, 336], sizes = [16, 16], strides = [1, 1]} : vector<16x384xf32> to vector<16x16xf32>
    %511 = vector.shape_cast %510 : vector<16x16xf32> to vector<2x8x16xf32>
    %512 = arith.truncf %511 : vector<2x8x16xf32> to vector<2x8x16xbf16>
    "tpu.trace_start"() <{level = 10 : i32, message = "bqd,bkd->bqk"}> : () -> ()
    %cst_169 = arith.constant dense<0.000000e+00> : vector<2x8x8xf32>
    %513 = tpu.matmul %506, %509, %cst_169 {dimension_numbers = #tpu.dot_dimension_numbers<[2], [2], [1], [1], [0, 0, 0, 1, 1, 1], [0], [0]>} : vector<2x8x16xbf16>, vector<2x8x16xbf16>, vector<2x8x8xf32> -> vector<2x8x8xf32>
    "tpu.trace_stop"() : () -> ()
    %cst_170 = arith.constant 2.500000e-01 : f32
    %514 = vector.broadcast %cst_170 : f32 to vector<2x8x8xf32>
    %515 = arith.mulf %513, %514 : vector<2x8x8xf32>
    %516 = vector.broadcast %49 : vector<2x1x8xf32> to vector<2x8x8xf32>
    %517 = arith.addf %515, %516 : vector<2x8x8xf32>
    %cst_171 = arith.constant dense<0xFF800000> : vector<2x8xf32>
    %518 = vector.multi_reduction <maximumf>, %517, %cst_171 [2] : vector<2x8x8xf32> to vector<2x8xf32>
    %519 = vector.shape_cast %518 : vector<2x8xf32> to vector<2x8x1xf32>
    %520 = vector.broadcast %519 : vector<2x8x1xf32> to vector<2x8x8xf32>
    %521 = arith.subf %517, %520 : vector<2x8x8xf32>
    %522 = math.exp %521 : vector<2x8x8xf32>
    %cst_172 = arith.constant dense<0.000000e+00> : vector<2x8xf32>
    %523 = vector.multi_reduction <add>, %522, %cst_172 [2] : vector<2x8x8xf32> to vector<2x8xf32>
    %524 = vector.shape_cast %523 : vector<2x8xf32> to vector<2x8x1xf32>
    %525 = vector.broadcast %524 : vector<2x8x1xf32> to vector<2x8x8xf32>
    %526 = arith.divf %522, %525 : vector<2x8x8xf32>
    %527 = arith.truncf %526 : vector<2x8x8xf32> to vector<2x8x8xbf16>
    "tpu.trace_start"() <{level = 10 : i32, message = "bqk,bkd->bqd"}> : () -> ()
    %cst_173 = arith.constant dense<0.000000e+00> : vector<2x8x16xf32>
    %528 = tpu.matmul %527, %512, %cst_173 {dimension_numbers = #tpu.dot_dimension_numbers<[2], [1], [1], [2], [0, 0, 0, 1, 1, 2], [0], [0]>} : vector<2x8x8xbf16>, vector<2x8x16xbf16>, vector<2x8x16xf32> -> vector<2x8x16xf32>
    "tpu.trace_stop"() : () -> ()
    %529 = vector.shape_cast %528 : vector<2x8x16xf32> to vector<16x16xf32>
    %c0_174 = arith.constant 0 : index
    %c80_175 = arith.constant 80 : index
    %530 = vector.load %arg25[%c0_174, %c80_175] : memref<16x128xf32, #tpu.memory_space<vmem>>, vector<16x16xf32>
    tpu.vector_store %arg25[%c0_174, %c80_175], %529 {strides = array<i32>} : memref<16x128xf32, #tpu.memory_space<vmem>>, vector<16x16xf32>,
    %531 = vector.extract_strided_slice %368 {offsets = [0, 96], sizes = [16, 16], strides = [1, 1]} : vector<16x384xf32> to vector<16x16xf32>
    %532 = vector.shape_cast %531 : vector<16x16xf32> to vector<2x8x16xf32>
    %533 = arith.truncf %532 : vector<2x8x16xf32> to vector<2x8x16xbf16>
    %534 = vector.extract_strided_slice %368 {offsets = [0, 224], sizes = [16, 16], strides = [1, 1]} : vector<16x384xf32> to vector<16x16xf32>
    %535 = vector.shape_cast %534 : vector<16x16xf32> to vector<2x8x16xf32>
    %536 = arith.truncf %535 : vector<2x8x16xf32> to vector<2x8x16xbf16>
    %537 = vector.extract_strided_slice %368 {offsets = [0, 352], sizes = [16, 16], strides = [1, 1]} : vector<16x384xf32> to vector<16x16xf32>
    %538 = vector.shape_cast %537 : vector<16x16xf32> to vector<2x8x16xf32>
    %539 = arith.truncf %538 : vector<2x8x16xf32> to vector<2x8x16xbf16>
    "tpu.trace_start"() <{level = 10 : i32, message = "bqd,bkd->bqk"}> : () -> ()
    %cst_176 = arith.constant dense<0.000000e+00> : vector<2x8x8xf32>
    %540 = tpu.matmul %533, %536, %cst_176 {dimension_numbers = #tpu.dot_dimension_numbers<[2], [2], [1], [1], [0, 0, 0, 1, 1, 1], [0], [0]>} : vector<2x8x16xbf16>, vector<2x8x16xbf16>, vector<2x8x8xf32> -> vector<2x8x8xf32>
    "tpu.trace_stop"() : () -> ()
    %cst_177 = arith.constant 2.500000e-01 : f32
    %541 = vector.broadcast %cst_177 : f32 to vector<2x8x8xf32>
    %542 = arith.mulf %540, %541 : vector<2x8x8xf32>
    %543 = vector.broadcast %49 : vector<2x1x8xf32> to vector<2x8x8xf32>
    %544 = arith.addf %542, %543 : vector<2x8x8xf32>
    %cst_178 = arith.constant dense<0xFF800000> : vector<2x8xf32>
    %545 = vector.multi_reduction <maximumf>, %544, %cst_178 [2] : vector<2x8x8xf32> to vector<2x8xf32>
    %546 = vector.shape_cast %545 : vector<2x8xf32> to vector<2x8x1xf32>
    %547 = vector.broadcast %546 : vector<2x8x1xf32> to vector<2x8x8xf32>
    %548 = arith.subf %544, %547 : vector<2x8x8xf32>
    %549 = math.exp %548 : vector<2x8x8xf32>
    %cst_179 = arith.constant dense<0.000000e+00> : vector<2x8xf32>
    %550 = vector.multi_reduction <add>, %549, %cst_179 [2] : vector<2x8x8xf32> to vector<2x8xf32>
    %551 = vector.shape_cast %550 : vector<2x8xf32> to vector<2x8x1xf32>
    %552 = vector.broadcast %551 : vector<2x8x1xf32> to vector<2x8x8xf32>
    %553 = arith.divf %549, %552 : vector<2x8x8xf32>
    %554 = arith.truncf %553 : vector<2x8x8xf32> to vector<2x8x8xbf16>
    "tpu.trace_start"() <{level = 10 : i32, message = "bqk,bkd->bqd"}> : () -> ()
    %cst_180 = arith.constant dense<0.000000e+00> : vector<2x8x16xf32>
    %555 = tpu.matmul %554, %539, %cst_180 {dimension_numbers = #tpu.dot_dimension_numbers<[2], [1], [1], [2], [0, 0, 0, 1, 1, 2], [0], [0]>} : vector<2x8x8xbf16>, vector<2x8x16xbf16>, vector<2x8x16xf32> -> vector<2x8x16xf32>
    "tpu.trace_stop"() : () -> ()
    %556 = vector.shape_cast %555 : vector<2x8x16xf32> to vector<16x16xf32>
    %c0_181 = arith.constant 0 : index
    %c96_182 = arith.constant 96 : index
    %557 = vector.load %arg25[%c0_181, %c96_182] : memref<16x128xf32, #tpu.memory_space<vmem>>, vector<16x16xf32>
    tpu.vector_store %arg25[%c0_181, %c96_182], %556 {strides = array<i32>} : memref<16x128xf32, #tpu.memory_space<vmem>>, vector<16x16xf32>,
    %558 = vector.extract_strided_slice %368 {offsets = [0, 112], sizes = [16, 16], strides = [1, 1]} : vector<16x384xf32> to vector<16x16xf32>
    %559 = vector.shape_cast %558 : vector<16x16xf32> to vector<2x8x16xf32>
    %560 = arith.truncf %559 : vector<2x8x16xf32> to vector<2x8x16xbf16>
    %561 = vector.extract_strided_slice %368 {offsets = [0, 240], sizes = [16, 16], strides = [1, 1]} : vector<16x384xf32> to vector<16x16xf32>
    %562 = vector.shape_cast %561 : vector<16x16xf32> to vector<2x8x16xf32>
    %563 = arith.truncf %562 : vector<2x8x16xf32> to vector<2x8x16xbf16>
    %564 = vector.extract_strided_slice %368 {offsets = [0, 368], sizes = [16, 16], strides = [1, 1]} : vector<16x384xf32> to vector<16x16xf32>
    %565 = vector.shape_cast %564 : vector<16x16xf32> to vector<2x8x16xf32>
    %566 = arith.truncf %565 : vector<2x8x16xf32> to vector<2x8x16xbf16>
    "tpu.trace_start"() <{level = 10 : i32, message = "bqd,bkd->bqk"}> : () -> ()
    %cst_183 = arith.constant dense<0.000000e+00> : vector<2x8x8xf32>
    %567 = tpu.matmul %560, %563, %cst_183 {dimension_numbers = #tpu.dot_dimension_numbers<[2], [2], [1], [1], [0, 0, 0, 1, 1, 1], [0], [0]>} : vector<2x8x16xbf16>, vector<2x8x16xbf16>, vector<2x8x8xf32> -> vector<2x8x8xf32>
    "tpu.trace_stop"() : () -> ()
    %cst_184 = arith.constant 2.500000e-01 : f32
    %568 = vector.broadcast %cst_184 : f32 to vector<2x8x8xf32>
    %569 = arith.mulf %567, %568 : vector<2x8x8xf32>
    %570 = vector.broadcast %49 : vector<2x1x8xf32> to vector<2x8x8xf32>
    %571 = arith.addf %569, %570 : vector<2x8x8xf32>
    %cst_185 = arith.constant dense<0xFF800000> : vector<2x8xf32>
    %572 = vector.multi_reduction <maximumf>, %571, %cst_185 [2] : vector<2x8x8xf32> to vector<2x8xf32>
    %573 = vector.shape_cast %572 : vector<2x8xf32> to vector<2x8x1xf32>
    %574 = vector.broadcast %573 : vector<2x8x1xf32> to vector<2x8x8xf32>
    %575 = arith.subf %571, %574 : vector<2x8x8xf32>
    %576 = math.exp %575 : vector<2x8x8xf32>
    %cst_186 = arith.constant dense<0.000000e+00> : vector<2x8xf32>
    %577 = vector.multi_reduction <add>, %576, %cst_186 [2] : vector<2x8x8xf32> to vector<2x8xf32>
    %578 = vector.shape_cast %577 : vector<2x8xf32> to vector<2x8x1xf32>
    %579 = vector.broadcast %578 : vector<2x8x1xf32> to vector<2x8x8xf32>
    %580 = arith.divf %576, %579 : vector<2x8x8xf32>
    %581 = arith.truncf %580 : vector<2x8x8xf32> to vector<2x8x8xbf16>
    "tpu.trace_start"() <{level = 10 : i32, message = "bqk,bkd->bqd"}> : () -> ()
    %cst_187 = arith.constant dense<0.000000e+00> : vector<2x8x16xf32>
    %582 = tpu.matmul %581, %566, %cst_187 {dimension_numbers = #tpu.dot_dimension_numbers<[2], [1], [1], [2], [0, 0, 0, 1, 1, 2], [0], [0]>} : vector<2x8x8xbf16>, vector<2x8x16xbf16>, vector<2x8x16xf32> -> vector<2x8x16xf32>
    "tpu.trace_stop"() : () -> ()
    %583 = vector.shape_cast %582 : vector<2x8x16xf32> to vector<16x16xf32>
    %c0_188 = arith.constant 0 : index
    %c112_189 = arith.constant 112 : index
    %584 = vector.load %arg25[%c0_188, %c112_189] : memref<16x128xf32, #tpu.memory_space<vmem>>, vector<16x16xf32>
    tpu.vector_store %arg25[%c0_188, %c112_189], %583 {strides = array<i32>} : memref<16x128xf32, #tpu.memory_space<vmem>>, vector<16x16xf32>,
    %c0_190 = arith.constant 0 : index
    %c0_191 = arith.constant 0 : index
    %585 = vector.load %arg25[%c0_190, %c0_191] : memref<16x128xf32, #tpu.memory_space<vmem>>, vector<16x128xf32>
    %586 = arith.truncf %585 : vector<16x128xf32> to vector<16x128xbf16>
    %c1_192 = arith.constant 1 : index
    %c0_193 = arith.constant 0 : index
    %c0_194 = arith.constant 0 : index
    %587 = vector.load %arg11[%c1_192, %c0_193, %c0_194] : memref<2x128x128xbf16, #tpu.memory_space<vmem>>, vector<1x128x128xbf16>
    %588 = vector.shape_cast %587 : vector<1x128x128xbf16> to vector<128x128xbf16>
    %cst_195 = arith.constant dense<0.000000e+00> : vector<16x128xf32>
    %589 = tpu.matmul %586, %588, %cst_195 {dimension_numbers = #tpu.dot_dimension_numbers<[1], [0], [0], [1], [0, 0, 1, 1], [], []>} : vector<16x128xbf16>, vector<128x128xbf16>, vector<16x128xf32> -> vector<16x128xf32>
    %c1_196 = arith.constant 1 : index
    %c0_197 = arith.constant 0 : index
    %c0_198 = arith.constant 0 : index
    %590 = vector.load %arg12[%c1_196, %c0_197, %c0_198] : memref<2x1x128xf32, #tpu.memory_space<vmem>>, vector<1x1x128xf32>
    %591 = vector.shape_cast %590 : vector<1x1x128xf32> to vector<1x128xf32>
    %592 = vector.broadcast %591 : vector<1x128xf32> to vector<16x128xf32>
    %593 = arith.addf %589, %592 : vector<16x128xf32>
    %594 = arith.addf %360, %593 : vector<16x128xf32>
    %c1_199 = arith.constant 1 : index
    %c0_200 = arith.constant 0 : index
    %c0_201 = arith.constant 0 : index
    %595 = vector.load %arg13[%c1_199, %c0_200, %c0_201] : memref<2x1x128xf32, #tpu.memory_space<vmem>>, vector<1x1x128xf32>
    %596 = vector.shape_cast %595 : vector<1x1x128xf32> to vector<1x128xf32>
    %c1_202 = arith.constant 1 : index
    %c0_203 = arith.constant 0 : index
    %c0_204 = arith.constant 0 : index
    %597 = vector.load %arg14[%c1_202, %c0_203, %c0_204] : memref<2x1x128xf32, #tpu.memory_space<vmem>>, vector<1x1x128xf32>
    %598 = vector.shape_cast %597 : vector<1x1x128xf32> to vector<1x128xf32>
    %cst_205 = arith.constant dense<0.000000e+00> : vector<16xf32>
    %599 = vector.multi_reduction <add>, %594, %cst_205 [1] : vector<16x128xf32> to vector<16xf32>
    %600 = vector.shape_cast %599 : vector<16xf32> to vector<16x1xf32>
    %cst_206 = arith.constant 1.280000e+02 : f32
    %601 = vector.broadcast %cst_206 : f32 to vector<16x1xf32>
    %602 = arith.divf %600, %601 : vector<16x1xf32>
    %603 = vector.broadcast %602 : vector<16x1xf32> to vector<16x128xf32>
    %604 = arith.subf %594, %603 : vector<16x128xf32>
    %605 = arith.mulf %604, %604 : vector<16x128xf32>
    %cst_207 = arith.constant dense<0.000000e+00> : vector<16xf32>
    %606 = vector.multi_reduction <add>, %605, %cst_207 [1] : vector<16x128xf32> to vector<16xf32>
    %607 = vector.shape_cast %606 : vector<16xf32> to vector<16x1xf32>
    %cst_208 = arith.constant 1.280000e+02 : f32
    %608 = vector.broadcast %cst_208 : f32 to vector<16x1xf32>
    %609 = arith.divf %607, %608 : vector<16x1xf32>
    %610 = vector.broadcast %602 : vector<16x1xf32> to vector<16x128xf32>
    %611 = arith.subf %594, %610 : vector<16x128xf32>
    %cst_209 = arith.constant 9.99999974E-6 : f32
    %612 = vector.broadcast %cst_209 : f32 to vector<16x1xf32>
    %613 = arith.addf %609, %612 : vector<16x1xf32>
    %614 = math.rsqrt %613 : vector<16x1xf32>
    %615 = vector.broadcast %614 : vector<16x1xf32> to vector<16x128xf32>
    %616 = arith.mulf %611, %615 : vector<16x128xf32>
    %617 = vector.broadcast %596 : vector<1x128xf32> to vector<16x128xf32>
    %618 = arith.mulf %616, %617 : vector<16x128xf32>
    %619 = vector.broadcast %598 : vector<1x128xf32> to vector<16x128xf32>
    %620 = arith.addf %618, %619 : vector<16x128xf32>
    %621 = arith.truncf %620 : vector<16x128xf32> to vector<16x128xbf16>
    %c1_210 = arith.constant 1 : index
    %c0_211 = arith.constant 0 : index
    %c0_212 = arith.constant 0 : index
    %622 = vector.load %arg15[%c1_210, %c0_211, %c0_212] : memref<2x128x512xbf16, #tpu.memory_space<vmem>>, vector<1x128x512xbf16>
    %623 = vector.shape_cast %622 : vector<1x128x512xbf16> to vector<128x512xbf16>
    %cst_213 = arith.constant dense<0.000000e+00> : vector<16x512xf32>
    %624 = tpu.matmul %621, %623, %cst_213 {dimension_numbers = #tpu.dot_dimension_numbers<[1], [0], [0], [1], [0, 0, 1, 1], [], []>} : vector<16x128xbf16>, vector<128x512xbf16>, vector<16x512xf32> -> vector<16x512xf32>
    %c1_214 = arith.constant 1 : index
    %c0_215 = arith.constant 0 : index
    %c0_216 = arith.constant 0 : index
    %625 = vector.load %arg16[%c1_214, %c0_215, %c0_216] : memref<2x1x512xf32, #tpu.memory_space<vmem>>, vector<1x1x512xf32>
    %626 = vector.shape_cast %625 : vector<1x1x512xf32> to vector<1x512xf32>
    %627 = vector.broadcast %626 : vector<1x512xf32> to vector<16x512xf32>
    %628 = arith.addf %624, %627 : vector<16x512xf32>
    %cst_217 = arith.constant 5.000000e-01 : f32
    %629 = vector.broadcast %cst_217 : f32 to vector<16x512xf32>
    %630 = arith.mulf %629, %628 : vector<16x512xf32>
    %cst_218 = arith.constant 0.707106769 : f32
    %631 = vector.broadcast %cst_218 : f32 to vector<16x512xf32>
    %632 = arith.mulf %628, %631 : vector<16x512xf32>
    %633 = math.erf %632 : vector<16x512xf32>
    %cst_219 = arith.constant 1.000000e+00 : f32
    %634 = vector.broadcast %cst_219 : f32 to vector<16x512xf32>
    %635 = arith.addf %634, %633 : vector<16x512xf32>
    %636 = arith.mulf %630, %635 : vector<16x512xf32>
    %637 = arith.truncf %636 : vector<16x512xf32> to vector<16x512xbf16>
    %c1_220 = arith.constant 1 : index
    %c0_221 = arith.constant 0 : index
    %c0_222 = arith.constant 0 : index
    %638 = vector.load %arg17[%c1_220, %c0_221, %c0_222] : memref<2x512x128xbf16, #tpu.memory_space<vmem>>, vector<1x512x128xbf16>
    %639 = vector.shape_cast %638 : vector<1x512x128xbf16> to vector<512x128xbf16>
    %cst_223 = arith.constant dense<0.000000e+00> : vector<16x128xf32>
    %640 = tpu.matmul %637, %639, %cst_223 {dimension_numbers = #tpu.dot_dimension_numbers<[1], [0], [0], [1], [0, 0, 1, 1], [], []>} : vector<16x512xbf16>, vector<512x128xbf16>, vector<16x128xf32> -> vector<16x128xf32>
    %c1_224 = arith.constant 1 : index
    %c0_225 = arith.constant 0 : index
    %c0_226 = arith.constant 0 : index
    %641 = vector.load %arg18[%c1_224, %c0_225, %c0_226] : memref<2x1x128xf32, #tpu.memory_space<vmem>>, vector<1x1x128xf32>
    %642 = vector.shape_cast %641 : vector<1x1x128xf32> to vector<1x128xf32>
    %643 = vector.broadcast %642 : vector<1x128xf32> to vector<16x128xf32>
    %644 = arith.addf %640, %643 : vector<16x128xf32>
    %645 = arith.addf %620, %644 : vector<16x128xf32>
    %c1_227 = arith.constant 1 : index
    %c0_228 = arith.constant 0 : index
    %c0_229 = arith.constant 0 : index
    %646 = vector.load %arg19[%c1_227, %c0_228, %c0_229] : memref<2x1x128xf32, #tpu.memory_space<vmem>>, vector<1x1x128xf32>
    %647 = vector.shape_cast %646 : vector<1x1x128xf32> to vector<1x128xf32>
    %c1_230 = arith.constant 1 : index
    %c0_231 = arith.constant 0 : index
    %c0_232 = arith.constant 0 : index
    %648 = vector.load %arg20[%c1_230, %c0_231, %c0_232] : memref<2x1x128xf32, #tpu.memory_space<vmem>>, vector<1x1x128xf32>
    %649 = vector.shape_cast %648 : vector<1x1x128xf32> to vector<1x128xf32>
    %cst_233 = arith.constant dense<0.000000e+00> : vector<16xf32>
    %650 = vector.multi_reduction <add>, %645, %cst_233 [1] : vector<16x128xf32> to vector<16xf32>
    %651 = vector.shape_cast %650 : vector<16xf32> to vector<16x1xf32>
    %cst_234 = arith.constant 1.280000e+02 : f32
    %652 = vector.broadcast %cst_234 : f32 to vector<16x1xf32>
    %653 = arith.divf %651, %652 : vector<16x1xf32>
    %654 = vector.broadcast %653 : vector<16x1xf32> to vector<16x128xf32>
    %655 = arith.subf %645, %654 : vector<16x128xf32>
    %656 = arith.mulf %655, %655 : vector<16x128xf32>
    %cst_235 = arith.constant dense<0.000000e+00> : vector<16xf32>
    %657 = vector.multi_reduction <add>, %656, %cst_235 [1] : vector<16x128xf32> to vector<16xf32>
    %658 = vector.shape_cast %657 : vector<16xf32> to vector<16x1xf32>
    %cst_236 = arith.constant 1.280000e+02 : f32
    %659 = vector.broadcast %cst_236 : f32 to vector<16x1xf32>
    %660 = arith.divf %658, %659 : vector<16x1xf32>
    %661 = vector.broadcast %653 : vector<16x1xf32> to vector<16x128xf32>
    %662 = arith.subf %645, %661 : vector<16x128xf32>
    %cst_237 = arith.constant 9.99999974E-6 : f32
    %663 = vector.broadcast %cst_237 : f32 to vector<16x1xf32>
    %664 = arith.addf %660, %663 : vector<16x1xf32>
    %665 = math.rsqrt %664 : vector<16x1xf32>
    %666 = vector.broadcast %665 : vector<16x1xf32> to vector<16x128xf32>
    %667 = arith.mulf %662, %666 : vector<16x128xf32>
    %668 = vector.broadcast %647 : vector<1x128xf32> to vector<16x128xf32>
    %669 = arith.mulf %667, %668 : vector<16x128xf32>
    %670 = vector.broadcast %649 : vector<1x128xf32> to vector<16x128xf32>
    %671 = arith.addf %669, %670 : vector<16x128xf32>
    %672 = tpu.iota {dimensions = array<i32: 1>} : vector<2x16xi32>
    %673 = tpu.iota {dimensions = array<i32: 0>} : vector<2x16xi32>
    %c8_i32 = arith.constant 8 : i32
    %674 = vector.broadcast %c8_i32 : i32 to vector<2x16xi32>
    %675 = arith.muli %673, %674 : vector<2x16xi32>
    %676 = arith.cmpi eq, %672, %675 : vector<2x16xi32>
    %677 = arith.extui %676 : vector<2x16xi1> to vector<2x16xi32>
    %678 = arith.sitofp %677 : vector<2x16xi32> to vector<2x16xf32>
    %cst_238 = arith.constant dense<0.000000e+00> : vector<2x128xf32>
    %679 = tpu.matmul %678, %671, %cst_238 {dimension_numbers = #tpu.dot_dimension_numbers<[1], [0], [0], [1], [0, 0, 1, 1], [], []>} : vector<2x16xf32>, vector<16x128xf32>, vector<2x128xf32> -> vector<2x128xf32>
    %c0_239 = arith.constant 0 : index
    %c0_240 = arith.constant 0 : index
    %680 = vector.load %arg21[%c0_239, %c0_240] : memref<128x8xf32, #tpu.memory_space<vmem>>, vector<128x8xf32>
    %cst_241 = arith.constant dense<0.000000e+00> : vector<2x8xf32>
    %681 = tpu.matmul %679, %680, %cst_241 {dimension_numbers = #tpu.dot_dimension_numbers<[1], [0], [0], [1], [0, 0, 1, 1], [], []>} : vector<2x128xf32>, vector<128x8xf32>, vector<2x8xf32> -> vector<2x8xf32>
    %c0_242 = arith.constant 0 : index
    %c0_243 = arith.constant 0 : index
    %682 = vector.load %arg22[%c0_242, %c0_243] : memref<1x8xf32, #tpu.memory_space<vmem>>, vector<1x8xf32>
    %683 = vector.broadcast %682 : vector<1x8xf32> to vector<2x8xf32>
    %684 = arith.addf %681, %683 : vector<2x8xf32>
    %c0_244 = arith.constant 0 : index
    %c0_245 = arith.constant 0 : index
    %685 = vector.load %arg23[%c0_244, %c0_245] : memref<2x8xf32, #tpu.memory_space<vmem>>, vector<2x8xf32>
    tpu.vector_store %arg23[%c0_244, %c0_245], %684 {strides = array<i32>} : memref<2x8xf32, #tpu.memory_space<vmem>>, vector<2x8xf32>,
    %c0_246 = arith.constant 0 : index
    %c0_247 = arith.constant 0 : index
    %686 = vector.load %arg3[%c0_246, %c0_247] : memref<2x8xf32, #tpu.memory_space<vmem>>, vector<2x8xf32>
    %cst_248 = arith.constant 0.000000e+00 : f32
    %687 = vector.broadcast %cst_248 : f32 to vector<2x8xf32>
    %688 = arith.maximumf %684, %687 : vector<2x8xf32>
    %689 = arith.mulf %684, %686 : vector<2x8xf32>
    %690 = arith.subf %688, %689 : vector<2x8xf32>
    %691 = math.absf %684 : vector<2x8xf32>
    %cst_249 = arith.constant 0.000000e+00 : f32
    %692 = vector.broadcast %cst_249 : f32 to vector<2x8xf32>
    %693 = arith.subf %692, %691 : vector<2x8xf32>
    %694 = math.exp %693 : vector<2x8xf32>
    %cst_250 = arith.constant 1.000000e+00 : f32
    %695 = vector.broadcast %cst_250 : f32 to vector<2x8xf32>
    %696 = arith.addf %695, %694 : vector<2x8xf32>
    %697 = math.log %696 : vector<2x8xf32>
    %698 = arith.addf %690, %697 : vector<2x8xf32>
    %cst_251 = arith.constant 0.000000e+00 : f32
    %699 = vector.broadcast %cst_251 : f32 to vector<2x8xf32>
    %700 = arith.subf %699, %698 : vector<2x8xf32>
    %701 = math.exp %700 : vector<2x8xf32>
    %cst_252 = arith.constant 1.000000e+00 : f32
    %702 = vector.broadcast %cst_252 : f32 to vector<2x8xf32>
    %703 = arith.subf %702, %701 : vector<2x8xf32>
    %704 = arith.mulf %703, %703 : vector<2x8xf32>
    %cst_253 = arith.constant 1.000000e+00 : f32
    %705 = vector.broadcast %cst_253 : f32 to vector<2x8xf32>
    %706 = arith.mulf %705, %704 : vector<2x8xf32>
    %707 = arith.mulf %706, %698 : vector<2x8xf32>
    %cst_254 = arith.constant dense<0.000000e+00> : vector<2xf32>
    %708 = vector.multi_reduction <add>, %707, %cst_254 [1] : vector<2x8xf32> to vector<2xf32>
    %709 = vector.shape_cast %708 : vector<2xf32> to vector<2x1xf32>
    %cst_255 = arith.constant dense<0.000000e+00> : vector<1xf32>
    %710 = vector.multi_reduction <add>, %709, %cst_255 [0] : vector<2x1xf32> to vector<1xf32>
    %711 = vector.shape_cast %710 : vector<1xf32> to vector<1x1xf32>
    %cst_256 = arith.constant 1.600000e+01 : f32
    %712 = vector.broadcast %cst_256 : f32 to vector<1x1xf32>
    %713 = arith.divf %711, %712 : vector<1x1xf32>
    %cst_257 = arith.constant 0.899999976 : f32
    %714 = vector.broadcast %cst_257 : f32 to vector<2x8xf32>
    %715 = arith.mulf %686, %714 : vector<2x8xf32>
    %cst_258 = arith.constant 5.000000e-02 : f32
    %716 = vector.broadcast %cst_258 : f32 to vector<2x8xf32>
    %717 = arith.addf %715, %716 : vector<2x8xf32>
    %cst_259 = arith.constant 0.000000e+00 : f32
    %718 = vector.broadcast %cst_259 : f32 to vector<2x8xf32>
    %719 = arith.maximumf %684, %718 : vector<2x8xf32>
    %720 = arith.mulf %684, %717 : vector<2x8xf32>
    %721 = arith.subf %719, %720 : vector<2x8xf32>
    %722 = math.absf %684 : vector<2x8xf32>
    %cst_260 = arith.constant 0.000000e+00 : f32
    %723 = vector.broadcast %cst_260 : f32 to vector<2x8xf32>
    %724 = arith.subf %723, %722 : vector<2x8xf32>
    %725 = math.exp %724 : vector<2x8xf32>
    %cst_261 = arith.constant 1.000000e+00 : f32
    %726 = vector.broadcast %cst_261 : f32 to vector<2x8xf32>
    %727 = arith.addf %726, %725 : vector<2x8xf32>
    %728 = math.log %727 : vector<2x8xf32>
    %729 = arith.addf %721, %728 : vector<2x8xf32>
    %cst_262 = arith.constant dense<0.000000e+00> : vector<2xf32>
    %730 = vector.multi_reduction <add>, %729, %cst_262 [1] : vector<2x8xf32> to vector<2xf32>
    %731 = vector.shape_cast %730 : vector<2xf32> to vector<2x1xf32>
    %cst_263 = arith.constant dense<0.000000e+00> : vector<1xf32>
    %732 = vector.multi_reduction <add>, %731, %cst_263 [0] : vector<2x1xf32> to vector<1xf32>
    %733 = vector.shape_cast %732 : vector<1xf32> to vector<1x1xf32>
    %cst_264 = arith.constant 1.600000e+01 : f32
    %734 = vector.broadcast %cst_264 : f32 to vector<1x1xf32>
    %735 = arith.divf %733, %734 : vector<1x1xf32>
    %cst_265 = arith.constant 0.699999988 : f32
    %736 = vector.broadcast %cst_265 : f32 to vector<1x1xf32>
    %737 = arith.mulf %736, %713 : vector<1x1xf32>
    %cst_266 = arith.constant 3.000000e-01 : f32
    %738 = vector.broadcast %cst_266 : f32 to vector<1x1xf32>
    %739 = arith.mulf %738, %735 : vector<1x1xf32>
    %740 = arith.addf %737, %739 : vector<1x1xf32>
    %c0_267 = arith.constant 0 : index
    %c0_268 = arith.constant 0 : index
    %741 = vector.load %arg24[%c0_267, %c0_268] : memref<1x1xf32, #tpu.memory_space<vmem>>, vector<1x1xf32>
    tpu.vector_store %arg24[%c0_267, %c0_268], %740 {strides = array<i32>} : memref<1x1xf32, #tpu.memory_space<vmem>>, vector<1x1xf32>,
    return
  }
}

</mosaic_0001>

<bundles_post_ra>
// kernel: model_forward.1
= control target key start
LH: loop header
LB: loop body
LE: loop exit
PB: predicated region body
PF: predicated region fallthrough
CT: control target
= control target key end

     0   :  { %s9876_s0 = inlined_call_operand.vmem [shape: s32[16,1], index: 0, kind: input, shape index: {}]   ;;  %s9877_s1 = inlined_call_operand.vmem [shape: s32[16,1], index: 1, kind: input, shape index: {}]   ;;  %s9878_s2 = inlined_call_operand.vmem [shape: s32[2,1,8], index: 2, kind: input, shape index: {}]   ;;  %s9879_s3 = inlined_call_operand.vmem [shape: f32[2,8], index: 3, kind: input, shape index: {}]   ;;  %s9880_s4 = inlined_call_operand.vmem [shape: f32[64,128], index: 4, kind: input, shape index: {}]   ;;  %s9881_s5 = inlined_call_operand.hbm [shape: f32[64,128], index: 5, kind: input, shape index: {}]   ;;  %s9882_s6 = inlined_call_operand.vmem [shape: f32[1,128], index: 6, kind: input, shape index: {}]   ;;  %s9883_s7 = inlined_call_operand.vmem [shape: f32[1,128], index: 7, kind: input, shape index: {}]   ;;  %s9884_s8 = inlined_call_operand.vmem [shape: f32[1,128], index: 8, kind: input, shape index: {}]   ;;  %s9885_s9 = inlined_call_operand.hbm [shape: bf16[2,128,384], index: 9, kind: input, shape index: {}]   ;;  %s9886_s10 = inlined_call_operand.vmem [shape: f32[2,1,384], index: 10, kind: input, shape index: {}]   ;;  %s9887_s11 = inlined_call_operand.vmem [shape: bf16[2,128,128], index: 11, kind: input, shape index: {}]   ;;  %s9888_s12 = inlined_call_operand.vmem [shape: f32[2,1,128], index: 12, kind: input, shape index: {}]   ;;  %s9889_s13 = inlined_call_operand.vmem [shape: f32[2,1,128], index: 13, kind: input, shape index: {}]   ;;  %s9890_s14 = inlined_call_operand.vmem [shape: f32[2,1,128], index: 14, kind: input, shape index: {}]   ;;  %s9891_s15 = inlined_call_operand.hbm [shape: bf16[2,128,512], index: 15, kind: input, shape index: {}]   ;;  %s9892_s16 = inlined_call_operand.vmem [shape: f32[2,1,512], index: 16, kind: input, shape index: {}]   ;;  %s9893_s17 = inlined_call_operand.hbm [shape: bf16[2,512,128], index: 17, kind: input, shape index: {}]   ;;  %s9894_s18 = inlined_call_operand.vmem [shape: f32[2,1,128], index: 18, kind: input, shape index: {}]   ;;  %s9895_s19 = inlined_call_operand.vmem [shape: f32[2,1,128], index: 19, kind: input, shape index: {}]   ;;  %s9896_s20 = inlined_call_operand.vmem [shape: f32[2,1,128], index: 20, kind: input, shape index: {}]   ;;  %s9897_s21 = inlined_call_operand.vmem [shape: f32[128,8], index: 21, kind: input, shape index: {}]   ;;  %s9898_s22 = inlined_call_operand.vmem [shape: f32[1,8], index: 22, kind: input, shape index: {}]   ;;  %s9899_s23 = inlined_call_operand.hbm [shape: f32[2,8], index: 23, kind: output, shape index: {0}]   ;;  %s9900_s24 = inlined_call_operand.hbm [shape: f32[1,1], index: 24, kind: output, shape index: {1}]  }
   0x1   :  { %9907 = sst [smem:[#allocation19_spill]] %s9876_s0 }
   0x2   :  { %9908 = sst [smem:[#allocation20_spill]] %s9877_s1 }
   0x3   :  { %9909 = sst [smem:[#allocation21_spill]] %s9878_s2 }
   0x4   :  { %9910 = sst [smem:[#allocation22_spill]] %s9879_s3 }
   0x5   :  { %9911 = sst [smem:[#allocation23_spill]] %s9880_s4 }
   0x6   :  { %9912 = sst [smem:[#allocation24_spill]] %s9881_s5 }
   0x7   :  { %9913 = sst [smem:[#allocation25_spill]] %s9882_s6 }
   0x8   :  { %9914 = sst [smem:[#allocation26_spill]] %s9883_s7 }
   0x9   :  { %9915 = sst [smem:[#allocation27_spill]] %s9884_s8 }
   0xa   :  { %9916 = sst [smem:[#allocation28_spill]] %s9900_s24 }
   0xb   :  { %30 = vsyncpa [#allocation4], 0 }
   0xc   :  { %31 = vsyncpa [#allocation7], 0 }
   0xd   :  { %32 = vsyncpa [#allocation10], 0 }
   0xe   :  { %33 = vsyncpa [#allocation5], 0 }
   0xf   :  { %34 = vsyncpa [#allocation13], 0  ;;  %s8518_s5 = smov [#allocation6]   ;;  %s8376_s6 = scalar_lea.hbm %s9885_s9, 6144 }
  0x10   :  { %s68_s26 = sshll.u32 %s8518_s5, 4  ;;  %p8377_p0 = scmp.ne.s32.totalorder %s9885_s9, %s8376_s6  ;;  %s69_s26 = int_to_ptr.vmem [resolvable:$true] %s68_s26 }
  0x11   :  { %p8380_p1 = scmp.lt.u32.totalorder %s8376_s6, %s9885_s9 }
  0x13   :  { %p8382_p2 = pnand %p8380_p1, %p8377_p0 }
  0x15   :  { %8385 = shalt.err (!%p8382_p2)
}
  0x16   :  { %s8386_s30 = scalar_lea.vmem %s69_s26, 6144  ;;  %p8391_p4 = scmp.lt.s32.totalorder %s69_s26, %s69_s26 }
  0x17   :  { %p8387_p3 = scmp.ne.s32.totalorder %s69_s26, %s8386_s30  ;;  %p8392_p5 = scmp.lt.s32.totalorder %s8386_s30, %s8386_s30 }
  0x19   :  { %p8393_p6 = por %p8392_p5, %p8391_p4 }
  0x1b   :  { %p8394_p7 = pnand %p8393_p6, %p8387_p3 }
  0x1d   :  { %8397 = shalt.err (!%p8394_p7)
}
  0x1e   :  { %s8519_s3 = smov 192   ;;  %s8520_s25 = smov 12  }
  0x1f   :  { %74 = dma.hbm_to_vmem [thread:$0]  %s9885_s9, 6144, %s69_s26, [#allocation7], %s8519_s3, %s8519_s3, %s8520_s25  }
  0x20   :  { %s8521_s1 = smov [#allocation3]   ;;  %s9917_s6 = sld [smem:[#allocation24_spill]] }
  0x21   :  { %s50_s5 = sshll.u32 %s8521_s1, 4  ;;  %s51_s5 = int_to_ptr.vmem [resolvable:$true] %s50_s5 }
  0x26   :  { %s8398_s2 = scalar_lea.hbm %s9917_s6, 1024 }
  0x27   :  { %p8399_p8 = scmp.ne.s32.totalorder %s9917_s6, %s8398_s2  ;;  %p8402_p9 = scmp.lt.u32.totalorder %s8398_s2, %s9917_s6 }
  0x29   :  { %p8404_p10 = pnand %p8402_p9, %p8399_p8 }
  0x2b   :  { %8407 = shalt.err (!%p8404_p10)
}
  0x2c   :  { %s8408_s24 = scalar_lea.vmem %s51_s5, 1024  ;;  %p8413_p12 = scmp.lt.s32.totalorder %s51_s5, %s51_s5 }
  0x2d   :  { %p8409_p11 = scmp.ne.s32.totalorder %s51_s5, %s8408_s24  ;;  %p8414_p13 = scmp.lt.s32.totalorder %s8408_s24, %s8408_s24 }
  0x2f   :  { %p8415_p0 = por %p8414_p13, %p8413_p12 }
  0x31   :  { %p8416_p1 = pnand %p8415_p0, %p8409_p11 }
  0x33   :  { %8419 = shalt.err (!%p8416_p1)
}
  0x34   :  { %s8522_s9 = smov 128   ;;  %s8523_s26 = smov 8  }
  0x35   :  { %56 = dma.hbm_to_vmem [thread:$0]  %s9917_s6, 1024, %s51_s5, [#allocation4], %s8522_s9, %s8522_s9, %s8523_s26  }
  0x36   :  { %s8524_s8 = smov [#allocation8]   ;;  %s8420_s28 = scalar_lea.hbm %s9891_s15, 8192 }
  0x37   :  { %s90_s4 = sshll.u32 %s8524_s8, 4  ;;  %p8421_p2 = scmp.ne.s32.totalorder %s9891_s15, %s8420_s28  ;;  %s91_s4 = int_to_ptr.vmem [resolvable:$true] %s90_s4 }
  0x38   :  { %p8424_p3 = scmp.lt.u32.totalorder %s8420_s28, %s9891_s15 }
  0x3a   :  { %p8426_p4 = pnand %p8424_p3, %p8421_p2 }
  0x3c   :  { %8429 = shalt.err (!%p8426_p4)
}
  0x3d   :  { %s8430_s7 = scalar_lea.vmem %s91_s4, 8192  ;;  %p8435_p6 = scmp.lt.s32.totalorder %s91_s4, %s91_s4 }
  0x3e   :  { %p8431_p5 = scmp.ne.s32.totalorder %s91_s4, %s8430_s7  ;;  %p8436_p7 = scmp.lt.s32.totalorder %s8430_s7, %s8430_s7 }
  0x40   :  { %p8437_p8 = por %p8436_p7, %p8435_p6 }
  0x42   :  { %p8438_p9 = pnand %p8437_p8, %p8431_p5 }
  0x44   :  { %8441 = shalt.err (!%p8438_p9)
}
  0x45   :  { %s8525_s5 = smov 256   ;;  %s8526_s6 = smov 16  }
  0x46   :  { %96 = dma.hbm_to_vmem [thread:$0]  %s9891_s15, 8192, %s91_s4, [#allocation7], %s8525_s5, %s8525_s5, %s8526_s6  }
  0x47   :  { %s8527_s26 = smov [#allocation9]   ;;  %s8442_s1 = scalar_lea.hbm %s9893_s17, 8192 }
  0x48   :  { %s104_s3 = sshll.u32 %s8527_s26, 4  ;;  %p8443_p10 = scmp.ne.s32.totalorder %s9893_s17, %s8442_s1  ;;  %s105_s3 = int_to_ptr.vmem [resolvable:$true] %s104_s3 }
  0x49   :  { %p8446_p11 = scmp.lt.u32.totalorder %s8442_s1, %s9893_s17 }
  0x4b   :  { %p8448_p12 = pnand %p8446_p11, %p8443_p10 }
  0x4d   :  { %8451 = shalt.err (!%p8448_p12)
}
  0x4e   :  { %s8452_s24 = scalar_lea.vmem %s105_s3, 8192  ;;  %p8457_p0 = scmp.lt.s32.totalorder %s105_s3, %s105_s3 }
  0x4f   :  { %p8453_p13 = scmp.ne.s32.totalorder %s105_s3, %s8452_s24  ;;  %p8458_p1 = scmp.lt.s32.totalorder %s8452_s24, %s8452_s24 }
  0x51   :  { %p8459_p2 = por %p8458_p1, %p8457_p0 }
  0x53   :  { %p8460_p3 = pnand %p8459_p2, %p8453_p13 }
  0x55   :  { %8463 = shalt.err (!%p8460_p3)
}
  0x56   :  { %s8528_s15 = smov 64   ;;  %s8529_s4 = smov 4  }
  0x57   :  { %110 = dma.hbm_to_vmem [thread:$0]  %s9893_s17, 8192, %s105_s3, [#allocation10], %s8528_s15, %s8528_s15, %s8529_s4  }
  0x58   :  { %8508 = dma.done.wait [#allocation4], 1024  }
  0x59   :  { %8509 = vsyncadd [#allocation4], 4294966272 }
  0x5a   :  { %8510 = dma.done.wait [#allocation7], 14336  }
  0x5b   :  { %8511 = vsyncadd [#allocation7], 4294952960 }
  0x5c   :  { %8512 = dma.done.wait [#allocation10], 8192  }
  0x5d   :  { %8513 = vsyncadd [#allocation10], 4294959104  ;;  %v8530_v0 = vmov 0   ;;  %s9918_s9 = sld [smem:[#allocation20_spill]]  ;;  %s9919_s17 = sld [smem:[#allocation19_spill]]  ;;  %v172_v4 = vld [vmem:[#allocation3] sm:$0xff]  ;;  %v138_v20 = vlaneseq }
  0x5e   :  { %7948 = vset.pattern.permute.xlu0 %v8530_v0  ;;  %7949 = vset.pattern.permute.xlu1 %v8530_v0  ;;  %v173_v5 = vld [vmem:[#allocation3 + $0x8] sm:$0xff]  ;;  %v174_v8 = vld [vmem:[#allocation3 + $0x10] sm:$0xff]  ;;  %v175_v9 = vld [vmem:[#allocation3 + $0x18] sm:$0xff]  ;;  %s9920_s29 = sld [smem:[#allocation23_spill]]  ;;  %vm180_vm0 = vcmask 523264   ;;  %v8531_v24 = vmov 0.0  }
  0x5f   :  { %611 = vmatprep.mubr.bf16.mxu1 %v8530_v0  ;;  %v7864_v7 = vpack.c.bf16 %v173_v5, %v172_v4  ;;  %v7868_v10 = vpack.c.bf16 %v175_v9, %v174_v8  ;;  %v176_v11 = vld [vmem:[#allocation3 + $0x20] sm:$0xff]  ;;  %v177_v12 = vld [vmem:[#allocation3 + $0x28] sm:$0xff]  ;;  %v178_v14 = vld [vmem:[#allocation3 + $0x30] sm:$0xff]  ;;  %v8739_v21 = vand.u32 127, %v138_v20  ;;  %s9921_s24 = sld [smem:[#allocation25_spill]]  ;;  %vm8532_vm5 = vmmov 0  }
  0x60   :  { %v7872_v13 = vpack.c.bf16 %v177_v12, %v176_v11  ;;  %v179_v15 = vld [vmem:[#allocation3 + $0x38] sm:$0xff]  ;;  %v7950_v45 = vld [vmem:[#allocation6 + $0x4] ss:$12 sps:$4 sm:$0xff]   ;;  %v7952_v46 = vld [vmem:[#allocation6] ss:$12 sps:$4 sm:$0xff]   ;;  %s9922_s0 = sld [smem:[#allocation26_spill]] }
  0x61   :  { %7865 = vmatprep.subr.bf16.mxu0 %v7864_v7  ;;  %v7876_v16 = vpack.c.bf16 %v179_v15, %v178_v14  ;;  %v7953_v47 = vld [vmem:[#allocation6 + $0x8] ss:$12 sps:$4 sm:$0xff]   ;;  %579 = vmatprep.subr.bf16.mxu1 %v7950_v45  ;;  %v7956_v57 = vld [vmem:[#allocation6 + $0x18] ss:$12 sps:$4 sm:$0xff]   ;;  %v7957_v58 = vld [vmem:[#allocation6 + $0x20] ss:$12 sps:$4 sm:$0xff]  }
  0x62   :  { %7867 = vmatpush3.bf16.msra.mxu0 %v7864_v7  ;;  %v7954_v48 = vld [vmem:[#allocation6 + $0x1c] ss:$12 sps:$4 sm:$0xff]   ;;  %580 = vmatpush1.bf16.msra.mxu1 %v7952_v46  ;;  %v7958_v59 = vld [vmem:[#allocation6 + $0x34] ss:$12 sps:$4 sm:$0xff]   ;;  %v7961_v61 = vld [vmem:[#allocation6 + $0x38] ss:$12 sps:$4 sm:$0xff]  }
  0x63   :  { %v136_v1 = vld [vmem:[%s9918_s9] sm:$0xff]  ;;  %v137_v3 = vld [vmem:[%s9918_s9 + $0x8] sm:$0xff]  ;;  %7869 = vmatprep.subr.bf16.mxu0 %v7868_v10  ;;  %581 = vmatprep.subr.bf16.mxu1 %v7954_v48  ;;  %v7973_v7 = vld [vmem:[#allocation6 + $0x80] ss:$12 sps:$4 sm:$0xff]   ;;  %s9923_s30 = sld [smem:[#allocation27_spill]]  ;;  %vm669_vm6 = vcmask 130048  }
  0x64   :  { %v134_v2 = vld [vmem:[%s9919_s17] sm:$0xff]  ;;  %153 = vperm.xlu0 %7948, %v136_v1   ;;  %v135_v6 = vld [vmem:[%s9919_s17 + $0x8] sm:$0xff]  ;;  %v166_v26 = vld [vmem:[%s9920_s29 + $0x10] sm:$0xff]  ;;  %vm806_vm7 = vcmask 1043456   ;;  %s9924_s3 = sld [smem:[#allocation21_spill]]  ;;  %vm778_vm8 = vcmask 64512  }
  0x65   :  { %141 = vperm.xlu1 %7949, %v134_v2   ;;  %v164_v17 = vld [vmem:[%s9920_s29] sm:$0xff]  ;;  %v165_v18 = vld [vmem:[%s9920_s29 + $0x8] sm:$0xff]  ;;  %v167_v27 = vld [vmem:[%s9920_s29 + $0x18] sm:$0xff]  ;;  %s8533_s27 = smov 112   ;;  %s8534_s28 = smov 96   ;;  %vm1136_vm9 = vcmask 261248  }
  0x66   :  { %7871 = vmatpush3.bf16.msra.mxu0 %v7868_v10  ;;  %v7880_v19 = vpack.c.bf16 %v165_v18, %v164_v17  ;;  %v7884_v29 = vpack.c.bf16 %v167_v27, %v166_v26  ;;  %v168_v32 = vld [vmem:[%s9920_s29 + $0x20] sm:$0xff]  ;;  %v169_v33 = vld [vmem:[%s9920_s29 + $0x28] sm:$0xff]  ;;  %v170_v35 = vld [vmem:[%s9920_s29 + $0x30] sm:$0xff]  ;;  %582 = vmatpush1.bf16.msra.mxu1 %v7956_v57  ;;  %s8535_s2 = smov 80   ;;  %vm1371_vm10 = vcmask 392448   ;;  %vm1606_vm11 = vcmask 523648  }
  0x67   :  { %7873 = vmatprep.subr.bf16.mxu0 %v7872_v13  ;;  %v7888_v34 = vpack.c.bf16 %v169_v33, %v168_v32  ;;  %v171_v36 = vld [vmem:[%s9920_s29 + $0x38] sm:$0xff]  ;;  %v6730_v40 = vld [vmem:[%s9921_s24] ss:$0 sm:$0xff]  ;;  %583 = vmatprep.subr.bf16.mxu1 %v7958_v59  ;;  %v7974_v8 = vld [vmem:[#allocation6 + $0x94] ss:$12 sps:$4 sm:$0xff]   ;;  %s8536_s24 = smov 48  }
  0x68   :  { %156 = vperm.xlu0 %7948, %v137_v3   ;;  %v7892_v37 = vpack.c.bf16 %v171_v36, %v170_v35  ;;  %v7960_v60 = vld [vmem:[#allocation6 + $0x30] ss:$12 sps:$4 sm:$0xff]   ;;  %v7962_v62 = vld [vmem:[#allocation6 + $0x4c] ss:$12 sps:$4 sm:$0xff]   ;;  %v7964_v63 = vld [vmem:[#allocation6 + $0x48] ss:$12 sps:$4 sm:$0xff]  }
  0x69   :  { %144 = vperm.xlu1 %7949, %v135_v6   ;;  %v7965_v1 = vld [vmem:[#allocation6 + $0x50] ss:$12 sps:$4 sm:$0xff]   ;;  %v7968_v3 = vld [vmem:[#allocation6 + $0x60] ss:$12 sps:$4 sm:$0xff]   ;;  %v7969_v4 = vld [vmem:[#allocation6 + $0x68] ss:$12 sps:$4 sm:$0xff]  }
  0x6a   :  { %7875 = vmatpush3.bf16.msra.mxu0 %v7872_v13  ;;  %584 = vmatpush1.bf16.msra.mxu1 %v7960_v60  ;;  %v7966_v2 = vld [vmem:[#allocation6 + $0x64] ss:$12 sps:$4 sm:$0xff]   ;;  %v7970_v5 = vld [vmem:[#allocation6 + $0x7c] ss:$12 sps:$4 sm:$0xff]   ;;  %v7978_v11 = vld [vmem:[#allocation6 + $0xac] ss:$12 sps:$4 sm:$0xff]  }
  0x6b   :  { %7877 = vmatprep.subr.bf16.mxu0 %v7876_v16  ;;  %585 = vmatprep.subr.bf16.mxu1 %v7962_v62  ;;  %v7972_v6 = vld [vmem:[#allocation6 + $0x78] ss:$12 sps:$4 sm:$0xff]   ;;  %v7976_v9 = vld [vmem:[#allocation6 + $0x90] ss:$12 sps:$4 sm:$0xff]   ;;  %v7980_v12 = vld [vmem:[#allocation6 + $0xa8] ss:$12 sps:$4 sm:$0xff]  }
  0x6c   :  { %v7977_v10 = vld [vmem:[#allocation6 + $0x98] ss:$12 sps:$4 sm:$0xff]   ;;  %v7981_v13 = vld [vmem:[#allocation6 + $0xb0] ss:$12 sps:$4 sm:$0xff]   ;;  %s8537_s29 = smov 32   ;;  %vm1841_vm12 = vcmask 654848  }
  0x6d   :  { %v434_v36 = vld [vmem:[%s9886_s10] sm:$0x7]  ;;  %vm2076_vm13 = vcmask 786048   ;;  %vm2311_vm14 = vcmask 917248   ;;  %vm2546_vm15 = vcmask 1048448   ;;  %s9925_s8 = sld [smem:[#allocation22_spill]] }
  0x6e   :  { %7879 = vmatpush3.bf16.msra.mxu0 %v7876_v16  ;;  %586 = vmatpush1.bf16.msra.mxu1 %v7964_v63  ;;  %v393_v63 = vld [vmem:[%s9924_s3] sm:$0x1] }
  0x6f   :  { %7881 = vmatprep.subr.bf16.mxu0 %v7880_v19  ;;  %587 = vmatprep.subr.bf16.mxu1 %v7966_v2 }
  0x72   :  { %588 = vmatpush1.bf16.msra.mxu1 %v7968_v3  ;;  %v394_v3 = vld [vmem:[%s9924_s3 + $0x1] sm:$0x1] }
  0x73   :  { %589 = vmatprep.subr.bf16.mxu1 %v7970_v5 }
  0x76   :  { %590 = vmatpush1.bf16.msra.mxu1 %v7972_v6 }
  0x77   :  { %591 = vmatprep.subr.bf16.mxu1 %v7974_v8 }
  0x7a   :  { %592 = vmatpush1.bf16.msra.mxu1 %v7976_v9 }
  0x7b   :  { %593 = vmatprep.subr.bf16.mxu1 %v7978_v11 }
  0x7e   :  { %594 = vmatpush1.bf16.msra.mxu1 %v7980_v12 }
  0x7f   :  { %7378 = vmatprep.subr.bf16.mxu1 %v8531_v24 }
  0xe3   :  { %v154_v22 = vpop.permute.xlu0 %153 }
  0xe4   :  { %vm158_vm1 = vcmp.eq.s32.totalorder %v8739_v21, %v154_v22  ;;  %v142_v23 = vpop.permute.xlu1 %141 }
  0xe5   :  { %v6724_v25 = vsel %vm158_vm1, 1.0, %v8531_v24  ;;  %vm146_vm2 = vcmp.eq.s32.totalorder %v8739_v21, %v142_v23  ;;  %vm6637_vm1 = vcmask 58368  }
  0xe6   :  { %7336 = vmatprep.mubr.msk.f32.mxu0 %vm180_vm0, %v6724_v25  ;;  %v6722_v30 = vsel %vm146_vm2, 1.0, %v8531_v24  ;;  %v6731_v25 = vld [vmem:[%s9922_s0] ss:$0 sm:$0xff] }
  0xe7   :  { %v157_v28 = vpop.permute.xlu0 %156 }
  0xe8   :  { %vm159_vm3 = vcmp.eq.s32.totalorder %v8739_v21, %v157_v28  ;;  %v145_v38 = vpop.permute.xlu1 %144 }
  0xe9   :  { %v6725_v31 = vsel %vm159_vm3, 1.0, %v8531_v24  ;;  %vm147_vm4 = vcmp.eq.s32.totalorder %v8739_v21, %v145_v38 }
  0xea   :  { %7337 = vmatmul.mubr.msk.f32.vlgmr.msra.gmra.mrb[0].mxu0 %vm180_vm0, %v6725_v31  ;;  %v6723_v39 = vsel %vm147_vm4, 1.0, %v8531_v24 }
  0xeb   :  { %7883 = vmatpush3.bf16.msra.mxu0 %v7880_v19  ;;  %7355 = vmatprep.mubr.msk.f32.mxu0 %vm180_vm0, %v6722_v30 }
  0xec   :  { %7885 = vmatprep.subr.bf16.mxu0 %v7884_v29 }
  0xef   :  { %7887 = vmatpush3.bf16.msra.mxu0 %v7884_v29  ;;  %v6732_v29 = vld [vmem:[%s9923_s30] ss:$0 sm:$0xff] }
  0xf0   :  { %7889 = vmatprep.subr.bf16.mxu0 %v7888_v34 }
  0xf3   :  { %7891 = vmatpush3.bf16.msra.mxu0 %v7888_v34  ;;  %v8813_v34 = vshrl.u32 %v138_v20, 7 }
  0xf4   :  { %7893 = vmatprep.subr.bf16.mxu0 %v7892_v37 }
  0xf5   :  { %v8816_v35 = vsub.s32 1, %v8813_v34 }
  0xf7   :  { %7895 = vmatpush3.bf16.msra.mxu0 %v7892_v37  ;;  %v8822_v37 = vsub.s32 2, %v8813_v34  ;;  %v443_v38 = vrot.slane %v434_v36, %v8816_v35 }
  0xf8   :  { %7358 = vmatprep.subr.bf16.mxu0 %v8531_v24 }
  0xf9   :  { %v447_v20 = vrot.slane %v434_v36, %v8822_v37 }
  0xfa   :  { %7356 = vmatmul.mubr.msk.f32.vlgmr.msra.gmra.mrb[0].mxu0 %vm180_vm0, %v6723_v39  ;;  %v8826_v39 = vsub.s32 0, %v8813_v34 }
  0xfb   :  { %7359 = vmatpush3.bf16.msra.mxu0 %v7953_v47  ;;  %7374 = vmatprep.mubr.msk.bf16.mxu0 %vm8532_vm5, %v8531_v24 }
  0xfc   :  { %7360 = vmatprep.subr.bf16.mxu0 %v8531_v24 }
  0xff   :  { %7361 = vmatpush3.bf16.msra.mxu0 %v7957_v58 }
 0x100   :  { %7362 = vmatprep.subr.bf16.mxu0 %v8531_v24 }
 0x103   :  { %7363 = vmatpush3.bf16.msra.mxu0 %v7961_v61 }
 0x104   :  { %7364 = vmatprep.subr.bf16.mxu0 %v8531_v24 }
 0x107   :  { %7365 = vmatpush3.bf16.msra.mxu0 %v7965_v1  ;;  %v395_v1 = vcvt.s32.f32 %v393_v63 }
 0x108   :  { %7366 = vmatprep.subr.bf16.mxu0 %v8531_v24 }
 0x109   :  { %v397_v2 = vsub.f32 1.0, %v395_v1 }
 0x10b   :  { %7367 = vmatpush3.bf16.msra.mxu0 %v7969_v4  ;;  %v396_v4 = vcvt.s32.f32 %v394_v3  ;;  %v399_v5 = vmul.f32 -1e+09, %v397_v2 }
 0x10c   :  { %7368 = vmatprep.subr.bf16.mxu0 %v8531_v24 }
 0x10d   :  { %v398_v6 = vsub.f32 1.0, %v396_v4 }
 0x10f   :  { %7369 = vmatpush3.bf16.msra.mxu0 %v7973_v7  ;;  %v8866_v7 = vrot.slane %v399_v5, %v8826_v39  ;;  %v400_v12 = vmul.f32 -1e+09, %v398_v6 }
 0x110   :  { %7370 = vmatprep.subr.bf16.mxu0 %v8531_v24 }
 0x113   :  { %7371 = vmatpush3.bf16.msra.mxu0 %v7977_v10 }
 0x114   :  { %7372 = vmatprep.subr.bf16.mxu0 %v8531_v24 }
 0x117   :  { %7373 = vmatpush3.bf16.msra.mxu0 %v7981_v13 }
 0x118   :  { %7402 = vmatprep.subr.bf16.mxu0 %v8531_v24 }
 0x1cd   :  { %v7357_v41 = vpop.f32.mrb[0].mxu0 }
 0x1ce   :  { %v351_v42 = vadd.f32 %v7357_v41, %v6730_v40  ;;  %v334_v43 = vpop.f32.mrb[1].mxu0 }
 0x1cf   :  { %v350_v44 = vadd.f32 %v6730_v40, %v334_v43 }
 0x1d0   :  { %356 = vadd.xlane.f32.xlu1 %v351_v42 }
 0x1d1   :  { %354 = vadd.xlane.f32.xlu0 %v350_v44 }
 0x25d   :  { %v357_v49 = vpop.xlane.xlu1 %356 }
 0x25e   :  { %v355_v50 = vpop.xlane.xlu0 %354  ;;  %v360_v51 = vmul.f32 0.0078125, %v357_v49 }
 0x25f   :  { %v359_v52 = vmul.f32 0.0078125, %v355_v50  ;;  %v439_v50 = vrot.slane %v434_v36, %v8826_v39 }
 0x260   :  { %v8780_v55 = vsub.f32 %v351_v42, %v360_v51 }
 0x261   :  { %v8776_v53 = vsub.f32 %v350_v44, %v359_v52 }
 0x262   :  { %v364_v56 = vmul.f32 %v8780_v55, %v8780_v55 }
 0x263   :  { %v363_v54 = vmul.f32 %v8776_v53, %v8776_v53 }
 0x265   :  { %365 = vadd.xlane.f32.xlu0 %v363_v54 }
 0x269   :  { %367 = vadd.xlane.f32.xlu0 %v364_v56 }
 0x2f2   :  { %v366_v14 = vpop.xlane.xlu0 %365 }
 0x2f3   :  { %v369_v15 = vmul.f32 0.0078125, %v366_v14 }
 0x2f5   :  { %v371_v16 = vadd.f32 1e-05, %v369_v15 }
 0x2f6   :  { %v368_v17 = vpop.xlane.xlu0 %367 }
 0x2f7   :  { %8190 = vrsqrt.f32 %v371_v16  ;;  %v370_v18 = vmul.f32 0.0078125, %v368_v17  ;;  %v8871_v16 = vrot.slane %v400_v12, %v8826_v39 }
 0x2f9   :  { %v372_v19 = vadd.f32 1e-05, %v370_v18 }
 0x2fb   :  { %8192 = vrsqrt.f32 %v372_v19 }
 0x301   :  { %v8191_v22 = vpop.eup %8190 }
 0x302   :  { %v375_v23 = vmul.f32 %v8191_v22, %v8776_v53 }
 0x304   :  { %v383_v28 = vmul.f32 %v6731_v25, %v375_v23 }
 0x305   :  { %v8193_v26 = vpop.eup %8192 }
 0x306   :  { %v376_v27 = vmul.f32 %v8193_v26, %v8780_v55  ;;  %v8802_v31 = vadd.f32 %v6732_v29, %v383_v28 }
 0x308   :  { %v384_v30 = vmul.f32 %v6731_v25, %v376_v27 }
 0x30a   :  { %v8804_v32 = vadd.f32 %v6732_v29, %v384_v30 }
 0x30c   :  { %v401_v33 = vpack.c.bf16 %v8804_v32, %v8802_v31 }
 0x30e   :  { %612 = vmatmul.mubr.bf16.vlgmr.msra.gmra.mrb[0].mxu1 %v401_v33  ;;  %7375 = vmatmul.mubr.bf16.vlgmr.msra.gmra.mrb[4].mxu0 %v401_v33 }
 0x30f   :  { %7380 = vmatprep.mubr.msk.bf16.mxu1 %vm8532_vm5, %v8531_v24  ;;  %7404 = vmatprep.mubr.msk.bf16.mxu0 %vm8532_vm5, %v8531_v24 }
 0x3e1   :  { %v613_v40 = vpop.f32.mrb[0].mxu1  ;;  %v656_v41 = vpop.f32.mrb[4].mxu0 }
 0x3e2   :  { %v615_v42 = vpop.f32.mrb[1].mxu1  ;;  %v7376_v43 = vpop.f32.mrb[5].mxu0  ;;  %v614_v54 = vadd.f32 %v613_v40, %v439_v50  ;;  %v657_v57 = vadd.f32 %v656_v41, %v447_v20 }
 0x3e3   :  { %v616_v44 = vadd.f32 %v615_v42, %v443_v38  ;;  %v617_v45 = vpop.f32.mrb[2].mxu1  ;;  %v659_v46 = vpop.f32.mrb[6].mxu0 }
 0x3e4   :  { %v8829_v47 = vadd.f32 %v659_v46, %v447_v20  ;;  %v619_v48 = vpop.f32.mrb[3].mxu1  ;;  %v7377_v49 = vpop.f32.mrb[7].mxu0  ;;  %v8839_v56 = vpack.c.bf16 %v614_v54, %v614_v54  ;;  %v618_v59 = vadd.f32 %v617_v45, %v439_v50  ;;  %v8848_v60 = vpack.c.bf16 %v657_v57, %v657_v57 }
 0x3e5   :  { %v8832_v51 = vpack.c.bf16 %v616_v44, %v616_v44  ;;  %v620_v52 = vadd.f32 %v619_v48, %v443_v38 }
 0x3e6   :  { %v8850_v61 = vpack.c.bf16 %v618_v59, %v618_v59  ;;  %v808_v62 = vsel %vm806_vm7, %v8848_v60, 0  ;;  %v8889_v48 = vpack.c.bf16 %v8829_v47, %v8829_v47 }
 0x3e7   :  { %v674_v53 = vsel %vm669_vm6, %v8832_v51, 0  ;;  %v8837_v55 = vpack.c.bf16 %v620_v52, %v620_v52 }
 0x3e8   :  { %7379 = vmatpush3.bf16.xpose.msra.mxu1 %v674_v53  ;;  %v854_v53 = vsel %vm806_vm7, %v8889_v48, 0 }
 0x3e9   :  { %7384 = vmatprep.subr.bf16.mxu1 %v8531_v24  ;;  %v720_v58 = vsel %vm669_vm6, %v8837_v55, 0 }
 0x3ef   :  { %7381 = vmatmul.mubr.msk.bf16.vlgmr.msra.gmra.mrb[4].mxu1 %vm669_vm6, %v8839_v56 }
 0x3f0   :  { %7385 = vmatpush3.bf16.xpose.msra.mxu1 %v720_v58  ;;  %7386 = vmatprep.mubr.msk.bf16.mxu1 %vm8532_vm5, %v8531_v24 }
 0x3f1   :  { %7390 = vmatprep.subr.bf16.mxu1 %v8531_v24 }
 0x3f7   :  { %7387 = vmatmul.mubr.msk.bf16.vlgmr.msra.gmra.mrb[8].mxu1 %vm669_vm6, %v8850_v61 }
 0x3f8   :  { %7391 = vmatpush3.bf16.msra.mxu1 %v808_v62  ;;  %7392 = vmatprep.mubr.msk.bf16.mxu1 %vm8532_vm5, %v8531_v24 }
 0x3f9   :  { %7396 = vmatprep.subr.bf16.mxu1 %v8531_v24 }
 0x4c2   :  { %v710_v8 = vpop.f32.mrb[4].mxu1 }
 0x4c3   :  { %v762_v9 = vmul.f32 0.25, %v710_v8  ;;  %v7382_v10 = vpop.f32.mrb[5].mxu1 }
 0x4c4   :  { %v713_v11 = vpop.f32.mrb[6].mxu1 }
 0x4c5   :  { %v7383_v13 = vpop.f32.mrb[7].mxu1  ;;  %v776_v14 = vadd.f32 %v8866_v7, %v762_v9 }
 0x4c7   :  { %v779_v15 = vsel %vm778_vm8, %v776_v14, -inf }
 0x4c8   :  { %780 = vmax.xlane.f32.xlu1 %v779_v15 }
 0x4ca   :  { %v756_v17 = vpop.f32.mrb[8].mxu1 }
 0x4cb   :  { %v763_v18 = vmul.f32 0.25, %v756_v17  ;;  %v7388_v19 = vpop.f32.mrb[9].mxu1 }
 0x4cc   :  { %v759_v22 = vpop.f32.mrb[10].mxu1 }
 0x4cd   :  { %v7389_v23 = vpop.f32.mrb[11].mxu1  ;;  %v777_v25 = vadd.f32 %v8871_v16, %v763_v18 }
 0x4cf   :  { %v782_v26 = vsel %vm778_vm8, %v777_v25, -inf }
 0x4d0   :  { %783 = vmax.xlane.f32.xlu0 %v782_v26 }
 0x555   :  { %v781_v27 = vpop.xlane.xlu1 %780 }
 0x556   :  { %v785_v28 = vsub.f32 %v776_v14, %v781_v27 }
 0x558   :  { %v787_v29 = vmul.f32 1.442695, %v785_v28 }
 0x55a   :  { %8194 = vpow2.f32 %v787_v29 }
 0x55d   :  { %v784_v30 = vpop.xlane.xlu0 %783 }
 0x55e   :  { %v786_v33 = vsub.f32 %v777_v25, %v784_v30 }
 0x560   :  { %v789_v36 = vmul.f32 1.442695, %v786_v33 }
 0x562   :  { %8196 = vpow2.f32 %v789_v36 }
 0x564   :  { %v8195_v38 = vpop.eup %8194 }
 0x565   :  { %v791_v40 = vsel %vm778_vm8, %v8195_v38, 0.0 }
 0x566   :  { %792 = vadd.xlane.f32.xlu1 %v791_v40 }
 0x56c   :  { %v8197_v41 = vpop.eup %8196 }
 0x56d   :  { %v794_v20 = vsel %vm778_vm8, %v8197_v41, 0.0 }
 0x56e   :  { %795 = vadd.xlane.f32.xlu0 %v794_v20 }
 0x577   :  { %902 = vrot.lane.b32.xlu1 %v8832_v51, %s8533_s27 }
 0x57b   :  { %899 = vrot.lane.b32.xlu1 %v8839_v56, %s8533_s27 }
 0x57f   :  { %951 = vrot.lane.b32.xlu1 %v8850_v61, %s8533_s27 }
 0x584   :  { %954 = vrot.lane.b32.xlu0 %v8837_v55, %s8533_s27 }
 0x5f3   :  { %v793_v42 = vpop.xlane.xlu1 %792 }
 0x5f4   :  { %8198 = vrcp.f32 %v793_v42 }
 0x5f7   :  { %v903_v43 = vpop.permute.xlu1 %902 }
 0x5f8   :  { %v908_v44 = vsel %vm669_vm6, %v903_v43, 0 }
 0x5f9   :  { %7403 = vmatpush3.bf16.xpose.msra.mxu0 %v908_v44 }
 0x5fa   :  { %7414 = vmatprep.subr.bf16.mxu0 %v8531_v24 }
 0x5fb   :  { %v796_v45 = vpop.xlane.xlu0 %795  ;;  %v900_v49 = vpop.permute.xlu1 %899 }
 0x5fc   :  { %8200 = vrcp.f32 %v796_v45 }
 0x5fe   :  { %v8199_v46 = vpop.eup %8198 }
 0x5ff   :  { %v798_v50 = vmul.f32 %v8199_v46, %v8195_v38  ;;  %v955_v57 = vpop.permute.xlu0 %954  ;;  %v952_v62 = vpop.permute.xlu1 %951 }
 0x600   :  { %7405 = vmatmul.mubr.msk.bf16.vlgmr.msra.gmra.mrb[8].mxu0 %vm669_vm6, %v900_v49  ;;  %v960_v59 = vsel %vm669_vm6, %v955_v57, 0 }
 0x601   :  { %v801_v52 = vpack.c.bf16 %v798_v50, %v798_v50  ;;  %7416 = vmatprep.mubr.msk.bf16.mxu0 %vm8532_vm5, %v8531_v24 }
 0x603   :  { %7393 = vmatmul.mubr.msk.bf16.vlgmr.msra.gmra.mrb[12].mxu1 %vm778_vm8, %v801_v52 }
 0x604   :  { %7397 = vmatpush3.bf16.msra.mxu1 %v854_v53  ;;  %7398 = vmatprep.mubr.msk.bf16.mxu1 %vm8532_vm5, %v8531_v24 }
 0x605   :  { %7408 = vmatprep.subr.bf16.mxu1 %v8531_v24 }
 0x606   :  { %v8201_v47 = vpop.eup %8200 }
 0x607   :  { %v800_v54 = vmul.f32 %v8201_v47, %v8197_v41 }
 0x609   :  { %v802_v58 = vpack.c.bf16 %v800_v54, %v800_v54 }
 0x60b   :  { %7399 = vmatmul.mubr.msk.bf16.vlgmr.msra.gmra.mrb[16].mxu1 %vm778_vm8, %v802_v58 }
 0x60c   :  { %7410 = vmatprep.mubr.msk.bf16.mxu1 %vm8532_vm5, %v8531_v24 }
 0x60d   :  { %7409 = vmatpush3.bf16.xpose.msra.mxu1 %v960_v59 }
 0x60e   :  { %7420 = vmatprep.subr.bf16.mxu1 %v8531_v24 }
 0x614   :  { %7411 = vmatmul.mubr.msk.bf16.vlgmr.msra.gmra.mrb[20].mxu1 %vm669_vm6, %v952_v62 }
 0x615   :  { %7422 = vmatprep.mubr.msk.bf16.mxu1 %vm8532_vm5, %v8531_v24 }
 0x6d3   :  { %v944_v63 = vpop.f32.mrb[8].mxu0 }
 0x6d4   :  { %v1002_v1 = vmul.f32 0.25, %v944_v63  ;;  %v7406_v2 = vpop.f32.mrb[9].mxu0 }
 0x6d5   :  { %v947_v3 = vpop.f32.mrb[10].mxu0 }
 0x6d6   :  { %v844_v4 = vpop.f32.mrb[12].mxu1  ;;  %v7407_v5 = vpop.f32.mrb[11].mxu0  ;;  %v1004_v6 = vadd.f32 %v1002_v1, %v8866_v7 }
 0x6d7   :  { %896 = vst.msk [vmem:[#allocation2] sm:$0xff] %vm669_vm6, %v844_v4  ;;  %v7394_v8 = vpop.f32.mrb[13].mxu1 }
 0x6d8   :  { %v847_v9 = vpop.f32.mrb[14].mxu1  ;;  %v1006_v10 = vsel %vm778_vm8, %v1004_v6, -inf }
 0x6d9   :  { %1007 = vmax.xlane.f32.xlu0 %v1006_v10  ;;  %v7395_v11 = vpop.f32.mrb[15].mxu1 }
 0x6de   :  { %v890_v12 = vpop.f32.mrb[16].mxu1 }
 0x6df   :  { %897 = vst.msk [vmem:[#allocation2 + $0x8] sm:$0xff] %vm669_vm6, %v890_v12  ;;  %v7400_v13 = vpop.f32.mrb[17].mxu1 }
 0x6e0   :  { %v893_v14 = vpop.f32.mrb[18].mxu1 }
 0x6e1   :  { %v7401_v15 = vpop.f32.mrb[19].mxu1 }
 0x6e7   :  { %v996_v17 = vpop.f32.mrb[20].mxu1 }
 0x6e8   :  { %v1003_v18 = vmul.f32 0.25, %v996_v17  ;;  %v7412_v19 = vpop.f32.mrb[21].mxu1 }
 0x6e9   :  { %v999_v22 = vpop.f32.mrb[22].mxu1 }
 0x6ea   :  { %v7413_v23 = vpop.f32.mrb[23].mxu1  ;;  %v1005_v25 = vadd.f32 %v1003_v18, %v8871_v16 }
 0x6ec   :  { %v1009_v26 = vsel %vm778_vm8, %v1005_v25, -inf }
 0x6ed   :  { %1010 = vmax.xlane.f32.xlu1 %v1009_v26 }
 0x6fe   :  { %1031 = vrot.lane.b32.xlu1 %v8848_v60, %s8533_s27 }
 0x702   :  { %1141 = vrot.lane.b32.xlu1 %v8832_v51, %s8534_s28 }
 0x706   :  { %1191 = vrot.lane.b32.xlu1 %v8837_v55, %s8534_s28 }
 0x70a   :  { %1189 = vrot.lane.b32.xlu1 %v8850_v61, %s8534_s28 }
 0x766   :  { %v1008_v27 = vpop.xlane.xlu0 %1007 }
 0x767   :  { %v1012_v28 = vsub.f32 %v1004_v6, %v1008_v27 }
 0x769   :  { %v1014_v29 = vmul.f32 1.442695, %v1012_v28 }
 0x76b   :  { %8202 = vpow2.f32 %v1014_v29 }
 0x775   :  { %v8203_v30 = vpop.eup %8202 }
 0x776   :  { %v1018_v33 = vsel %vm778_vm8, %v8203_v30, 0.0 }
 0x777   :  { %1019 = vadd.xlane.f32.xlu0 %v1018_v33 }
 0x77a   :  { %v1011_v36 = vpop.xlane.xlu1 %1010 }
 0x77b   :  { %v1013_v38 = vsub.f32 %v1005_v25, %v1011_v36 }
 0x77d   :  { %v1016_v40 = vmul.f32 1.442695, %v1013_v38 }
 0x77e   :  { %v1032_v41 = vpop.permute.xlu1 %1031 }
 0x77f   :  { %8204 = vpow2.f32 %v1016_v40  ;;  %v1037_v20 = vsel %vm806_vm7, %v1032_v41, 0 }
 0x780   :  { %7415 = vmatpush3.bf16.msra.mxu0 %v1037_v20 }
 0x781   :  { %7426 = vmatprep.subr.bf16.mxu0 %v8531_v24 }
 0x782   :  { %v1142_v49 = vpop.permute.xlu1 %1141 }
 0x783   :  { %v1147_v52 = vsel %vm669_vm6, %v1142_v49, 0 }
 0x786   :  { %v1192_v62 = vpop.permute.xlu1 %1191 }
 0x787   :  { %v1197_v1 = vsel %vm669_vm6, %v1192_v62, 0 }
 0x789   :  { %v8205_v42 = vpop.eup %8204 }
 0x78a   :  { %v1021_v43 = vsel %vm778_vm8, %v8205_v42, 0.0  ;;  %v1190_v2 = vpop.permute.xlu1 %1189 }
 0x78b   :  { %1022 = vadd.xlane.f32.xlu0 %v1021_v43 }
 0x7a1   :  { %1080 = vrot.lane.b32.xlu0 %v8889_v48, %s8533_s27 }
 0x7a5   :  { %1139 = vrot.lane.b32.xlu0 %v8839_v56, %s8534_s28 }
 0x804   :  { %v1020_v44 = vpop.xlane.xlu0 %1019 }
 0x805   :  { %8206 = vrcp.f32 %v1020_v44 }
 0x80f   :  { %v8207_v45 = vpop.eup %8206 }
 0x810   :  { %v1025_v46 = vmul.f32 %v8207_v45, %v8203_v30 }
 0x812   :  { %v1028_v50 = vpack.c.bf16 %v1025_v46, %v1025_v46 }
 0x814   :  { %7417 = vmatmul.mubr.msk.bf16.vlgmr.msra.gmra.mrb[12].mxu0 %vm778_vm8, %v1028_v50 }
 0x815   :  { %7427 = vmatpush3.bf16.xpose.msra.mxu0 %v1147_v52  ;;  %7428 = vmatprep.mubr.msk.bf16.mxu0 %vm8532_vm5, %v8531_v24 }
 0x816   :  { %7438 = vmatprep.subr.bf16.mxu0 %v8531_v24 }
 0x818   :  { %v1023_v53 = vpop.xlane.xlu0 %1022 }
 0x819   :  { %8208 = vrcp.f32 %v1023_v53 }
 0x81c   :  { %v1081_v47 = vpop.permute.xlu0 %1080 }
 0x81d   :  { %v1086_v54 = vsel %vm806_vm7, %v1081_v47, 0 }
 0x81e   :  { %7421 = vmatpush3.bf16.msra.mxu1 %v1086_v54 }
 0x81f   :  { %7432 = vmatprep.subr.bf16.mxu1 %v8531_v24 }
 0x820   :  { %v1140_v57 = vpop.permute.xlu0 %1139 }
 0x821   :  { %7429 = vmatmul.mubr.msk.bf16.vlgmr.msra.gmra.mrb[16].mxu0 %vm669_vm6, %v1140_v57 }
 0x822   :  { %7440 = vmatprep.mubr.msk.bf16.mxu0 %vm8532_vm5, %v8531_v24 }
 0x823   :  { %v8209_v58 = vpop.eup %8208 }
 0x824   :  { %v1027_v59 = vmul.f32 %v8209_v58, %v8205_v42 }
 0x826   :  { %v1029_v63 = vpack.c.bf16 %v1027_v59, %v1027_v59 }
 0x828   :  { %7423 = vmatmul.mubr.msk.bf16.vlgmr.msra.gmra.mrb[24].mxu1 %vm778_vm8, %v1029_v63 }
 0x829   :  { %7433 = vmatpush3.bf16.xpose.msra.mxu1 %v1197_v1  ;;  %7434 = vmatprep.mubr.msk.bf16.mxu1 %vm8532_vm5, %v8531_v24 }
 0x82a   :  { %7444 = vmatprep.subr.bf16.mxu1 %v8531_v24 }
 0x830   :  { %7435 = vmatmul.mubr.msk.bf16.vlgmr.msra.gmra.mrb[28].mxu1 %vm669_vm6, %v1190_v2 }
 0x831   :  { %7446 = vmatprep.mubr.msk.bf16.mxu1 %vm8532_vm5, %v8531_v24 }
 0x8e7   :  { %v8948_v3 = vpop.f32.mrb[12].mxu0 }
 0x8e8   :  { %v7418_v4 = vpop.f32.mrb[13].mxu0 }
 0x8e9   :  { %v1076_v5 = vpop.f32.mrb[14].mxu0 }
 0x8ea   :  { %v7419_v6 = vpop.f32.mrb[15].mxu0 }
 0x8f4   :  { %v1183_v8 = vpop.f32.mrb[16].mxu0 }
 0x8f5   :  { %v1239_v9 = vmul.f32 0.25, %v1183_v8  ;;  %v7430_v10 = vpop.f32.mrb[17].mxu0 }
 0x8f6   :  { %v1186_v11 = vpop.f32.mrb[18].mxu0 }
 0x8f7   :  { %v7431_v12 = vpop.f32.mrb[19].mxu0  ;;  %v1241_v13 = vadd.f32 %v1239_v9, %v8866_v7 }
 0x8f9   :  { %v1243_v14 = vsel %vm778_vm8, %v1241_v13, -inf }
 0x8fa   :  { %1244 = vmax.xlane.f32.xlu0 %v1243_v14 }
 0x8fb   :  { %v8952_v15 = vpop.f32.mrb[24].mxu1 }
 0x8fc   :  { %v7424_v17 = vpop.f32.mrb[25].mxu1 }
 0x8fd   :  { %v1125_v18 = vpop.f32.mrb[26].mxu1 }
 0x8fe   :  { %v7425_v19 = vpop.f32.mrb[27].mxu1 }
 0x903   :  { %v1233_v22 = vpop.f32.mrb[28].mxu1 }
 0x904   :  { %v1240_v23 = vmul.f32 0.25, %v1233_v22  ;;  %v7436_v25 = vpop.f32.mrb[29].mxu1 }
 0x905   :  { %v1236_v26 = vpop.f32.mrb[30].mxu1 }
 0x906   :  { %v7437_v27 = vpop.f32.mrb[31].mxu1  ;;  %v1242_v28 = vadd.f32 %v1240_v23, %v8871_v16 }
 0x908   :  { %v1246_v29 = vsel %vm778_vm8, %v1242_v28, -inf }
 0x909   :  { %1247 = vmax.xlane.f32.xlu1 %v1246_v29 }
 0x91a   :  { %1267 = vrot.lane.b32.xlu1 %v8848_v60, %s8534_s28 }
 0x91e   :  { %1376 = vrot.lane.b32.xlu1 %v8832_v51, %s8535_s2 }
 0x922   :  { %1426 = vrot.lane.b32.xlu1 %v8837_v55, %s8535_s2 }
 0x926   :  { %1424 = vrot.lane.b32.xlu1 %v8850_v61, %s8535_s2 }
 0x987   :  { %v1245_v30 = vpop.xlane.xlu0 %1244 }
 0x988   :  { %v1249_v33 = vsub.f32 %v1241_v13, %v1245_v30 }
 0x98a   :  { %v1251_v36 = vmul.f32 1.442695, %v1249_v33 }
 0x98c   :  { %8210 = vpow2.f32 %v1251_v36 }
 0x996   :  { %v8211_v38 = vpop.eup %8210  ;;  %v1248_v40 = vpop.xlane.xlu1 %1247 }
 0x997   :  { %v1250_v41 = vsub.f32 %v1242_v28, %v1248_v40  ;;  %v1255_v20 = vsel %vm778_vm8, %v8211_v38, 0.0 }
 0x998   :  { %1256 = vadd.xlane.f32.xlu0 %v1255_v20 }
 0x999   :  { %v1253_v42 = vmul.f32 1.442695, %v1250_v41 }
 0x99a   :  { %v1268_v43 = vpop.permute.xlu1 %1267 }
 0x99b   :  { %8212 = vpow2.f32 %v1253_v42  ;;  %v1273_v44 = vsel %vm806_vm7, %v1268_v43, 0 }
 0x99c   :  { %7439 = vmatpush3.bf16.msra.mxu0 %v1273_v44 }
 0x99d   :  { %7450 = vmatprep.subr.bf16.mxu0 %v8531_v24 }
 0x99e   :  { %v1377_v53 = vpop.permute.xlu1 %1376 }
 0x99f   :  { %v1382_v57 = vsel %vm669_vm6, %v1377_v53, 0 }
 0x9a2   :  { %v1427_v2 = vpop.permute.xlu1 %1426 }
 0x9a3   :  { %v1432_v5 = vsel %vm669_vm6, %v1427_v2, 0 }
 0x9a5   :  { %v8213_v45 = vpop.eup %8212 }
 0x9a6   :  { %v1258_v46 = vsel %vm778_vm8, %v8213_v45, 0.0  ;;  %v1425_v6 = vpop.permute.xlu1 %1424 }
 0x9a7   :  { %1259 = vadd.xlane.f32.xlu0 %v1258_v46 }
 0x9bd   :  { %1315 = vrot.lane.b32.xlu0 %v8889_v48, %s8534_s28 }
 0x9c1   :  { %1374 = vrot.lane.b32.xlu0 %v8839_v56, %s8535_s2 }
 0xa25   :  { %v1257_v49 = vpop.xlane.xlu0 %1256 }
 0xa26   :  { %8214 = vrcp.f32 %v1257_v49 }
 0xa30   :  { %v8215_v50 = vpop.eup %8214 }
 0xa31   :  { %v1262_v52 = vmul.f32 %v8215_v50, %v8211_v38 }
 0xa33   :  { %v1265_v47 = vpack.c.bf16 %v1262_v52, %v1262_v52 }
 0xa34   :  { %v1260_v54 = vpop.xlane.xlu0 %1259 }
 0xa35   :  { %8216 = vrcp.f32 %v1260_v54  ;;  %7441 = vmatmul.mubr.msk.bf16.vlgmr.msra.gmra.mrb[20].mxu0 %vm778_vm8, %v1265_v47 }
 0xa36   :  { %7451 = vmatpush3.bf16.xpose.msra.mxu0 %v1382_v57  ;;  %7452 = vmatprep.mubr.msk.bf16.mxu0 %vm8532_vm5, %v8531_v24 }
 0xa37   :  { %7462 = vmatprep.subr.bf16.mxu0 %v8531_v24 }
 0xa38   :  { %v1316_v58 = vpop.permute.xlu0 %1315 }
 0xa39   :  { %v1321_v59 = vsel %vm806_vm7, %v1316_v58, 0 }
 0xa3a   :  { %7445 = vmatpush3.bf16.msra.mxu1 %v1321_v59 }
 0xa3b   :  { %7456 = vmatprep.subr.bf16.mxu1 %v8531_v24 }
 0xa3c   :  { %v1375_v62 = vpop.permute.xlu0 %1374 }
 0xa3d   :  { %7453 = vmatmul.mubr.msk.bf16.vlgmr.msra.gmra.mrb[24].mxu0 %vm669_vm6, %v1375_v62 }
 0xa3e   :  { %7464 = vmatprep.mubr.msk.bf16.mxu0 %vm8532_vm5, %v8531_v24 }
 0xa3f   :  { %v8217_v63 = vpop.eup %8216 }
 0xa40   :  { %v1264_v1 = vmul.f32 %v8217_v63, %v8213_v45 }
 0xa42   :  { %v1266_v4 = vpack.c.bf16 %v1264_v1, %v1264_v1 }
 0xa44   :  { %7447 = vmatmul.mubr.msk.bf16.vlgmr.msra.gmra.mrb[32].mxu1 %vm778_vm8, %v1266_v4 }
 0xa45   :  { %7457 = vmatpush3.bf16.xpose.msra.mxu1 %v1432_v5  ;;  %7458 = vmatprep.mubr.msk.bf16.mxu1 %vm8532_vm5, %v8531_v24 }
 0xa46   :  { %7468 = vmatprep.subr.bf16.mxu1 %v8531_v24 }
 0xa4c   :  { %7459 = vmatmul.mubr.msk.bf16.vlgmr.msra.gmra.mrb[36].mxu1 %vm669_vm6, %v1425_v6 }
 0xa4d   :  { %7470 = vmatprep.mubr.msk.bf16.mxu1 %vm8532_vm5, %v8531_v24 }
 0xb08   :  { %v8990_v8 = vpop.f32.mrb[20].mxu0 }
 0xb09   :  { %v7442_v9 = vpop.f32.mrb[21].mxu0 }
 0xb0a   :  { %v1312_v10 = vpop.f32.mrb[22].mxu0 }
 0xb0b   :  { %v7443_v11 = vpop.f32.mrb[23].mxu0 }
 0xb10   :  { %v1418_v12 = vpop.f32.mrb[24].mxu0 }
 0xb11   :  { %v1474_v13 = vmul.f32 0.25, %v1418_v12  ;;  %v7454_v14 = vpop.f32.mrb[25].mxu0 }
 0xb12   :  { %v1421_v17 = vpop.f32.mrb[26].mxu0 }
 0xb13   :  { %v7455_v18 = vpop.f32.mrb[27].mxu0  ;;  %v1476_v19 = vadd.f32 %v1474_v13, %v8866_v7 }
 0xb15   :  { %v1478_v22 = vsel %vm778_vm8, %v1476_v19, -inf }
 0xb16   :  { %1479 = vmax.xlane.f32.xlu0 %v1478_v22 }
 0xb17   :  { %v8994_v23 = vpop.f32.mrb[32].mxu1 }
 0xb18   :  { %v7448_v25 = vpop.f32.mrb[33].mxu1 }
 0xb19   :  { %v1360_v26 = vpop.f32.mrb[34].mxu1 }
 0xb1a   :  { %v7449_v27 = vpop.f32.mrb[35].mxu1 }
 0xb1f   :  { %v1468_v28 = vpop.f32.mrb[36].mxu1 }
 0xb20   :  { %v1475_v29 = vmul.f32 0.25, %v1468_v28  ;;  %v7460_v30 = vpop.f32.mrb[37].mxu1 }
 0xb21   :  { %v1471_v33 = vpop.f32.mrb[38].mxu1 }
 0xb22   :  { %v7461_v36 = vpop.f32.mrb[39].mxu1  ;;  %v1477_v38 = vadd.f32 %v1475_v29, %v8871_v16 }
 0xb24   :  { %v1481_v40 = vsel %vm778_vm8, %v1477_v38, -inf }
 0xb25   :  { %1482 = vmax.xlane.f32.xlu1 %v1481_v40 }
 0xb36   :  { %1502 = vrot.lane.b32.xlu1 %v8848_v60, %s8535_s2 }
 0xb3a   :  { %1611 = vrot.lane.b32.xlu1 %v8832_v51, %s8528_s15 }
 0xb3e   :  { %1661 = vrot.lane.b32.xlu1 %v8837_v55, %s8528_s15 }
 0xb42   :  { %1659 = vrot.lane.b32.xlu1 %v8850_v61, %s8528_s15 }
 0xba3   :  { %v1480_v41 = vpop.xlane.xlu0 %1479 }
 0xba4   :  { %v1484_v20 = vsub.f32 %v1476_v19, %v1480_v41 }
 0xba6   :  { %v1486_v42 = vmul.f32 1.442695, %v1484_v20 }
 0xba8   :  { %8218 = vpow2.f32 %v1486_v42 }
 0xbb2   :  { %v8219_v43 = vpop.eup %8218  ;;  %v1483_v44 = vpop.xlane.xlu1 %1482 }
 0xbb3   :  { %v1485_v45 = vsub.f32 %v1477_v38, %v1483_v44  ;;  %v1490_v46 = vsel %vm778_vm8, %v8219_v43, 0.0 }
 0xbb4   :  { %1491 = vadd.xlane.f32.xlu0 %v1490_v46 }
 0xbb5   :  { %v1488_v49 = vmul.f32 1.442695, %v1485_v45 }
 0xbb6   :  { %v1503_v50 = vpop.permute.xlu1 %1502 }
 0xbb7   :  { %8220 = vpow2.f32 %v1488_v49  ;;  %v1508_v52 = vsel %vm806_vm7, %v1503_v50, 0 }
 0xbb8   :  { %7463 = vmatpush3.bf16.msra.mxu0 %v1508_v52 }
 0xbb9   :  { %7474 = vmatprep.subr.bf16.mxu0 %v8531_v24 }
 0xbba   :  { %v1612_v59 = vpop.permute.xlu1 %1611 }
 0xbbb   :  { %v1617_v1 = vsel %vm669_vm6, %v1612_v59, 0 }
 0xbbe   :  { %v1662_v10 = vpop.permute.xlu1 %1661 }
 0xbbf   :  { %v1667_v12 = vsel %vm669_vm6, %v1662_v10, 0 }
 0xbc1   :  { %v8221_v53 = vpop.eup %8220 }
 0xbc2   :  { %v1493_v47 = vsel %vm778_vm8, %v8221_v53, 0.0  ;;  %v1660_v13 = vpop.permute.xlu1 %1659 }
 0xbc3   :  { %1494 = vadd.xlane.f32.xlu0 %v1493_v47 }
 0xbd9   :  { %1550 = vrot.lane.b32.xlu0 %v8889_v48, %s8535_s2 }
 0xbdd   :  { %1609 = vrot.lane.b32.xlu0 %v8839_v56, %s8528_s15 }
 0xc41   :  { %v1492_v54 = vpop.xlane.xlu0 %1491 }
 0xc42   :  { %8222 = vrcp.f32 %v1492_v54 }
 0xc4c   :  { %v8223_v57 = vpop.eup %8222 }
 0xc4d   :  { %v1497_v58 = vmul.f32 %v8223_v57, %v8219_v43 }
 0xc4f   :  { %v1500_v62 = vpack.c.bf16 %v1497_v58, %v1497_v58 }
 0xc50   :  { %v1495_v63 = vpop.xlane.xlu0 %1494 }
 0xc51   :  { %8224 = vrcp.f32 %v1495_v63  ;;  %7465 = vmatmul.mubr.msk.bf16.vlgmr.msra.gmra.mrb[28].mxu0 %vm778_vm8, %v1500_v62 }
 0xc52   :  { %7475 = vmatpush3.bf16.xpose.msra.mxu0 %v1617_v1  ;;  %7476 = vmatprep.mubr.msk.bf16.mxu0 %vm8532_vm5, %v8531_v24 }
 0xc53   :  { %7486 = vmatprep.subr.bf16.mxu0 %v8531_v24 }
 0xc54   :  { %v1551_v2 = vpop.permute.xlu0 %1550 }
 0xc55   :  { %v1556_v4 = vsel %vm806_vm7, %v1551_v2, 0 }
 0xc56   :  { %7469 = vmatpush3.bf16.msra.mxu1 %v1556_v4 }
 0xc57   :  { %7480 = vmatprep.subr.bf16.mxu1 %v8531_v24 }
 0xc58   :  { %v1610_v5 = vpop.permute.xlu0 %1609 }
 0xc59   :  { %7477 = vmatmul.mubr.msk.bf16.vlgmr.msra.gmra.mrb[32].mxu0 %vm669_vm6, %v1610_v5 }
 0xc5a   :  { %7488 = vmatprep.mubr.msk.bf16.mxu0 %vm8532_vm5, %v8531_v24 }
 0xc5b   :  { %v8225_v6 = vpop.eup %8224 }
 0xc5c   :  { %v1499_v9 = vmul.f32 %v8225_v6, %v8221_v53 }
 0xc5e   :  { %v1501_v11 = vpack.c.bf16 %v1499_v9, %v1499_v9 }
 0xc60   :  { %7471 = vmatmul.mubr.msk.bf16.vlgmr.msra.gmra.mrb[40].mxu1 %vm778_vm8, %v1501_v11 }
 0xc61   :  { %7481 = vmatpush3.bf16.xpose.msra.mxu1 %v1667_v12  ;;  %7482 = vmatprep.mubr.msk.bf16.mxu1 %vm8532_vm5, %v8531_v24 }
 0xc62   :  { %7492 = vmatprep.subr.bf16.mxu1 %v8531_v24 }
 0xc68   :  { %7483 = vmatmul.mubr.msk.bf16.vlgmr.msra.gmra.mrb[44].mxu1 %vm669_vm6, %v1660_v13 }
 0xc69   :  { %7494 = vmatprep.mubr.msk.bf16.mxu1 %vm8532_vm5, %v8531_v24 }
 0xd24   :  { %v9032_v14 = vpop.f32.mrb[28].mxu0 }
 0xd25   :  { %v7466_v17 = vpop.f32.mrb[29].mxu0 }
 0xd26   :  { %v1547_v18 = vpop.f32.mrb[30].mxu0 }
 0xd27   :  { %v7467_v19 = vpop.f32.mrb[31].mxu0 }
 0xd2c   :  { %v1653_v22 = vpop.f32.mrb[32].mxu0 }
 0xd2d   :  { %v1709_v25 = vmul.f32 0.25, %v1653_v22  ;;  %v7478_v26 = vpop.f32.mrb[33].mxu0 }
 0xd2e   :  { %v1656_v27 = vpop.f32.mrb[34].mxu0 }
 0xd2f   :  { %v7479_v28 = vpop.f32.mrb[35].mxu0  ;;  %v1711_v29 = vadd.f32 %v1709_v25, %v8866_v7 }
 0xd31   :  { %v1713_v30 = vsel %vm778_vm8, %v1711_v29, -inf }
 0xd32   :  { %1714 = vmax.xlane.f32.xlu0 %v1713_v30 }
 0xd33   :  { %v9036_v33 = vpop.f32.mrb[40].mxu1 }
 0xd34   :  { %v7472_v36 = vpop.f32.mrb[41].mxu1 }
 0xd35   :  { %v1595_v38 = vpop.f32.mrb[42].mxu1 }
 0xd36   :  { %v7473_v40 = vpop.f32.mrb[43].mxu1 }
 0xd3b   :  { %v1703_v41 = vpop.f32.mrb[44].mxu1 }
 0xd3c   :  { %v1710_v20 = vmul.f32 0.25, %v1703_v41  ;;  %v7484_v42 = vpop.f32.mrb[45].mxu1 }
 0xd3d   :  { %v1706_v43 = vpop.f32.mrb[46].mxu1 }
 0xd3e   :  { %v7485_v44 = vpop.f32.mrb[47].mxu1  ;;  %v1712_v45 = vadd.f32 %v1710_v20, %v8871_v16 }
 0xd40   :  { %v1716_v46 = vsel %vm778_vm8, %v1712_v45, -inf }
 0xd41   :  { %1717 = vmax.xlane.f32.xlu1 %v1716_v46 }
 0xd52   :  { %1737 = vrot.lane.b32.xlu1 %v8848_v60, %s8528_s15 }
 0xd56   :  { %1846 = vrot.lane.b32.xlu1 %v8832_v51, %s8536_s24 }
 0xd5a   :  { %1896 = vrot.lane.b32.xlu1 %v8837_v55, %s8536_s24 }
 0xd5e   :  { %1894 = vrot.lane.b32.xlu1 %v8850_v61, %s8536_s24 }
 0xdbf   :  { %v1715_v49 = vpop.xlane.xlu0 %1714 }
 0xdc0   :  { %v1719_v50 = vsub.f32 %v1711_v29, %v1715_v49 }
 0xdc2   :  { %v1721_v52 = vmul.f32 1.442695, %v1719_v50 }
 0xdc4   :  { %8226 = vpow2.f32 %v1721_v52 }
 0xdce   :  { %v8227_v53 = vpop.eup %8226  ;;  %v1718_v47 = vpop.xlane.xlu1 %1717 }
 0xdcf   :  { %v1720_v54 = vsub.f32 %v1712_v45, %v1718_v47  ;;  %v1725_v57 = vsel %vm778_vm8, %v8227_v53, 0.0 }
 0xdd0   :  { %1726 = vadd.xlane.f32.xlu0 %v1725_v57 }
 0xdd1   :  { %v1723_v58 = vmul.f32 1.442695, %v1720_v54 }
 0xdd2   :  { %v1738_v59 = vpop.permute.xlu1 %1737 }
 0xdd3   :  { %8228 = vpow2.f32 %v1723_v58  ;;  %v1743_v62 = vsel %vm806_vm7, %v1738_v59, 0 }
 0xdd4   :  { %7487 = vmatpush3.bf16.msra.mxu0 %v1743_v62 }
 0xdd5   :  { %7498 = vmatprep.subr.bf16.mxu0 %v8531_v24 }
 0xdd6   :  { %v1847_v6 = vpop.permute.xlu1 %1846 }
 0xdd7   :  { %v1852_v11 = vsel %vm669_vm6, %v1847_v6, 0 }
 0xdda   :  { %v1897_v22 = vpop.permute.xlu1 %1896 }
 0xddb   :  { %v1902_v26 = vsel %vm669_vm6, %v1897_v22, 0 }
 0xddd   :  { %v8229_v63 = vpop.eup %8228 }
 0xdde   :  { %v1728_v1 = vsel %vm778_vm8, %v8229_v63, 0.0  ;;  %v1895_v27 = vpop.permute.xlu1 %1894 }
 0xddf   :  { %1729 = vadd.xlane.f32.xlu0 %v1728_v1 }
 0xdf5   :  { %1785 = vrot.lane.b32.xlu0 %v8889_v48, %s8528_s15 }
 0xdf9   :  { %1844 = vrot.lane.b32.xlu0 %v8839_v56, %s8536_s24 }
 0xe5d   :  { %v1727_v2 = vpop.xlane.xlu0 %1726 }
 0xe5e   :  { %8230 = vrcp.f32 %v1727_v2 }
 0xe68   :  { %v8231_v4 = vpop.eup %8230 }
 0xe69   :  { %v1732_v5 = vmul.f32 %v8231_v4, %v8227_v53 }
 0xe6b   :  { %v1735_v9 = vpack.c.bf16 %v1732_v5, %v1732_v5 }
 0xe6c   :  { %v1730_v10 = vpop.xlane.xlu0 %1729 }
 0xe6d   :  { %8232 = vrcp.f32 %v1730_v10  ;;  %7489 = vmatmul.mubr.msk.bf16.vlgmr.msra.gmra.mrb[36].mxu0 %vm778_vm8, %v1735_v9 }
 0xe6e   :  { %7499 = vmatpush3.bf16.xpose.msra.mxu0 %v1852_v11  ;;  %7500 = vmatprep.mubr.msk.bf16.mxu0 %vm8532_vm5, %v8531_v24 }
 0xe6f   :  { %7510 = vmatprep.subr.bf16.mxu0 %v8531_v24 }
 0xe70   :  { %v1786_v12 = vpop.permute.xlu0 %1785 }
 0xe71   :  { %v1791_v13 = vsel %vm806_vm7, %v1786_v12, 0 }
 0xe72   :  { %7493 = vmatpush3.bf16.msra.mxu1 %v1791_v13 }
 0xe73   :  { %7504 = vmatprep.subr.bf16.mxu1 %v8531_v24 }
 0xe74   :  { %v1845_v17 = vpop.permute.xlu0 %1844 }
 0xe75   :  { %7501 = vmatmul.mubr.msk.bf16.vlgmr.msra.gmra.mrb[40].mxu0 %vm669_vm6, %v1845_v17 }
 0xe76   :  { %7512 = vmatprep.mubr.msk.bf16.mxu0 %vm8532_vm5, %v8531_v24 }
 0xe77   :  { %v8233_v18 = vpop.eup %8232 }
 0xe78   :  { %v1734_v19 = vmul.f32 %v8233_v18, %v8229_v63 }
 0xe7a   :  { %v1736_v25 = vpack.c.bf16 %v1734_v19, %v1734_v19 }
 0xe7c   :  { %7495 = vmatmul.mubr.msk.bf16.vlgmr.msra.gmra.mrb[48].mxu1 %vm778_vm8, %v1736_v25 }
 0xe7d   :  { %7505 = vmatpush3.bf16.xpose.msra.mxu1 %v1902_v26  ;;  %7506 = vmatprep.mubr.msk.bf16.mxu1 %vm8532_vm5, %v8531_v24 }
 0xe7e   :  { %7516 = vmatprep.subr.bf16.mxu1 %v8531_v24 }
 0xe84   :  { %7507 = vmatmul.mubr.msk.bf16.vlgmr.msra.gmra.mrb[52].mxu1 %vm669_vm6, %v1895_v27 }
 0xe85   :  { %7518 = vmatprep.mubr.msk.bf16.mxu1 %vm8532_vm5, %v8531_v24 }
 0xf40   :  { %v9074_v28 = vpop.f32.mrb[36].mxu0 }
 0xf41   :  { %v7490_v29 = vpop.f32.mrb[37].mxu0 }
 0xf42   :  { %v1782_v30 = vpop.f32.mrb[38].mxu0 }
 0xf43   :  { %v7491_v36 = vpop.f32.mrb[39].mxu0 }
 0xf48   :  { %v1888_v38 = vpop.f32.mrb[40].mxu0 }
 0xf49   :  { %v1944_v40 = vmul.f32 0.25, %v1888_v38  ;;  %v7502_v41 = vpop.f32.mrb[41].mxu0 }
 0xf4a   :  { %v1891_v20 = vpop.f32.mrb[42].mxu0 }
 0xf4b   :  { %v7503_v42 = vpop.f32.mrb[43].mxu0  ;;  %v1946_v43 = vadd.f32 %v1944_v40, %v8866_v7 }
 0xf4d   :  { %v1948_v44 = vsel %vm778_vm8, %v1946_v43, -inf }
 0xf4e   :  { %1949 = vmax.xlane.f32.xlu0 %v1948_v44 }
 0xf4f   :  { %v9078_v45 = vpop.f32.mrb[48].mxu1 }
 0xf50   :  { %v7496_v46 = vpop.f32.mrb[49].mxu1 }
 0xf51   :  { %v1830_v49 = vpop.f32.mrb[50].mxu1 }
 0xf52   :  { %v7497_v50 = vpop.f32.mrb[51].mxu1 }
 0xf57   :  { %v1938_v52 = vpop.f32.mrb[52].mxu1 }
 0xf58   :  { %v1945_v53 = vmul.f32 0.25, %v1938_v52  ;;  %v7508_v47 = vpop.f32.mrb[53].mxu1 }
 0xf59   :  { %v1941_v54 = vpop.f32.mrb[54].mxu1 }
 0xf5a   :  { %v7509_v57 = vpop.f32.mrb[55].mxu1  ;;  %v1947_v58 = vadd.f32 %v1945_v53, %v8871_v16 }
 0xf5c   :  { %v1951_v59 = vsel %vm778_vm8, %v1947_v58, -inf }
 0xf5d   :  { %1952 = vmax.xlane.f32.xlu1 %v1951_v59 }
 0xf6e   :  { %1972 = vrot.lane.b32.xlu1 %v8848_v60, %s8536_s24 }
 0xf72   :  { %2081 = vrot.lane.b32.xlu1 %v8832_v51, %s8537_s29 }
 0xf76   :  { %2131 = vrot.lane.b32.xlu1 %v8837_v55, %s8537_s29 }
 0xf7a   :  { %2129 = vrot.lane.b32.xlu1 %v8850_v61, %s8537_s29 }
 0xfdb   :  { %v1950_v62 = vpop.xlane.xlu0 %1949 }
 0xfdc   :  { %v1954_v63 = vsub.f32 %v1946_v43, %v1950_v62 }
 0xfde   :  { %v1956_v1 = vmul.f32 1.442695, %v1954_v63 }
 0xfe0   :  { %8234 = vpow2.f32 %v1956_v1 }
 0xfea   :  { %v8235_v2 = vpop.eup %8234  ;;  %v1953_v4 = vpop.xlane.xlu1 %1952 }
 0xfeb   :  { %v1955_v5 = vsub.f32 %v1947_v58, %v1953_v4  ;;  %v1960_v6 = vsel %vm778_vm8, %v8235_v2, 0.0 }
 0xfec   :  { %1961 = vadd.xlane.f32.xlu0 %v1960_v6 }
 0xfed   :  { %v1958_v9 = vmul.f32 1.442695, %v1955_v5 }
 0xfee   :  { %v1973_v10 = vpop.permute.xlu1 %1972 }
 0xfef   :  { %8236 = vpow2.f32 %v1958_v9  ;;  %v1978_v11 = vsel %vm806_vm7, %v1973_v10, 0 }
 0xff0   :  { %7511 = vmatpush3.bf16.msra.mxu0 %v1978_v11 }
 0xff1   :  { %7522 = vmatprep.subr.bf16.mxu0 %v8531_v24 }
 0xff2   :  { %v2082_v22 = vpop.permute.xlu1 %2081 }
 0xff3   :  { %v2087_v27 = vsel %vm669_vm6, %v2082_v22, 0 }
 0xff6   :  { %v2132_v41 = vpop.permute.xlu1 %2131 }
 0xff7   :  { %v2137_v42 = vsel %vm669_vm6, %v2132_v41, 0 }
 0xff9   :  { %v8237_v12 = vpop.eup %8236 }
 0xffa   :  { %v1963_v13 = vsel %vm778_vm8, %v8237_v12, 0.0  ;;  %v2130_v43 = vpop.permute.xlu1 %2129 }
 0xffb   :  { %1964 = vadd.xlane.f32.xlu0 %v1963_v13 }
0x1011   :  { %2020 = vrot.lane.b32.xlu0 %v8889_v48, %s8536_s24 }
0x1015   :  { %2079 = vrot.lane.b32.xlu0 %v8839_v56, %s8537_s29 }
0x1079   :  { %v1962_v17 = vpop.xlane.xlu0 %1961 }
0x107a   :  { %8238 = vrcp.f32 %v1962_v17 }
0x1084   :  { %v8239_v18 = vpop.eup %8238 }
0x1085   :  { %v1967_v19 = vmul.f32 %v8239_v18, %v8235_v2 }
0x1087   :  { %v1970_v25 = vpack.c.bf16 %v1967_v19, %v1967_v19 }
0x1088   :  { %v1965_v26 = vpop.xlane.xlu0 %1964 }
0x1089   :  { %8240 = vrcp.f32 %v1965_v26  ;;  %7513 = vmatmul.mubr.msk.bf16.vlgmr.msra.gmra.mrb[44].mxu0 %vm778_vm8, %v1970_v25 }
0x108a   :  { %7523 = vmatpush3.bf16.xpose.msra.mxu0 %v2087_v27  ;;  %7524 = vmatprep.mubr.msk.bf16.mxu0 %vm8532_vm5, %v8531_v24 }
0x108b   :  { %7534 = vmatprep.subr.bf16.mxu0 %v8531_v24 }
0x108c   :  { %v2021_v29 = vpop.permute.xlu0 %2020 }
0x108d   :  { %v2026_v30 = vsel %vm806_vm7, %v2021_v29, 0 }
0x108e   :  { %7517 = vmatpush3.bf16.msra.mxu1 %v2026_v30 }
0x108f   :  { %7528 = vmatprep.subr.bf16.mxu1 %v8531_v24 }
0x1090   :  { %v2080_v36 = vpop.permute.xlu0 %2079 }
0x1091   :  { %7525 = vmatmul.mubr.msk.bf16.vlgmr.msra.gmra.mrb[48].mxu0 %vm669_vm6, %v2080_v36 }
0x1092   :  { %7536 = vmatprep.mubr.msk.bf16.mxu0 %vm8532_vm5, %v8531_v24 }
0x1093   :  { %v8241_v38 = vpop.eup %8240 }
0x1094   :  { %v1969_v40 = vmul.f32 %v8241_v38, %v8237_v12 }
0x1096   :  { %v1971_v20 = vpack.c.bf16 %v1969_v40, %v1969_v40 }
0x1098   :  { %7519 = vmatmul.mubr.msk.bf16.vlgmr.msra.gmra.mrb[56].mxu1 %vm778_vm8, %v1971_v20 }
0x1099   :  { %7529 = vmatpush3.bf16.xpose.msra.mxu1 %v2137_v42  ;;  %7530 = vmatprep.mubr.msk.bf16.mxu1 %vm8532_vm5, %v8531_v24 }
0x109a   :  { %7540 = vmatprep.subr.bf16.mxu1 %v8531_v24 }
0x10a0   :  { %7531 = vmatmul.mubr.msk.bf16.vlgmr.msra.gmra.mrb[60].mxu1 %vm669_vm6, %v2130_v43 }
0x10a1   :  { %7542 = vmatprep.mubr.msk.bf16.mxu1 %vm8532_vm5, %v8531_v24 }
0x115c   :  { %v9116_v44 = vpop.f32.mrb[44].mxu0 }
0x115d   :  { %v7514_v46 = vpop.f32.mrb[45].mxu0 }
0x115e   :  { %v2017_v49 = vpop.f32.mrb[46].mxu0 }
0x115f   :  { %v7515_v50 = vpop.f32.mrb[47].mxu0 }
0x1164   :  { %v2123_v52 = vpop.f32.mrb[48].mxu0 }
0x1165   :  { %v2179_v53 = vmul.f32 0.25, %v2123_v52  ;;  %v7526_v47 = vpop.f32.mrb[49].mxu0 }
0x1166   :  { %v2126_v54 = vpop.f32.mrb[50].mxu0 }
0x1167   :  { %v7527_v57 = vpop.f32.mrb[51].mxu0  ;;  %v2181_v58 = vadd.f32 %v2179_v53, %v8866_v7 }
0x1169   :  { %v2183_v59 = vsel %vm778_vm8, %v2181_v58, -inf }
0x116a   :  { %2184 = vmax.xlane.f32.xlu0 %v2183_v59 }
0x116b   :  { %v9120_v62 = vpop.f32.mrb[56].mxu1 }
0x116c   :  { %v7520_v63 = vpop.f32.mrb[57].mxu1 }
0x116d   :  { %v2065_v1 = vpop.f32.mrb[58].mxu1 }
0x116e   :  { %v7521_v2 = vpop.f32.mrb[59].mxu1 }
0x1173   :  { %v2173_v4 = vpop.f32.mrb[60].mxu1 }
0x1174   :  { %v2180_v5 = vmul.f32 0.25, %v2173_v4  ;;  %v7532_v6 = vpop.f32.mrb[61].mxu1 }
0x1175   :  { %v2176_v9 = vpop.f32.mrb[62].mxu1 }
0x1176   :  { %v7533_v10 = vpop.f32.mrb[63].mxu1  ;;  %v2182_v11 = vadd.f32 %v2180_v5, %v8871_v16 }
0x1178   :  { %v2186_v12 = vsel %vm778_vm8, %v2182_v11, -inf }
0x1179   :  { %2187 = vmax.xlane.f32.xlu1 %v2186_v12 }
0x118a   :  { %2207 = vrot.lane.b32.xlu1 %v8848_v60, %s8537_s29 }
0x118e   :  { %2316 = vrot.lane.b32.xlu1 %v8832_v51, %s8526_s6 }
0x1192   :  { %2366 = vrot.lane.b32.xlu1 %v8837_v55, %s8526_s6 }
0x1196   :  { %2364 = vrot.lane.b32.xlu1 %v8850_v61, %s8526_s6 }
0x11f7   :  { %v2185_v13 = vpop.xlane.xlu0 %2184 }
0x11f8   :  { %v2189_v17 = vsub.f32 %v2181_v58, %v2185_v13 }
0x11fa   :  { %v2191_v18 = vmul.f32 1.442695, %v2189_v17 }
0x11fc   :  { %8242 = vpow2.f32 %v2191_v18 }
0x1206   :  { %v8243_v19 = vpop.eup %8242  ;;  %v2188_v22 = vpop.xlane.xlu1 %2187 }
0x1207   :  { %v2190_v25 = vsub.f32 %v2182_v11, %v2188_v22  ;;  %v2195_v26 = vsel %vm778_vm8, %v8243_v19, 0.0 }
0x1208   :  { %2196 = vadd.xlane.f32.xlu0 %v2195_v26 }
0x1209   :  { %v2193_v27 = vmul.f32 1.442695, %v2190_v25 }
0x120a   :  { %v2208_v29 = vpop.permute.xlu1 %2207 }
0x120b   :  { %8244 = vpow2.f32 %v2193_v27  ;;  %v2213_v51 = vsel %vm806_vm7, %v2208_v29, 0 }
0x120c   :  { %7535 = vmatpush3.bf16.msra.mxu0 %v2213_v51 }
0x120d   :  { %7546 = vmatprep.subr.bf16.mxu0 %v8531_v24 }
0x120e   :  { %v2317_v40 = vpop.permute.xlu1 %2316 }
0x120f   :  { %v2322_v42 = vsel %vm669_vm6, %v2317_v40, 0 }
0x1212   :  { %v2367_v52 = vpop.permute.xlu1 %2366 }
0x1213   :  { %v2372_v47 = vsel %vm669_vm6, %v2367_v52, 0 }
0x1215   :  { %v8245_v55 = vpop.eup %8244 }
0x1216   :  { %v2198_v61 = vsel %vm778_vm8, %v8245_v55, 0.0  ;;  %v2365_v54 = vpop.permute.xlu1 %2364 }
0x1217   :  { %2199 = vadd.xlane.f32.xlu0 %v2198_v61 }
0x122d   :  { %2255 = vrot.lane.b32.xlu0 %v8889_v48, %s8537_s29 }
0x1231   :  { %2314 = vrot.lane.b32.xlu0 %v8839_v56, %s8526_s6 }
0x1295   :  { %v2197_v30 = vpop.xlane.xlu0 %2196 }
0x1296   :  { %8246 = vrcp.f32 %v2197_v30 }
0x12a0   :  { %v8247_v36 = vpop.eup %8246 }
0x12a1   :  { %v2202_v38 = vmul.f32 %v8247_v36, %v8243_v19 }
0x12a3   :  { %v2205_v41 = vpack.c.bf16 %v2202_v38, %v2202_v38 }
0x12a4   :  { %v2200_v20 = vpop.xlane.xlu0 %2199 }
0x12a5   :  { %8248 = vrcp.f32 %v2200_v20  ;;  %7537 = vmatmul.mubr.msk.bf16.vlgmr.msra.gmra.mrb[52].mxu0 %vm778_vm8, %v2205_v41 }
0x12a6   :  { %7547 = vmatpush3.bf16.xpose.msra.mxu0 %v2322_v42  ;;  %7548 = vmatprep.mubr.msk.bf16.mxu0 %vm8532_vm5, %v8531_v24 }
0x12a7   :  { %7558 = vmatprep.subr.bf16.mxu0 %v8531_v24 }
0x12a8   :  { %v2256_v43 = vpop.permute.xlu0 %2255 }
0x12a9   :  { %v2261_v56 = vsel %vm806_vm7, %v2256_v43, 0 }
0x12aa   :  { %7541 = vmatpush3.bf16.msra.mxu1 %v2261_v56 }
0x12ab   :  { %7552 = vmatprep.subr.bf16.mxu1 %v8531_v24 }
0x12ac   :  { %v2315_v46 = vpop.permute.xlu0 %2314 }
0x12ad   :  { %7549 = vmatmul.mubr.msk.bf16.vlgmr.msra.gmra.mrb[56].mxu0 %vm669_vm6, %v2315_v46 }
0x12ae   :  { %7560 = vmatprep.mubr.msk.bf16.mxu0 %vm8532_vm5, %v8531_v24 }
0x12af   :  { %v8249_v49 = vpop.eup %8248 }
0x12b0   :  { %v2204_v50 = vmul.f32 %v8249_v49, %v8245_v55 }
0x12b2   :  { %v2206_v53 = vpack.c.bf16 %v2204_v50, %v2204_v50 }
0x12b4   :  { %7543 = vmatmul.mubr.msk.bf16.vlgmr.msra.gmra.mrb[64].mxu1 %vm778_vm8, %v2206_v53 }
0x12b5   :  { %7553 = vmatpush3.bf16.xpose.msra.mxu1 %v2372_v47  ;;  %7554 = vmatprep.mubr.msk.bf16.mxu1 %vm8532_vm5, %v8531_v24 }
0x12b6   :  { %7564 = vmatprep.subr.bf16.mxu1 %v8531_v24 }
0x12bc   :  { %7555 = vmatmul.mubr.msk.bf16.vlgmr.msra.gmra.mrb[68].mxu1 %vm669_vm6, %v2365_v54 }
0x12bd   :  { %7566 = vmatprep.mubr.msk.bf16.mxu1 %vm8532_vm5, %v8531_v24 }
0x1378   :  { %v9158_v57 = vpop.f32.mrb[52].mxu0 }
0x1379   :  { %v7538_v58 = vpop.f32.mrb[53].mxu0 }
0x137a   :  { %v2252_v59 = vpop.f32.mrb[54].mxu0 }
0x137b   :  { %v7539_v63 = vpop.f32.mrb[55].mxu0 }
0x137c   :  { %v7982_v63 = vld [vmem:[%s9887_s11] sm:$0xff]  }
0x1380   :  { %v2358_v1 = vpop.f32.mrb[56].mxu0 }
0x1381   :  { %v2414_v2 = vmul.f32 0.25, %v2358_v1  ;;  %v7550_v4 = vpop.f32.mrb[57].mxu0  ;;  %v7983_v1 = vld [vmem:[%s9887_s11 + $0x8] sm:$0xff]  }
0x1382   :  { %v2361_v5 = vpop.f32.mrb[58].mxu0  ;;  %v7985_v4 = vld [vmem:[%s9887_s11 + $0x18] sm:$0xff]  }
0x1383   :  { %v7551_v6 = vpop.f32.mrb[59].mxu0  ;;  %v2416_v9 = vadd.f32 %v2414_v2, %v8866_v7  ;;  %v7984_v2 = vld [vmem:[%s9887_s11 + $0x10] sm:$0xff]   ;;  %v7986_v5 = vld [vmem:[%s9887_s11 + $0x20] sm:$0xff]  }
0x1384   :  { %v7987_v6 = vld [vmem:[%s9887_s11 + $0x28] sm:$0xff]  }
0x1385   :  { %v2418_v10 = vsel %vm778_vm8, %v2416_v9, -inf }
0x1386   :  { %2419 = vmax.xlane.f32.xlu0 %v2418_v10 }
0x1387   :  { %v2297_v11 = vpop.f32.mrb[64].mxu1 }
0x1388   :  { %v7544_v12 = vpop.f32.mrb[65].mxu1 }
0x1389   :  { %v2300_v13 = vpop.f32.mrb[66].mxu1 }
0x138a   :  { %v7545_v17 = vpop.f32.mrb[67].mxu1  ;;  %v7988_v13 = vld [vmem:[%s9887_s11 + $0x30] sm:$0xff]  }
0x138b   :  { %v7989_v17 = vld [vmem:[%s9887_s11 + $0x38] sm:$0xff]  }
0x138f   :  { %v2408_v18 = vpop.f32.mrb[68].mxu1 }
0x1390   :  { %v2415_v19 = vmul.f32 0.25, %v2408_v18  ;;  %v7556_v22 = vpop.f32.mrb[69].mxu1 }
0x1391   :  { %v2411_v25 = vpop.f32.mrb[70].mxu1 }
0x1392   :  { %v7557_v26 = vpop.f32.mrb[71].mxu1  ;;  %v2417_v27 = vadd.f32 %v2415_v19, %v8871_v16 }
0x1394   :  { %v2421_v29 = vsel %vm778_vm8, %v2417_v27, -inf }
0x1395   :  { %2422 = vmax.xlane.f32.xlu1 %v2421_v29 }
0x13a6   :  { %2442 = vrot.lane.b32.xlu1 %v8848_v60, %s8526_s6 }
0x13aa   :  { %1130 = vrot.lane.b32.xlu1 %v8948_v3, %s8526_s6 }
0x13ae   :  { %1132 = vrot.lane.b32.xlu1 %v8952_v15, %s8526_s6 }
0x13b2   :  { %1367 = vrot.lane.b32.xlu1 %v8994_v23, %s8537_s29 }
0x13b6   :  { %1602 = vrot.lane.b32.xlu1 %v9036_v33, %s8536_s24 }
0x13ba   :  { %1837 = vrot.lane.b32.xlu1 %v9078_v45, %s8528_s15 }
0x13be   :  { %2072 = vrot.lane.b32.xlu1 %v9120_v62, %s8535_s2 }
0x13c2   :  { %2307 = vrot.lane.b32.xlu1 %v2297_v11, %s8534_s28 }
0x1413   :  { %v2420_v60 = vpop.xlane.xlu0 %2419 }
0x1414   :  { %v2424_v51 = vsub.f32 %v2416_v9, %v2420_v60 }
0x1416   :  { %v2426_v3 = vmul.f32 1.442695, %v2424_v51 }
0x1418   :  { %8250 = vpow2.f32 %v2426_v3  ;;  %v6789_v3 = vld [vmem:[%s9888_s12] ss:$0 sm:$0xff] }
0x1422   :  { %v8251_v55 = vpop.eup %8250  ;;  %v2423_v15 = vpop.xlane.xlu1 %2422 }
0x1423   :  { %v2425_v61 = vsub.f32 %v2417_v27, %v2423_v15  ;;  %v2430_v23 = vsel %vm778_vm8, %v8251_v55, 0.0 }
0x1424   :  { %2431 = vadd.xlane.f32.xlu0 %v2430_v23 }
0x1425   :  { %v2428_v30 = vmul.f32 1.442695, %v2425_v61 }
0x1426   :  { %v2443_v33 = vpop.permute.xlu1 %2442 }
0x1427   :  { %8252 = vpow2.f32 %v2428_v30  ;;  %v2448_v45 = vsel %vm806_vm7, %v2443_v33, 0 }
0x1428   :  { %7559 = vmatpush3.bf16.msra.mxu0 %v2448_v45 }
0x1429   :  { %7570 = vmatprep.subr.bf16.mxu0 %v8531_v24 }
0x142a   :  { %v1131_v62 = vpop.permute.xlu1 %1130 }
0x142b   :  { %1137 = vst.msk [vmem:[#allocation2] sm:$0xff] %vm1136_vm9, %v1131_v62 }
0x142e   :  { %v1133_v36 = vpop.permute.xlu1 %1132 }
0x142f   :  { %1138 = vst.msk [vmem:[#allocation2 + $0x8] sm:$0xff] %vm1136_vm9, %v1133_v36  ;;  %v7990_v36 = vld [vmem:[#allocation8] ss:$16 sps:$4 sm:$0xff]  }
0x1431   :  { %v8253_v38 = vpop.eup %8252 }
0x1432   :  { %v1368_v40 = vpop.permute.xlu1 %1367  ;;  %v2433_v41 = vsel %vm778_vm8, %v8253_v38, 0.0 }
0x1433   :  { %1373 = vst.msk [vmem:[#allocation2 + $0x8] sm:$0xff] %vm1371_vm10, %v1368_v40  ;;  %2434 = vadd.xlane.f32.xlu0 %v2433_v41  ;;  %v7993_v40 = vld [vmem:[#allocation8 + $0x8] ss:$16 sps:$4 sm:$0xff]   ;;  %v7995_v41 = vld [vmem:[#allocation8 + $0xc] ss:$16 sps:$4 sm:$0xff]  }
0x1436   :  { %v1603_v20 = vpop.permute.xlu1 %1602 }
0x1437   :  { %1608 = vst.msk [vmem:[#allocation2 + $0x8] sm:$0xff] %vm1606_vm11, %v1603_v20  ;;  %v7998_v20 = vld [vmem:[#allocation8 + $0x24] ss:$16 sps:$4 sm:$0xff]  }
0x143a   :  { %v1838_v42 = vpop.permute.xlu1 %1837 }
0x143b   :  { %1843 = vst.msk [vmem:[#allocation2 + $0x8] sm:$0xff] %vm1841_vm12, %v1838_v42  ;;  %v8001_v42 = vld [vmem:[#allocation8 + $0x2c] ss:$16 sps:$4 sm:$0xff]  }
0x143e   :  { %v2073_v43 = vpop.permute.xlu1 %2072 }
0x143f   :  { %2078 = vst.msk [vmem:[#allocation2 + $0x8] sm:$0xff] %vm2076_vm13, %v2073_v43  ;;  %v7996_v43 = vld [vmem:[#allocation8 + $0x20] ss:$16 sps:$4 sm:$0xff]  }
0x1442   :  { %v2308_v56 = vpop.permute.xlu1 %2307 }
0x1443   :  { %2313 = vst.msk [vmem:[#allocation2 + $0x8] sm:$0xff] %vm2311_vm14, %v2308_v56  ;;  %v7999_v56 = vld [vmem:[#allocation8 + $0x28] ss:$16 sps:$4 sm:$0xff]  }
0x1449   :  { %2490 = vrot.lane.b32.xlu0 %v8889_v48, %s8526_s6 }
0x144d   :  { %1365 = vrot.lane.b32.xlu0 %v8990_v8, %s8537_s29 }
0x1451   :  { %1600 = vrot.lane.b32.xlu0 %v9032_v14, %s8536_s24 }
0x1455   :  { %1835 = vrot.lane.b32.xlu0 %v9074_v28, %s8528_s15 }
0x1459   :  { %2070 = vrot.lane.b32.xlu0 %v9116_v44, %s8535_s2 }
0x145d   :  { %2305 = vrot.lane.b32.xlu0 %v9158_v57, %s8534_s28 }
0x14b1   :  { %v2432_v46 = vpop.xlane.xlu0 %2431 }
0x14b2   :  { %8254 = vrcp.f32 %v2432_v46 }
0x14bc   :  { %v8255_v49 = vpop.eup %8254 }
0x14bd   :  { %v2437_v50 = vmul.f32 %v8255_v49, %v8251_v55 }
0x14bf   :  { %v2440_v48 = vpack.c.bf16 %v2437_v50, %v2437_v50 }
0x14c0   :  { %v2435_v52 = vpop.xlane.xlu0 %2434 }
0x14c1   :  { %8256 = vrcp.f32 %v2435_v52  ;;  %7561 = vmatmul.mubr.msk.bf16.vlgmr.msra.gmra.mrb[60].mxu0 %vm778_vm8, %v2440_v48 }
0x14c2   :  { %7586 = vmatprep.mubr.msk.bf16.mxu0 %vm8532_vm5, %v8531_v24  ;;  %7571 = vmatpush3.bf16.msra.mxu0 %v7982_v63  ;;  %v8014_v63 = vld [vmem:[#allocation8 + $0x80] ss:$16 sps:$4 sm:$0xff]  }
0x14c3   :  { %7572 = vmatprep.subr.bf16.mxu0 %v8531_v24 }
0x14c4   :  { %v2491_v8 = vpop.permute.xlu0 %2490 }
0x14c5   :  { %v2496_v14 = vsel %vm806_vm7, %v2491_v8, 0 }
0x14c6   :  { %7565 = vmatpush3.bf16.msra.mxu1 %v2496_v14  ;;  %7573 = vmatpush3.bf16.msra.mxu0 %v7983_v1  ;;  %v8004_v14 = vld [vmem:[#allocation8 + $0x44] ss:$16 sps:$4 sm:$0xff]   ;;  %v8017_v1 = vld [vmem:[#allocation8 + $0x88] ss:$16 sps:$4 sm:$0xff]  }
0x14c7   :  { %7574 = vmatprep.subr.bf16.mxu0 %v8531_v24 }
0x14c8   :  { %v1366_v28 = vpop.permute.xlu0 %1365 }
0x14c9   :  { %1372 = vst.msk [vmem:[#allocation2] sm:$0xff] %vm1371_vm10, %v1366_v28  ;;  %v8007_v28 = vld [vmem:[#allocation8 + $0x4c] ss:$16 sps:$4 sm:$0xff]  }
0x14ca   :  { %7575 = vmatpush3.bf16.msra.mxu0 %v7984_v2  ;;  %v8019_v2 = vld [vmem:[#allocation8 + $0x8c] ss:$16 sps:$4 sm:$0xff]  }
0x14cb   :  { %v8257_v44 = vpop.eup %8256  ;;  %7576 = vmatprep.subr.bf16.mxu0 %v8531_v24 }
0x14cc   :  { %v1601_v53 = vpop.permute.xlu0 %1600  ;;  %v2439_v47 = vmul.f32 %v8257_v44, %v8253_v38  ;;  %v7992_v38 = vld [vmem:[#allocation8 + $0x4] ss:$16 sps:$4 sm:$0xff]   ;;  %v8002_v44 = vld [vmem:[#allocation8 + $0x40] ss:$16 sps:$4 sm:$0xff]  }
0x14cd   :  { %1607 = vst.msk [vmem:[#allocation2] sm:$0xff] %vm1606_vm11, %v1601_v53  ;;  %2921 = vmatprep.subr.bf16.mxu1 %v7992_v38  ;;  %v8005_v53 = vld [vmem:[#allocation8 + $0x48] ss:$16 sps:$4 sm:$0xff]  }
0x14ce   :  { %v2441_v54 = vpack.c.bf16 %v2439_v47, %v2439_v47  ;;  %7577 = vmatpush3.bf16.msra.mxu0 %v7985_v4  ;;  %v8010_v47 = vld [vmem:[#allocation8 + $0x64] ss:$16 sps:$4 sm:$0xff]  }
0x14cf   :  { %7578 = vmatprep.subr.bf16.mxu0 %v8531_v24  ;;  %v8022_v4 = vld [vmem:[#allocation8 + $0xa4] ss:$16 sps:$4 sm:$0xff]  }
0x14d0   :  { %7567 = vmatmul.mubr.msk.bf16.vlgmr.msra.gmra.mrb[72].mxu1 %vm778_vm8, %v2441_v54  ;;  %v1836_v57 = vpop.permute.xlu0 %1835  ;;  %v8013_v54 = vld [vmem:[#allocation8 + $0x6c] ss:$16 sps:$4 sm:$0xff]  }
0x14d1   :  { %1842 = vst.msk [vmem:[#allocation2] sm:$0xff] %vm1841_vm12, %v1836_v57  ;;  %2953 = vmatprep.mubr.bf16.mxu1 %v8530_v0  ;;  %2922 = vmatpush1.bf16.msra.mxu1 %v7990_v36  ;;  %v8008_v57 = vld [vmem:[#allocation8 + $0x60] ss:$16 sps:$4 sm:$0xff]  }
0x14d2   :  { %7579 = vmatpush3.bf16.msra.mxu0 %v7986_v5  ;;  %2923 = vmatprep.subr.bf16.mxu1 %v7998_v20  ;;  %v8025_v5 = vld [vmem:[#allocation8 + $0xac] ss:$16 sps:$4 sm:$0xff]   ;;  %v8041_v20 = vld [vmem:[#allocation9 + $0x80] sm:$0xff]  }
0x14d3   :  { %7580 = vmatprep.subr.bf16.mxu0 %v8531_v24 }
0x14d4   :  { %v2071_v58 = vpop.permute.xlu0 %2070 }
0x14d5   :  { %2077 = vst.msk [vmem:[#allocation2] sm:$0xff] %vm2076_vm13, %v2071_v58  ;;  %2924 = vmatpush1.bf16.msra.mxu1 %v7996_v43  ;;  %v8011_v58 = vld [vmem:[#allocation8 + $0x68] ss:$16 sps:$4 sm:$0xff]  }
0x14d6   :  { %7581 = vmatpush3.bf16.msra.mxu0 %v7987_v6  ;;  %2925 = vmatprep.subr.bf16.mxu1 %v8004_v14  ;;  %v8020_v6 = vld [vmem:[#allocation8 + $0xa0] ss:$16 sps:$4 sm:$0xff]   ;;  %v8042_v43 = vld [vmem:[#allocation9 + $0x48] sm:$0xff]   ;;  %v8052_v14 = vld [vmem:[#allocation9 + $0x18] sm:$0xff]  }
0x14d7   :  { %7582 = vmatprep.subr.bf16.mxu0 %v8531_v24 }
0x14d8   :  { %v2306_v59 = vpop.permute.xlu0 %2305 }
0x14d9   :  { %2312 = vst.msk [vmem:[#allocation2] sm:$0xff] %vm2311_vm14, %v2306_v59  ;;  %2926 = vmatpush1.bf16.msra.mxu1 %v8002_v44  ;;  %v8016_v59 = vld [vmem:[#allocation8 + $0x84] ss:$16 sps:$4 sm:$0xff]  }
0x14da   :  { %7583 = vmatpush3.bf16.msra.mxu0 %v7988_v13  ;;  %2927 = vmatprep.subr.bf16.mxu1 %v8010_v47  ;;  %v8029_v13 = vld [vmem:[#allocation8 + $0xc8] ss:$16 sps:$4 sm:$0xff]   ;;  %v8054_v44 = vld [vmem:[#allocation9 + $0x60] sm:$0xff]  }
0x14db   :  { %7584 = vmatprep.subr.bf16.mxu0 %v8531_v24  ;;  %v8056_v47 = vld [vmem:[#allocation9 + $0x20] sm:$0xff]  }
0x14dd   :  { %2928 = vmatpush1.bf16.msra.mxu1 %v8008_v57  ;;  %v8058_v57 = vld [vmem:[#allocation9 + $0x68] sm:$0xff]  }
0x14de   :  { %7585 = vmatpush3.bf16.msra.mxu0 %v7989_v17  ;;  %2929 = vmatprep.subr.bf16.mxu1 %v8016_v59  ;;  %v8034_v17 = vld [vmem:[#allocation8 + $0xe4] ss:$16 sps:$4 sm:$0xff]   ;;  %v8060_v59 = vld [vmem:[#allocation9 + $0x28] sm:$0xff]  }
0x14df   :  { %2964 = vmatprep.subr.bf16.mxu0 %v7995_v41  ;;  %v8040_v41 = vld [vmem:[#allocation9] sm:$0xff]  }
0x14e1   :  { %2930 = vmatpush1.bf16.msra.mxu1 %v8014_v63  ;;  %v8061_v63 = vld [vmem:[#allocation9 + $0xa8] sm:$0xff]  }
0x14e2   :  { %2931 = vmatprep.subr.bf16.mxu1 %v8022_v4  ;;  %v8064_v4 = vld [vmem:[#allocation9 + $0x30] sm:$0xff]  }
0x14e5   :  { %2932 = vmatpush1.bf16.msra.mxu1 %v8020_v6  ;;  %v8066_v6 = vld [vmem:[#allocation9 + $0x78] sm:$0xff]  }
0x1594   :  { %v2484_v9 = vpop.f32.mrb[60].mxu0 }
0x1595   :  { %2540 = vrot.lane.b32.xlu0 %v2484_v9, %s8533_s27  ;;  %v7562_v10 = vpop.f32.mrb[61].mxu0  ;;  %v8023_v9 = vld [vmem:[#allocation8 + $0xa8] ss:$16 sps:$4 sm:$0xff]  }
0x1596   :  { %v2487_v11 = vpop.f32.mrb[62].mxu0  ;;  %v8028_v10 = vld [vmem:[#allocation8 + $0xc4] ss:$16 sps:$4 sm:$0xff]  }
0x1597   :  { %v7563_v12 = vpop.f32.mrb[63].mxu0  ;;  %v8031_v11 = vld [vmem:[#allocation8 + $0xcc] ss:$16 sps:$4 sm:$0xff]   ;;  %2933 = vmatprep.subr.bf16.mxu1 %v8028_v10 }
0x1598   :  { %v8026_v12 = vld [vmem:[#allocation8 + $0xc0] ss:$16 sps:$4 sm:$0xff]   ;;  %v8068_v10 = vld [vmem:[#allocation9 + $0x38] sm:$0xff]  }
0x1599   :  { %2934 = vmatpush1.bf16.msra.mxu1 %v8026_v12  ;;  %v2739_v12 = vld [vmem:[%s9892_s16] sm:$0xf] }
0x159a   :  { %2935 = vmatprep.subr.bf16.mxu1 %v8034_v17  ;;  %v2744_v17 = vrot.slane %v2739_v12, %v8826_v39 }
0x15a3   :  { %v2532_v18 = vpop.f32.mrb[72].mxu1 }
0x15a4   :  { %2542 = vrot.lane.b32.xlu1 %v2532_v18, %s8533_s27  ;;  %v7568_v19 = vpop.f32.mrb[73].mxu1  ;;  %v8037_v18 = vld [vmem:[#allocation8 + $0xec] ss:$16 sps:$4 sm:$0xff]  }
0x15a5   :  { %v2535_v22 = vpop.f32.mrb[74].mxu1  ;;  %v8032_v19 = vld [vmem:[#allocation8 + $0xe0] ss:$16 sps:$4 sm:$0xff]  }
0x15a6   :  { %v7569_v25 = vpop.f32.mrb[75].mxu1  ;;  %v8035_v22 = vld [vmem:[#allocation8 + $0xe8] ss:$16 sps:$4 sm:$0xff]   ;;  %2936 = vmatpush1.bf16.msra.mxu1 %v8032_v19  ;;  %v2748_v19 = vrot.slane %v2739_v12, %v8816_v35 }
0x15a7   :  { %v8038_v25 = vld [vmem:[#allocation9 + $0x40] sm:$0xff]  }
0x15a8   :  { %7130 = vmatprep.subr.bf16.mxu1 %v8038_v25 }
0x1607   :  { %v2541_v26 = vpop.permute.xlu0 %2540 }
0x1608   :  { %2547 = vst.msk [vmem:[#allocation2] sm:$0xff] %vm2546_vm15, %v2541_v26  ;;  %v8039_v26 = vld [vmem:[#allocation9 + $0xc0] sm:$0xff]  }
0x160f   :  { %v2549_v29 = vld [vmem:[#allocation2] sm:$0xff] }
0x1616   :  { %v2543_v27 = vpop.permute.xlu1 %2542 }
0x1617   :  { %2548 = vst.msk [vmem:[#allocation2 + $0x8] sm:$0xff] %vm2546_vm15, %v2543_v27 }
0x161e   :  { %v2550_v60 = vld [vmem:[#allocation2 + $0x8] sm:$0xff] }
0x161f   :  { %v2551_v51 = vpack.c.bf16 %v2550_v60, %v2549_v29 }
0x1621   :  { %7587 = vmatmul.mubr.bf16.vlgmr.msra.gmra.mrb[64].mxu0 %v2551_v51 }
0x1622   :  { %2996 = vmatprep.mubr.bf16.mxu0 %v8530_v0  ;;  %2965 = vmatpush1.bf16.msra.mxu0 %v7993_v40 }
0x1623   :  { %2966 = vmatprep.subr.bf16.mxu0 %v8001_v42 }
0x1626   :  { %2967 = vmatpush1.bf16.msra.mxu0 %v7999_v56  ;;  %v8043_v56 = vld [vmem:[#allocation9 + $0xc8] sm:$0xff]  }
0x1627   :  { %2968 = vmatprep.subr.bf16.mxu0 %v8007_v28  ;;  %v8053_v28 = vld [vmem:[#allocation9 + $0x98] sm:$0xff]  }
0x162a   :  { %2969 = vmatpush1.bf16.msra.mxu0 %v8005_v53  ;;  %v8055_v53 = vld [vmem:[#allocation9 + $0xe0] sm:$0xff]  }
0x162b   :  { %2970 = vmatprep.subr.bf16.mxu0 %v8013_v54  ;;  %v8057_v54 = vld [vmem:[#allocation9 + $0xa0] sm:$0xff]  }
0x162e   :  { %2971 = vmatpush1.bf16.msra.mxu0 %v8011_v58  ;;  %v8059_v58 = vld [vmem:[#allocation9 + $0xe8] sm:$0xff]  }
0x162f   :  { %2972 = vmatprep.subr.bf16.mxu0 %v8019_v2  ;;  %v8063_v2 = vld [vmem:[#allocation9 + $0xf0] sm:$0xff]  }
0x1632   :  { %2973 = vmatpush1.bf16.msra.mxu0 %v8017_v1  ;;  %v8062_v1 = vld [vmem:[#allocation9 + $0x70] sm:$0xff]  }
0x1633   :  { %2974 = vmatprep.subr.bf16.mxu0 %v8025_v5  ;;  %v8065_v5 = vld [vmem:[#allocation9 + $0xb0] sm:$0xff]  }
0x1636   :  { %2975 = vmatpush1.bf16.msra.mxu0 %v8023_v9  ;;  %v8067_v9 = vld [vmem:[#allocation9 + $0xf8] sm:$0xff]  }
0x1637   :  { %2976 = vmatprep.subr.bf16.mxu0 %v8031_v11  ;;  %v8069_v11 = vld [vmem:[#allocation9 + $0xb8] sm:$0xff]  }
0x163a   :  { %2977 = vmatpush1.bf16.msra.mxu0 %v8029_v13  ;;  %v2755_v13 = vsub.s32 3, %v8813_v34 }
0x163b   :  { %2978 = vmatprep.subr.bf16.mxu0 %v8037_v18  ;;  %v2752_v18 = vrot.slane %v2739_v12, %v8822_v37 }
0x163e   :  { %2979 = vmatpush1.bf16.msra.mxu0 %v8035_v22  ;;  %v2756_v22 = vrot.slane %v2739_v12, %v2755_v13 }
0x163f   :  { %7152 = vmatprep.subr.bf16.mxu0 %v8039_v26 }
0x16f4   :  { %v2657_v55 = vpop.f32.mrb[64].mxu0 }
0x16f5   :  { %v2658_v15 = vadd.f32 %v6789_v3, %v2657_v55  ;;  %v7588_v61 = vpop.f32.mrb[65].mxu0 }
0x16f6   :  { %v2660_v23 = vpop.f32.mrb[66].mxu0 }
0x16f7   :  { %v2661_v30 = vadd.f32 %v6789_v3, %v2660_v23  ;;  %v7589_v33 = vpop.f32.mrb[67].mxu0  ;;  %v2664_v45 = vadd.f32 %v2658_v15, %v8802_v31  ;;  %v6798_v23 = vld [vmem:[%s9889_s13] ss:$0 sm:$0xff] }
0x16f9   :  { %2668 = vadd.xlane.f32.xlu0 %v2664_v45  ;;  %v2665_v62 = vadd.f32 %v2661_v30, %v8804_v32 }
0x16fb   :  { %2670 = vadd.xlane.f32.xlu1 %v2665_v62 }
0x1786   :  { %v2669_v31 = vpop.xlane.xlu0 %2668 }
0x1787   :  { %v2672_v46 = vmul.f32 0.0078125, %v2669_v31  ;;  %v8044_v31 = vld [vmem:[#allocation9 + $0x8] sm:$0xff]  }
0x1788   :  { %v2671_v32 = vpop.xlane.xlu1 %2670 }
0x1789   :  { %v9254_v49 = vsub.f32 %v2664_v45, %v2672_v46  ;;  %v2673_v50 = vmul.f32 0.0078125, %v2671_v32  ;;  %v8045_v46 = vld [vmem:[#allocation9 + $0x88] sm:$0xff]   ;;  %v8046_v32 = vld [vmem:[#allocation9 + $0x50] sm:$0xff]  }
0x178b   :  { %v9256_v48 = vsub.f32 %v2665_v62, %v2673_v50  ;;  %v2676_v52 = vmul.f32 %v9254_v49, %v9254_v49  ;;  %v6799_v62 = vld [vmem:[%s9890_s14] ss:$0 sm:$0xff] }
0x178c   :  { %v8048_v50 = vld [vmem:[#allocation9 + $0x10] sm:$0xff]  }
0x178d   :  { %2678 = vadd.xlane.f32.xlu0 %v2676_v52  ;;  %v2677_v8 = vmul.f32 %v9256_v48, %v9256_v48  ;;  %v8050_v52 = vld [vmem:[#allocation9 + $0x58] sm:$0xff]  }
0x1791   :  { %2680 = vadd.xlane.f32.xlu0 %v2677_v8  ;;  %v8051_v8 = vld [vmem:[#allocation9 + $0xd8] sm:$0xff]  }
0x181a   :  { %v2679_v27 = vpop.xlane.xlu0 %2678 }
0x181b   :  { %v2682_v29 = vmul.f32 0.0078125, %v2679_v27 }
0x181d   :  { %v2684_v60 = vadd.f32 1e-05, %v2682_v29 }
0x181e   :  { %v2681_v51 = vpop.xlane.xlu0 %2680 }
0x181f   :  { %8258 = vrsqrt.f32 %v2684_v60  ;;  %v2683_v3 = vmul.f32 0.0078125, %v2681_v51 }
0x1821   :  { %v2685_v55 = vadd.f32 1e-05, %v2683_v3 }
0x1823   :  { %8260 = vrsqrt.f32 %v2685_v55 }
0x1829   :  { %v8259_v15 = vpop.eup %8258 }
0x182a   :  { %v2688_v61 = vmul.f32 %v8259_v15, %v9254_v49  ;;  %v8047_v49 = vld [vmem:[#allocation9 + $0xd0] sm:$0xff]  }
0x182c   :  { %v2696_v45 = vmul.f32 %v6798_v23, %v2688_v61 }
0x182d   :  { %v8261_v30 = vpop.eup %8260 }
0x182e   :  { %v2689_v33 = vmul.f32 %v8261_v30, %v9256_v48  ;;  %v9270_v38 = vadd.f32 %v6799_v62, %v2696_v45  ;;  %v8049_v48 = vld [vmem:[#allocation9 + $0x90] sm:$0xff]  }
0x1830   :  { %v2697_v36 = vmul.f32 %v6798_v23, %v2689_v33 }
0x1832   :  { %v9272_v40 = vadd.f32 %v6799_v62, %v2697_v36 }
0x1834   :  { %v2706_v42 = vpack.c.bf16 %v9272_v40, %v9270_v38 }
0x1836   :  { %2954 = vmatmul.mubr.bf16.vlgmr.msra.gmra.mrb[76].mxu1 %v2706_v42  ;;  %2997 = vmatmul.mubr.bf16.vlgmr.msra.gmra.mrb[68].mxu0 %v2706_v42 }
0x1837   :  { %7131 = vmatpush3.bf16.msra.mxu1 %v8040_v41  ;;  %7153 = vmatpush3.bf16.msra.mxu0 %v8041_v20 }
0x1838   :  { %7132 = vmatprep.subr.bf16.mxu1 %v8042_v43  ;;  %7154 = vmatprep.subr.bf16.mxu0 %v8043_v56 }
0x183b   :  { %7133 = vmatpush3.bf16.msra.mxu1 %v8044_v31  ;;  %7155 = vmatpush3.bf16.msra.mxu0 %v8045_v46 }
0x183c   :  { %7134 = vmatprep.subr.bf16.mxu1 %v8046_v32  ;;  %7156 = vmatprep.subr.bf16.mxu0 %v8047_v49 }
0x183f   :  { %7135 = vmatpush3.bf16.msra.mxu1 %v8048_v50  ;;  %7157 = vmatpush3.bf16.msra.mxu0 %v8049_v48 }
0x1840   :  { %7136 = vmatprep.subr.bf16.mxu1 %v8050_v52  ;;  %7158 = vmatprep.subr.bf16.mxu0 %v8051_v8 }
0x1843   :  { %7137 = vmatpush3.bf16.msra.mxu1 %v8052_v14  ;;  %7159 = vmatpush3.bf16.msra.mxu0 %v8053_v28 }
0x1844   :  { %7138 = vmatprep.subr.bf16.mxu1 %v8054_v44  ;;  %7160 = vmatprep.subr.bf16.mxu0 %v8055_v53 }
0x1847   :  { %7139 = vmatpush3.bf16.msra.mxu1 %v8056_v47  ;;  %7161 = vmatpush3.bf16.msra.mxu0 %v8057_v54 }
0x1848   :  { %7140 = vmatprep.subr.bf16.mxu1 %v8058_v57  ;;  %7162 = vmatprep.subr.bf16.mxu0 %v8059_v58 }
0x184b   :  { %7141 = vmatpush3.bf16.msra.mxu1 %v8060_v59  ;;  %7163 = vmatpush3.bf16.msra.mxu0 %v8061_v63 }
0x184c   :  { %7142 = vmatprep.subr.bf16.mxu1 %v8062_v1  ;;  %7164 = vmatprep.subr.bf16.mxu0 %v8063_v2 }
0x184f   :  { %7143 = vmatpush3.bf16.msra.mxu1 %v8064_v4  ;;  %7165 = vmatpush3.bf16.msra.mxu0 %v8065_v5 }
0x1850   :  { %7144 = vmatprep.subr.bf16.mxu1 %v8066_v6  ;;  %7166 = vmatprep.subr.bf16.mxu0 %v8067_v9 }
0x1853   :  { %7145 = vmatpush3.bf16.msra.mxu1 %v8068_v10  ;;  %7167 = vmatpush3.bf16.msra.mxu0 %v8069_v11 }
0x1854   :  { %7590 = vmatprep.subr.bf16.mxu0 %v8531_v24 }
0x1909   :  { %v2955_v25 = vpop.f32.mrb[76].mxu1  ;;  %v2998_v26 = vpop.f32.mrb[68].mxu0 }
0x190a   :  { %v2956_v27 = vadd.f32 %v2955_v25, %v2744_v17  ;;  %v2999_v29 = vadd.f32 %v2998_v26, %v2752_v18  ;;  %v2957_v60 = vpop.f32.mrb[77].mxu1  ;;  %v3000_v51 = vpop.f32.mrb[69].mxu0 }
0x190b   :  { %v2958_v3 = vadd.f32 %v2957_v60, %v2748_v19  ;;  %v3001_v55 = vadd.f32 %v3000_v51, %v2756_v22  ;;  %v2959_v15 = vpop.f32.mrb[78].mxu1  ;;  %v3002_v61 = vpop.f32.mrb[70].mxu0 }
0x190c   :  { %v3015_v23 = vmul.f32 0.70710677, %v2956_v27  ;;  %v3017_v30 = vmul.f32 0.70710677, %v2999_v29  ;;  %v2960_v62 = vadd.f32 %v2959_v15, %v2744_v17  ;;  %v3003_v36 = vadd.f32 %v3002_v61, %v2752_v18  ;;  %v2961_v41 = vpop.f32.mrb[79].mxu1  ;;  %v3004_v20 = vpop.f32.mrb[71].mxu0 }
0x190d   :  { %v3016_v33 = vmul.f32 0.70710677, %v2958_v3  ;;  %v3018_v45 = vmul.f32 0.70710677, %v3001_v55  ;;  %v2962_v42 = vadd.f32 %v2961_v41, %v2748_v19  ;;  %v3005_v43 = vadd.f32 %v3004_v20, %v2756_v22 }
0x190e   :  { %8262 = verf.f32 %v3015_v23  ;;  %v3019_v56 = vmul.f32 0.70710677, %v2960_v62  ;;  %v3021_v31 = vmul.f32 0.70710677, %v3003_v36  ;;  %v3007_v28 = vmul.f32 0.5, %v2956_v27 }
0x190f   :  { %8264 = verf.f32 %v3017_v30  ;;  %v3020_v46 = vmul.f32 0.70710677, %v2962_v42  ;;  %v3022_v32 = vmul.f32 0.70710677, %v3005_v43  ;;  %v3009_v44 = vmul.f32 0.5, %v2999_v29 }
0x1910   :  { %8266 = verf.f32 %v3016_v33  ;;  %v3008_v54 = vmul.f32 0.5, %v2958_v3  ;;  %v3011_v58 = vmul.f32 0.5, %v2960_v62  ;;  %v3010_v1 = vmul.f32 0.5, %v3001_v55  ;;  %v6832_v23 = vld [vmem:[%s9894_s18] ss:$0 sm:$0xff] }
0x1911   :  { %8268 = verf.f32 %v3018_v45  ;;  %v3013_v4 = vmul.f32 0.5, %v3003_v36  ;;  %v3012_v11 = vmul.f32 0.5, %v2962_v42  ;;  %v3014_v19 = vmul.f32 0.5, %v3005_v43 }
0x1912   :  { %8270 = verf.f32 %v3019_v56 }
0x1913   :  { %8272 = verf.f32 %v3021_v31 }
0x1914   :  { %8274 = verf.f32 %v3020_v46 }
0x1915   :  { %8276 = verf.f32 %v3022_v32 }
0x1918   :  { %v8263_v49 = vpop.eup %8262 }
0x1919   :  { %v8265_v50 = vpop.eup %8264  ;;  %v3031_v8 = vadd.f32 1.0, %v8263_v49 }
0x191a   :  { %v8267_v48 = vpop.eup %8266  ;;  %v3033_v53 = vadd.f32 1.0, %v8265_v50 }
0x191b   :  { %v8269_v52 = vpop.eup %8268  ;;  %v3032_v57 = vadd.f32 1.0, %v8267_v48  ;;  %v3039_v9 = vmul.f32 %v3031_v8, %v3007_v28  ;;  %v8072_v8 = vld [vmem:[#allocation6 + $0xc4] ss:$12 sps:$4 sm:$0xff]   ;;  %v8076_v28 = vld [vmem:[#allocation6 + $0xdc] ss:$12 sps:$4 sm:$0xff]  }
0x191c   :  { %v8271_v14 = vpop.eup %8270  ;;  %v3034_v2 = vadd.f32 1.0, %v8269_v52  ;;  %v3041_v17 = vmul.f32 %v3033_v53, %v3009_v44  ;;  %v8070_v52 = vld [vmem:[#allocation6 + $0xc0] ss:$12 sps:$4 sm:$0xff]   ;;  %3618 = vmatprep.subr.bf16.mxu1 %v8072_v8  ;;  %v8074_v53 = vld [vmem:[#allocation6 + $0xd8] ss:$12 sps:$4 sm:$0xff]  }
0x191d   :  { %v8273_v47 = vpop.eup %8272  ;;  %v3035_v59 = vadd.f32 1.0, %v8271_v14  ;;  %v3040_v25 = vmul.f32 %v3032_v57, %v3008_v54  ;;  %v8073_v14 = vld [vmem:[#allocation6 + $0xc8] ss:$12 sps:$4 sm:$0xff]   ;;  %v8077_v44 = vld [vmem:[#allocation6 + $0xe0] ss:$12 sps:$4 sm:$0xff]  }
0x191e   :  { %v8275_v63 = vpop.eup %8274  ;;  %v3037_v5 = vadd.f32 1.0, %v8273_v47  ;;  %v3042_v29 = vmul.f32 %v3034_v2, %v3010_v1  ;;  %v8080_v1 = vld [vmem:[#allocation6 + $0xf4] ss:$12 sps:$4 sm:$0xff]   ;;  %v8078_v2 = vld [vmem:[#allocation6 + $0xf0] ss:$12 sps:$4 sm:$0xff]  }
0x191f   :  { %v8277_v6 = vpop.eup %8276  ;;  %v3043_v10 = vmul.f32 %v3035_v59, %v3011_v58  ;;  %v3036_v12 = vadd.f32 1.0, %v8275_v63 }
0x1920   :  { %v3045_v18 = vmul.f32 %v3037_v5, %v3013_v4  ;;  %v3038_v22 = vadd.f32 1.0, %v8277_v6  ;;  %v8081_v4 = vld [vmem:[#allocation6 + $0xf8] ss:$12 sps:$4 sm:$0xff]   ;;  %v8082_v6 = vld [vmem:[#allocation6 + $0x108] ss:$12 sps:$4 sm:$0xff]  }
0x1921   :  { %v3047_v26 = vpack.c.bf16 %v3043_v10, %v3039_v9  ;;  %v3044_v27 = vmul.f32 %v3036_v12, %v3012_v11  ;;  %v8084_v5 = vld [vmem:[#allocation6 + $0x10c] ss:$12 sps:$4 sm:$0xff]   ;;  %v8085_v9 = vld [vmem:[#allocation6 + $0x110] ss:$12 sps:$4 sm:$0xff]   ;;  %v8089_v12 = vld [vmem:[#allocation6 + $0x128] ss:$12 sps:$4 sm:$0xff]  }
0x1922   :  { %v3049_v60 = vpack.c.bf16 %v3045_v18, %v3041_v17  ;;  %v3046_v51 = vmul.f32 %v3038_v22, %v3014_v19  ;;  %v8088_v10 = vld [vmem:[#allocation6 + $0x124] ss:$12 sps:$4 sm:$0xff]   ;;  %v8086_v11 = vld [vmem:[#allocation6 + $0x120] ss:$12 sps:$4 sm:$0xff]   ;;  %v8092_v17 = vld [vmem:[#allocation6 + $0x13c] ss:$12 sps:$4 sm:$0xff]  }
0x1923   :  { %v3048_v3 = vpack.c.bf16 %v3044_v27, %v3040_v25  ;;  %v8090_v18 = vld [vmem:[#allocation6 + $0x138] ss:$12 sps:$4 sm:$0xff]   ;;  %v8093_v19 = vld [vmem:[#allocation6 + $0x140] ss:$12 sps:$4 sm:$0xff]   ;;  %v8094_v25 = vld [vmem:[#allocation6 + $0x150] ss:$12 sps:$4 sm:$0xff]  }
0x1924   :  { %v3050_v55 = vpack.c.bf16 %v3046_v51, %v3042_v29  ;;  %v8096_v22 = vld [vmem:[#allocation6 + $0x154] ss:$12 sps:$4 sm:$0xff]   ;;  %v8100_v27 = vld [vmem:[#allocation6 + $0x16c] ss:$12 sps:$4 sm:$0xff]  }
0x1925   :  { %3346 = vmatprep.mubr.bf16.mxu1 %v3048_v3  ;;  %v8098_v29 = vld [vmem:[#allocation6 + $0x168] ss:$12 sps:$4 sm:$0xff]  }
0x1926   :  { %3387 = vmatprep.mubr.bf16.mxu0 %v3050_v55  ;;  %3347 = vmatmul.mubr.bf16.vlgmr.msra.gmra.mrb[80].mxu1 %v3047_v26  ;;  %v8097_v26 = vld [vmem:[#allocation6 + $0x158] ss:$12 sps:$4 sm:$0xff]  }
0x1927   :  { %3388 = vmatmul.mubr.bf16.vlgmr.msra.gmra.mrb[72].mxu0 %v3049_v60  ;;  %3650 = vmatprep.mubr.bf16.mxu1 %v8530_v0  ;;  %v8101_v60 = vld [vmem:[#allocation6 + $0x170] ss:$12 sps:$4 sm:$0xff]  }
0x1928   :  { %7606 = vmatprep.mubr.msk.bf16.mxu0 %vm8532_vm5, %v8531_v24  ;;  %7591 = vmatpush3.bf16.msra.mxu0 %v8073_v14 }
0x1929   :  { %3619 = vmatpush1.bf16.msra.mxu1 %v8070_v52  ;;  %7592 = vmatprep.subr.bf16.mxu0 %v8531_v24 }
0x192a   :  { %3620 = vmatprep.subr.bf16.mxu1 %v8076_v28 }
0x192c   :  { %7593 = vmatpush3.bf16.msra.mxu0 %v8077_v44 }
0x192d   :  { %3621 = vmatpush1.bf16.msra.mxu1 %v8074_v53  ;;  %7594 = vmatprep.subr.bf16.mxu0 %v8531_v24 }
0x192e   :  { %3622 = vmatprep.subr.bf16.mxu1 %v8080_v1 }
0x1930   :  { %7595 = vmatpush3.bf16.msra.mxu0 %v8081_v4 }
0x1931   :  { %3623 = vmatpush1.bf16.msra.mxu1 %v8078_v2  ;;  %7596 = vmatprep.subr.bf16.mxu0 %v8531_v24 }
0x1932   :  { %3624 = vmatprep.subr.bf16.mxu1 %v8084_v5 }
0x1934   :  { %7597 = vmatpush3.bf16.msra.mxu0 %v8085_v9 }
0x1935   :  { %3625 = vmatpush1.bf16.msra.mxu1 %v8082_v6  ;;  %7598 = vmatprep.subr.bf16.mxu0 %v8531_v24 }
0x1936   :  { %3626 = vmatprep.subr.bf16.mxu1 %v8088_v10 }
0x1938   :  { %7599 = vmatpush3.bf16.msra.mxu0 %v8089_v12 }
0x1939   :  { %3627 = vmatpush1.bf16.msra.mxu1 %v8086_v11  ;;  %7600 = vmatprep.subr.bf16.mxu0 %v8531_v24 }
0x193a   :  { %3628 = vmatprep.subr.bf16.mxu1 %v8092_v17 }
0x193c   :  { %7601 = vmatpush3.bf16.msra.mxu0 %v8093_v19 }
0x193d   :  { %3629 = vmatpush1.bf16.msra.mxu1 %v8090_v18  ;;  %7602 = vmatprep.subr.bf16.mxu0 %v8531_v24 }
0x193e   :  { %3630 = vmatprep.subr.bf16.mxu1 %v8096_v22 }
0x1940   :  { %7603 = vmatpush3.bf16.msra.mxu0 %v8097_v26 }
0x1941   :  { %3631 = vmatpush1.bf16.msra.mxu1 %v8094_v25  ;;  %7604 = vmatprep.subr.bf16.mxu0 %v8531_v24 }
0x1942   :  { %3632 = vmatprep.subr.bf16.mxu1 %v8100_v27 }
0x1944   :  { %7605 = vmatpush3.bf16.msra.mxu0 %v8101_v60 }
0x1945   :  { %3633 = vmatpush1.bf16.msra.mxu1 %v8098_v29  ;;  %7634 = vmatprep.subr.bf16.mxu0 %v8531_v24 }
0x1946   :  { %7610 = vmatprep.subr.bf16.mxu1 %v8531_v24 }
0x19f9   :  { %v7146_v15 = vpop.f32.mrb[80].mxu1 }
0x19fa   :  { %v7168_v61 = vpop.f32.mrb[72].mxu0  ;;  %v7147_v30 = vpop.f32.mrb[81].mxu1 }
0x19fb   :  { %v7148_v33 = vadd.f32 %v7147_v30, %v7146_v15  ;;  %v7169_v45 = vpop.f32.mrb[73].mxu0  ;;  %v7149_v62 = vpop.f32.mrb[82].mxu1 }
0x19fc   :  { %v7170_v36 = vadd.f32 %v7169_v45, %v7168_v61  ;;  %v7171_v41 = vpop.f32.mrb[74].mxu0  ;;  %v7150_v20 = vpop.f32.mrb[83].mxu1 }
0x19fd   :  { %v3349_v42 = vadd.f32 %v7148_v33, %v6832_v23  ;;  %v7151_v43 = vadd.f32 %v7150_v20, %v7149_v62  ;;  %v7172_v56 = vpop.f32.mrb[75].mxu0  ;;  %v6865_v33 = vld [vmem:[%s9895_s19] ss:$0 sm:$0xff] }
0x19fe   :  { %v7173_v31 = vadd.f32 %v7172_v56, %v7171_v41  ;;  %v6866_v20 = vld [vmem:[%s9896_s20] ss:$0 sm:$0xff] }
0x19ff   :  { %v3390_v46 = vadd.f32 %v7170_v36, %v3349_v42  ;;  %v3352_v32 = vadd.f32 %v7151_v43, %v6832_v23 }
0x1a01   :  { %v3393_v49 = vadd.f32 %v7173_v31, %v3352_v32  ;;  %v3396_v50 = vadd.f32 %v3390_v46, %v9270_v38  ;;  %v6867_v46 = vld [vmem:[%s9886_s10 + $0x3] sm:$0x7] }
0x1a02   :  { %v3482_v32 = vrot.slane %v6867_v46, %v8816_v35 }
0x1a03   :  { %3400 = vadd.xlane.f32.xlu1 %v3396_v50  ;;  %v3397_v48 = vadd.f32 %v3393_v49, %v9272_v40 }
0x1a05   :  { %3402 = vadd.xlane.f32.xlu0 %v3397_v48 }
0x1a90   :  { %v3401_v38 = vpop.xlane.xlu1 %3400 }
0x1a91   :  { %v3404_v47 = vmul.f32 0.0078125, %v3401_v38 }
0x1a92   :  { %v3403_v40 = vpop.xlane.xlu0 %3402 }
0x1a93   :  { %v3406_v54 = vsub.f32 %v3396_v50, %v3404_v47  ;;  %v3405_v57 = vmul.f32 0.0078125, %v3403_v40  ;;  %v3478_v40 = vrot.slane %v6867_v46, %v8826_v39 }
0x1a95   :  { %v3407_v58 = vsub.f32 %v3397_v48, %v3405_v57  ;;  %v3408_v59 = vmul.f32 %v3406_v54, %v3406_v54  ;;  %v3486_v48 = vrot.slane %v6867_v46, %v8822_v37 }
0x1a97   :  { %3410 = vadd.xlane.f32.xlu1 %v3408_v59  ;;  %v3409_v63 = vmul.f32 %v3407_v58, %v3407_v58 }
0x1a99   :  { %3412 = vadd.xlane.f32.xlu0 %v3409_v63 }
0x1b24   :  { %v3411_v51 = vpop.xlane.xlu1 %3410 }
0x1b25   :  { %v3414_v3 = vmul.f32 0.0078125, %v3411_v51 }
0x1b26   :  { %v3413_v55 = vpop.xlane.xlu0 %3412 }
0x1b27   :  { %v3416_v15 = vadd.f32 1e-05, %v3414_v3  ;;  %v3415_v61 = vmul.f32 0.0078125, %v3413_v55 }
0x1b29   :  { %8278 = vrsqrt.f32 %v3416_v15  ;;  %v3417_v23 = vadd.f32 1e-05, %v3415_v61 }
0x1b2b   :  { %8280 = vrsqrt.f32 %v3417_v23 }
0x1b33   :  { %v8279_v30 = vpop.eup %8278 }
0x1b34   :  { %v3420_v45 = vmul.f32 %v8279_v30, %v3406_v54 }
0x1b35   :  { %v8281_v62 = vpop.eup %8280 }
0x1b36   :  { %v3421_v36 = vmul.f32 %v8281_v62, %v3407_v58  ;;  %v3428_v41 = vmul.f32 %v6865_v33, %v3420_v45 }
0x1b38   :  { %v3429_v42 = vmul.f32 %v6865_v33, %v3421_v36  ;;  %v9309_v43 = vadd.f32 %v6866_v20, %v3428_v41 }
0x1b3a   :  { %v9311_v56 = vadd.f32 %v6866_v20, %v3429_v42 }
0x1b3c   :  { %v3438_v31 = vpack.c.bf16 %v9311_v56, %v9309_v43 }
0x1b3e   :  { %3651 = vmatmul.mubr.bf16.vlgmr.msra.gmra.mrb[84].mxu1 %v3438_v31  ;;  %7607 = vmatmul.mubr.bf16.vlgmr.msra.gmra.mrb[76].mxu0 %v3438_v31 }
0x1b3f   :  { %7612 = vmatprep.mubr.msk.bf16.mxu1 %vm8532_vm5, %v8531_v24  ;;  %7636 = vmatprep.mubr.msk.bf16.mxu0 %vm8532_vm5, %v8531_v24 }
0x1c11   :  { %v3652_v49 = vpop.f32.mrb[84].mxu1  ;;  %v3695_v50 = vpop.f32.mrb[76].mxu0 }
0x1c12   :  { %v3654_v52 = vpop.f32.mrb[85].mxu1  ;;  %v7608_v8 = vpop.f32.mrb[77].mxu0  ;;  %v3653_v59 = vadd.f32 %v3652_v49, %v3478_v40  ;;  %v3696_v2 = vadd.f32 %v3695_v50, %v3486_v48 }
0x1c13   :  { %v3655_v14 = vadd.f32 %v3654_v52, %v3482_v32  ;;  %v3656_v28 = vpop.f32.mrb[86].mxu1  ;;  %v3698_v44 = vpop.f32.mrb[78].mxu0 }
0x1c14   :  { %v9324_v53 = vadd.f32 %v3698_v44, %v3486_v48  ;;  %v3658_v38 = vpop.f32.mrb[87].mxu1  ;;  %v7609_v47 = vpop.f32.mrb[79].mxu0  ;;  %v9334_v1 = vpack.c.bf16 %v3653_v59, %v3653_v59  ;;  %v3657_v5 = vadd.f32 %v3656_v28, %v3478_v40  ;;  %v9343_v6 = vpack.c.bf16 %v3696_v2, %v3696_v2 }
0x1c15   :  { %v9327_v54 = vpack.c.bf16 %v3655_v14, %v3655_v14  ;;  %v3659_v57 = vadd.f32 %v3658_v38, %v3482_v32 }
0x1c16   :  { %v9345_v9 = vpack.c.bf16 %v3657_v5, %v3657_v5  ;;  %v3832_v10 = vsel %vm806_vm7, %v9343_v6, 0  ;;  %v9372_v50 = vpack.c.bf16 %v9324_v53, %v9324_v53 }
0x1c17   :  { %v3712_v58 = vsel %vm669_vm6, %v9327_v54, 0  ;;  %v9332_v63 = vpack.c.bf16 %v3659_v57, %v3659_v57 }
0x1c18   :  { %7611 = vmatpush3.bf16.xpose.msra.mxu1 %v3712_v58  ;;  %v3878_v14 = vsel %vm806_vm7, %v9372_v50, 0 }
0x1c19   :  { %7616 = vmatprep.subr.bf16.mxu1 %v8531_v24  ;;  %v3758_v4 = vsel %vm669_vm6, %v9332_v63, 0 }
0x1c1f   :  { %7613 = vmatmul.mubr.msk.bf16.vlgmr.msra.gmra.mrb[88].mxu1 %vm669_vm6, %v9334_v1 }
0x1c20   :  { %7617 = vmatpush3.bf16.xpose.msra.mxu1 %v3758_v4  ;;  %7618 = vmatprep.mubr.msk.bf16.mxu1 %vm8532_vm5, %v8531_v24 }
0x1c21   :  { %7622 = vmatprep.subr.bf16.mxu1 %v8531_v24 }
0x1c27   :  { %7619 = vmatmul.mubr.msk.bf16.vlgmr.msra.gmra.mrb[92].mxu1 %vm669_vm6, %v9345_v9 }
0x1c28   :  { %7623 = vmatpush3.bf16.msra.mxu1 %v3832_v10  ;;  %7624 = vmatprep.mubr.msk.bf16.mxu1 %vm8532_vm5, %v8531_v24 }
0x1c29   :  { %7628 = vmatprep.subr.bf16.mxu1 %v8531_v24 }
0x1cf2   :  { %v3748_v11 = vpop.f32.mrb[88].mxu1 }
0x1cf3   :  { %v3800_v12 = vmul.f32 0.25, %v3748_v11  ;;  %v7614_v17 = vpop.f32.mrb[89].mxu1 }
0x1cf4   :  { %v3751_v18 = vpop.f32.mrb[90].mxu1 }
0x1cf5   :  { %v3802_v19 = vadd.f32 %v3800_v12, %v8866_v7  ;;  %v7615_v22 = vpop.f32.mrb[91].mxu1 }
0x1cf7   :  { %v3804_v25 = vsel %vm778_vm8, %v3802_v19, -inf }
0x1cf8   :  { %3805 = vmax.xlane.f32.xlu1 %v3804_v25 }
0x1cfa   :  { %v3794_v26 = vpop.f32.mrb[92].mxu1 }
0x1cfb   :  { %v3801_v27 = vmul.f32 0.25, %v3794_v26  ;;  %v7620_v29 = vpop.f32.mrb[93].mxu1 }
0x1cfc   :  { %v3797_v60 = vpop.f32.mrb[94].mxu1 }
0x1cfd   :  { %v3803_v51 = vadd.f32 %v3801_v27, %v8871_v16  ;;  %v7621_v3 = vpop.f32.mrb[95].mxu1 }
0x1cff   :  { %v3807_v55 = vsel %vm778_vm8, %v3803_v51, -inf }
0x1d00   :  { %3808 = vmax.xlane.f32.xlu0 %v3807_v55 }
0x1d85   :  { %v3806_v15 = vpop.xlane.xlu1 %3805 }
0x1d86   :  { %v3810_v61 = vsub.f32 %v3802_v19, %v3806_v15 }
0x1d88   :  { %v3812_v23 = vmul.f32 1.442695, %v3810_v61 }
0x1d8a   :  { %8282 = vpow2.f32 %v3812_v23 }
0x1d8d   :  { %v3809_v30 = vpop.xlane.xlu0 %3808 }
0x1d8e   :  { %v3811_v33 = vsub.f32 %v3803_v51, %v3809_v30 }
0x1d90   :  { %v3814_v45 = vmul.f32 1.442695, %v3811_v33 }
0x1d92   :  { %8284 = vpow2.f32 %v3814_v45 }
0x1d94   :  { %v8283_v62 = vpop.eup %8282 }
0x1d95   :  { %v3816_v36 = vsel %vm778_vm8, %v8283_v62, 0.0 }
0x1d96   :  { %3817 = vadd.xlane.f32.xlu1 %v3816_v36 }
0x1d9c   :  { %v8285_v41 = vpop.eup %8284 }
0x1d9d   :  { %v3819_v20 = vsel %vm778_vm8, %v8285_v41, 0.0 }
0x1d9e   :  { %3820 = vadd.xlane.f32.xlu0 %v3819_v20 }
0x1da7   :  { %3926 = vrot.lane.b32.xlu1 %v9327_v54, %s8533_s27 }
0x1dab   :  { %3923 = vrot.lane.b32.xlu1 %v9334_v1, %s8533_s27 }
0x1daf   :  { %3975 = vrot.lane.b32.xlu1 %v9345_v9, %s8533_s27 }
0x1db4   :  { %3978 = vrot.lane.b32.xlu0 %v9332_v63, %s8533_s27 }
0x1e23   :  { %v3818_v42 = vpop.xlane.xlu1 %3817 }
0x1e24   :  { %8286 = vrcp.f32 %v3818_v42 }
0x1e27   :  { %v3927_v31 = vpop.permute.xlu1 %3926 }
0x1e28   :  { %v3932_v46 = vsel %vm669_vm6, %v3927_v31, 0 }
0x1e29   :  { %7635 = vmatpush3.bf16.xpose.msra.mxu0 %v3932_v46 }
0x1e2a   :  { %7646 = vmatprep.subr.bf16.mxu0 %v8531_v24 }
0x1e2b   :  { %v3821_v32 = vpop.xlane.xlu0 %3820  ;;  %v3924_v52 = vpop.permute.xlu1 %3923 }
0x1e2c   :  { %8288 = vrcp.f32 %v3821_v32 }
0x1e2e   :  { %v8287_v49 = vpop.eup %8286 }
0x1e2f   :  { %v3823_v48 = vmul.f32 %v8287_v49, %v8283_v62  ;;  %v3979_v53 = vpop.permute.xlu0 %3978  ;;  %v3976_v40 = vpop.permute.xlu1 %3975 }
0x1e30   :  { %7637 = vmatmul.mubr.msk.bf16.vlgmr.msra.gmra.mrb[80].mxu0 %vm669_vm6, %v3924_v52  ;;  %v3984_v47 = vsel %vm669_vm6, %v3979_v53, 0 }
0x1e31   :  { %v3826_v8 = vpack.c.bf16 %v3823_v48, %v3823_v48  ;;  %7648 = vmatprep.mubr.msk.bf16.mxu0 %vm8532_vm5, %v8531_v24 }
0x1e33   :  { %7625 = vmatmul.mubr.msk.bf16.vlgmr.msra.gmra.mrb[96].mxu1 %vm778_vm8, %v3826_v8 }
0x1e34   :  { %7629 = vmatpush3.bf16.msra.mxu1 %v3878_v14  ;;  %7630 = vmatprep.mubr.msk.bf16.mxu1 %vm8532_vm5, %v8531_v24 }
0x1e35   :  { %7640 = vmatprep.subr.bf16.mxu1 %v8531_v24 }
0x1e36   :  { %v8289_v28 = vpop.eup %8288 }
0x1e37   :  { %v3825_v44 = vmul.f32 %v8289_v28, %v8285_v41 }
0x1e39   :  { %v3827_v38 = vpack.c.bf16 %v3825_v44, %v3825_v44 }
0x1e3b   :  { %7631 = vmatmul.mubr.msk.bf16.vlgmr.msra.gmra.mrb[100].mxu1 %vm778_vm8, %v3827_v38 }
0x1e3c   :  { %7642 = vmatprep.mubr.msk.bf16.mxu1 %vm8532_vm5, %v8531_v24 }
0x1e3d   :  { %7641 = vmatpush3.bf16.xpose.msra.mxu1 %v3984_v47 }
0x1e3e   :  { %7652 = vmatprep.subr.bf16.mxu1 %v8531_v24 }
0x1e44   :  { %7643 = vmatmul.mubr.msk.bf16.vlgmr.msra.gmra.mrb[104].mxu1 %vm669_vm6, %v3976_v40 }
0x1e45   :  { %7654 = vmatprep.mubr.msk.bf16.mxu1 %vm8532_vm5, %v8531_v24 }
0x1f03   :  { %v3968_v57 = vpop.f32.mrb[80].mxu0 }
0x1f04   :  { %v4026_v58 = vmul.f32 0.25, %v3968_v57  ;;  %v7638_v59 = vpop.f32.mrb[81].mxu0 }
0x1f05   :  { %v3971_v2 = vpop.f32.mrb[82].mxu0 }
0x1f06   :  { %v4028_v4 = vadd.f32 %v4026_v58, %v8866_v7  ;;  %v3868_v5 = vpop.f32.mrb[96].mxu1  ;;  %v7639_v10 = vpop.f32.mrb[83].mxu0 }
0x1f07   :  { %3920 = vst.msk [vmem:[#allocation2] sm:$0xff] %vm669_vm6, %v3868_v5  ;;  %v7626_v11 = vpop.f32.mrb[97].mxu1 }
0x1f08   :  { %v3871_v12 = vpop.f32.mrb[98].mxu1  ;;  %v4030_v17 = vsel %vm778_vm8, %v4028_v4, -inf }
0x1f09   :  { %4031 = vmax.xlane.f32.xlu0 %v4030_v17  ;;  %v7627_v18 = vpop.f32.mrb[99].mxu1 }
0x1f0e   :  { %v3914_v19 = vpop.f32.mrb[100].mxu1 }
0x1f0f   :  { %3921 = vst.msk [vmem:[#allocation2 + $0x8] sm:$0xff] %vm669_vm6, %v3914_v19  ;;  %v7632_v22 = vpop.f32.mrb[101].mxu1 }
0x1f10   :  { %v3917_v25 = vpop.f32.mrb[102].mxu1 }
0x1f11   :  { %v7633_v26 = vpop.f32.mrb[103].mxu1 }
0x1f17   :  { %v4020_v27 = vpop.f32.mrb[104].mxu1 }
0x1f18   :  { %v4027_v29 = vmul.f32 0.25, %v4020_v27  ;;  %v7644_v60 = vpop.f32.mrb[105].mxu1 }
0x1f19   :  { %v4023_v51 = vpop.f32.mrb[106].mxu1 }
0x1f1a   :  { %v4029_v3 = vadd.f32 %v4027_v29, %v8871_v16  ;;  %v7645_v55 = vpop.f32.mrb[107].mxu1 }
0x1f1c   :  { %v4033_v15 = vsel %vm778_vm8, %v4029_v3, -inf }
0x1f1d   :  { %4034 = vmax.xlane.f32.xlu1 %v4033_v15 }
0x1f2e   :  { %4055 = vrot.lane.b32.xlu1 %v9343_v6, %s8533_s27 }
0x1f32   :  { %4164 = vrot.lane.b32.xlu1 %v9327_v54, %s8534_s28 }
0x1f36   :  { %4214 = vrot.lane.b32.xlu1 %v9332_v63, %s8534_s28 }
0x1f3a   :  { %4212 = vrot.lane.b32.xlu1 %v9345_v9, %s8534_s28 }
0x1f96   :  { %v4032_v61 = vpop.xlane.xlu0 %4031 }
0x1f97   :  { %v4036_v23 = vsub.f32 %v4028_v4, %v4032_v61 }
0x1f99   :  { %v4038_v30 = vmul.f32 1.442695, %v4036_v23 }
0x1f9b   :  { %8290 = vpow2.f32 %v4038_v30 }
0x1fa5   :  { %v8291_v33 = vpop.eup %8290 }
0x1fa6   :  { %v4042_v45 = vsel %vm778_vm8, %v8291_v33, 0.0 }
0x1fa7   :  { %4043 = vadd.xlane.f32.xlu0 %v4042_v45 }
0x1faa   :  { %v4035_v62 = vpop.xlane.xlu1 %4034 }
0x1fab   :  { %v4037_v36 = vsub.f32 %v4029_v3, %v4035_v62 }
0x1fad   :  { %v4040_v41 = vmul.f32 1.442695, %v4037_v36 }
0x1fae   :  { %v4056_v20 = vpop.permute.xlu1 %4055 }
0x1faf   :  { %8292 = vpow2.f32 %v4040_v41  ;;  %v4061_v42 = vsel %vm806_vm7, %v4056_v20, 0 }
0x1fb0   :  { %7647 = vmatpush3.bf16.msra.mxu0 %v4061_v42 }
0x1fb1   :  { %7658 = vmatprep.subr.bf16.mxu0 %v8531_v24 }
0x1fb2   :  { %v4165_v52 = vpop.permute.xlu1 %4164 }
0x1fb3   :  { %v4170_v14 = vsel %vm669_vm6, %v4165_v52, 0 }
0x1fb6   :  { %v4215_v57 = vpop.permute.xlu1 %4214 }
0x1fb7   :  { %v4220_v59 = vsel %vm669_vm6, %v4215_v57, 0 }
0x1fb9   :  { %v8293_v31 = vpop.eup %8292 }
0x1fba   :  { %v4045_v46 = vsel %vm778_vm8, %v8293_v31, 0.0  ;;  %v4213_v2 = vpop.permute.xlu1 %4212 }
0x1fbb   :  { %4046 = vadd.xlane.f32.xlu0 %v4045_v46 }
0x1fd1   :  { %4104 = vrot.lane.b32.xlu0 %v9372_v50, %s8533_s27 }
0x1fd5   :  { %4162 = vrot.lane.b32.xlu0 %v9334_v1, %s8534_s28 }
0x2034   :  { %v4044_v32 = vpop.xlane.xlu0 %4043 }
0x2035   :  { %8294 = vrcp.f32 %v4044_v32 }
0x203f   :  { %v8295_v49 = vpop.eup %8294 }
0x2040   :  { %v4049_v48 = vmul.f32 %v8295_v49, %v8291_v33 }
0x2042   :  { %v4052_v8 = vpack.c.bf16 %v4049_v48, %v4049_v48 }
0x2044   :  { %7649 = vmatmul.mubr.msk.bf16.vlgmr.msra.gmra.mrb[84].mxu0 %vm778_vm8, %v4052_v8 }
0x2045   :  { %7659 = vmatpush3.bf16.xpose.msra.mxu0 %v4170_v14  ;;  %7660 = vmatprep.mubr.msk.bf16.mxu0 %vm8532_vm5, %v8531_v24 }
0x2046   :  { %7670 = vmatprep.subr.bf16.mxu0 %v8531_v24 }
0x2048   :  { %v4047_v28 = vpop.xlane.xlu0 %4046 }
0x2049   :  { %8296 = vrcp.f32 %v4047_v28 }
0x204c   :  { %v4105_v44 = vpop.permute.xlu0 %4104 }
0x204d   :  { %v4110_v53 = vsel %vm806_vm7, %v4105_v44, 0 }
0x204e   :  { %7653 = vmatpush3.bf16.msra.mxu1 %v4110_v53 }
0x204f   :  { %7664 = vmatprep.subr.bf16.mxu1 %v8531_v24 }
0x2050   :  { %v4163_v38 = vpop.permute.xlu0 %4162 }
0x2051   :  { %7661 = vmatmul.mubr.msk.bf16.vlgmr.msra.gmra.mrb[88].mxu0 %vm669_vm6, %v4163_v38 }
0x2052   :  { %7672 = vmatprep.mubr.msk.bf16.mxu0 %vm8532_vm5, %v8531_v24 }
0x2053   :  { %v8297_v47 = vpop.eup %8296 }
0x2054   :  { %v4051_v40 = vmul.f32 %v8297_v47, %v8293_v31 }
0x2056   :  { %v4053_v58 = vpack.c.bf16 %v4051_v40, %v4051_v40 }
0x2058   :  { %7655 = vmatmul.mubr.msk.bf16.vlgmr.msra.gmra.mrb[108].mxu1 %vm778_vm8, %v4053_v58 }
0x2059   :  { %7665 = vmatpush3.bf16.xpose.msra.mxu1 %v4220_v59  ;;  %7666 = vmatprep.mubr.msk.bf16.mxu1 %vm8532_vm5, %v8531_v24 }
0x205a   :  { %7676 = vmatprep.subr.bf16.mxu1 %v8531_v24 }
0x2060   :  { %7667 = vmatmul.mubr.msk.bf16.vlgmr.msra.gmra.mrb[112].mxu1 %vm669_vm6, %v4213_v2 }
0x2061   :  { %7678 = vmatprep.mubr.msk.bf16.mxu1 %vm8532_vm5, %v8531_v24 }
0x2117   :  { %v9431_v4 = vpop.f32.mrb[84].mxu0 }
0x2118   :  { %v7650_v5 = vpop.f32.mrb[85].mxu0 }
0x2119   :  { %v4100_v10 = vpop.f32.mrb[86].mxu0 }
0x211a   :  { %v7651_v11 = vpop.f32.mrb[87].mxu0 }
0x2124   :  { %v4206_v12 = vpop.f32.mrb[88].mxu0 }
0x2125   :  { %v4262_v17 = vmul.f32 0.25, %v4206_v12  ;;  %v7662_v18 = vpop.f32.mrb[89].mxu0 }
0x2126   :  { %v4209_v19 = vpop.f32.mrb[90].mxu0 }
0x2127   :  { %v4264_v22 = vadd.f32 %v4262_v17, %v8866_v7  ;;  %v7663_v25 = vpop.f32.mrb[91].mxu0 }
0x2129   :  { %v4266_v26 = vsel %vm778_vm8, %v4264_v22, -inf }
0x212a   :  { %4267 = vmax.xlane.f32.xlu0 %v4266_v26 }
0x212b   :  { %v9435_v27 = vpop.f32.mrb[108].mxu1 }
0x212c   :  { %v7656_v29 = vpop.f32.mrb[109].mxu1 }
0x212d   :  { %v4149_v60 = vpop.f32.mrb[110].mxu1 }
0x212e   :  { %v7657_v51 = vpop.f32.mrb[111].mxu1 }
0x2133   :  { %v4256_v3 = vpop.f32.mrb[112].mxu1 }
0x2134   :  { %v4263_v55 = vmul.f32 0.25, %v4256_v3  ;;  %v7668_v15 = vpop.f32.mrb[113].mxu1 }
0x2135   :  { %v4259_v61 = vpop.f32.mrb[114].mxu1 }
0x2136   :  { %v4265_v23 = vadd.f32 %v4263_v55, %v8871_v16  ;;  %v7669_v30 = vpop.f32.mrb[115].mxu1 }
0x2138   :  { %v4269_v33 = vsel %vm778_vm8, %v4265_v23, -inf }
0x2139   :  { %4270 = vmax.xlane.f32.xlu1 %v4269_v33 }
0x214a   :  { %4290 = vrot.lane.b32.xlu1 %v9343_v6, %s8534_s28 }
0x214e   :  { %4398 = vrot.lane.b32.xlu1 %v9327_v54, %s8535_s2 }
0x2152   :  { %4448 = vrot.lane.b32.xlu1 %v9332_v63, %s8535_s2 }
0x2156   :  { %4446 = vrot.lane.b32.xlu1 %v9345_v9, %s8535_s2 }
0x21b7   :  { %v4268_v45 = vpop.xlane.xlu0 %4267 }
0x21b8   :  { %v4272_v62 = vsub.f32 %v4264_v22, %v4268_v45 }
0x21ba   :  { %v4274_v36 = vmul.f32 1.442695, %v4272_v62 }
0x21bc   :  { %8298 = vpow2.f32 %v4274_v36 }
0x21c6   :  { %v8299_v41 = vpop.eup %8298  ;;  %v4271_v20 = vpop.xlane.xlu1 %4270 }
0x21c7   :  { %v4273_v42 = vsub.f32 %v4265_v23, %v4271_v20  ;;  %v4278_v31 = vsel %vm778_vm8, %v8299_v41, 0.0 }
0x21c8   :  { %4279 = vadd.xlane.f32.xlu0 %v4278_v31 }
0x21c9   :  { %v4276_v46 = vmul.f32 1.442695, %v4273_v42 }
0x21ca   :  { %v4291_v32 = vpop.permute.xlu1 %4290 }
0x21cb   :  { %8300 = vpow2.f32 %v4276_v46  ;;  %v4296_v49 = vsel %vm806_vm7, %v4291_v32, 0 }
0x21cc   :  { %7671 = vmatpush3.bf16.msra.mxu0 %v4296_v49 }
0x21cd   :  { %7682 = vmatprep.subr.bf16.mxu0 %v8531_v24 }
0x21ce   :  { %v4399_v44 = vpop.permute.xlu1 %4398 }
0x21cf   :  { %v4404_v47 = vsel %vm669_vm6, %v4399_v44, 0 }
0x21d2   :  { %v4449_v5 = vpop.permute.xlu1 %4448 }
0x21d3   :  { %v4454_v11 = vsel %vm669_vm6, %v4449_v5, 0 }
0x21d5   :  { %v8301_v48 = vpop.eup %8300 }
0x21d6   :  { %v4281_v52 = vsel %vm778_vm8, %v8301_v48, 0.0  ;;  %v4447_v12 = vpop.permute.xlu1 %4446 }
0x21d7   :  { %4282 = vadd.xlane.f32.xlu0 %v4281_v52 }
0x21ed   :  { %4338 = vrot.lane.b32.xlu0 %v9372_v50, %s8534_s28 }
0x21f1   :  { %4396 = vrot.lane.b32.xlu0 %v9334_v1, %s8535_s2 }
0x2255   :  { %v4280_v8 = vpop.xlane.xlu0 %4279 }
0x2256   :  { %8302 = vrcp.f32 %v4280_v8 }
0x2260   :  { %v8303_v14 = vpop.eup %8302 }
0x2261   :  { %v4285_v28 = vmul.f32 %v8303_v14, %v8299_v41 }
0x2263   :  { %v4288_v53 = vpack.c.bf16 %v4285_v28, %v4285_v28 }
0x2264   :  { %v4283_v38 = vpop.xlane.xlu0 %4282 }
0x2265   :  { %8304 = vrcp.f32 %v4283_v38  ;;  %7673 = vmatmul.mubr.msk.bf16.vlgmr.msra.gmra.mrb[92].mxu0 %vm778_vm8, %v4288_v53 }
0x2266   :  { %7683 = vmatpush3.bf16.xpose.msra.mxu0 %v4404_v47  ;;  %7684 = vmatprep.mubr.msk.bf16.mxu0 %vm8532_vm5, %v8531_v24 }
0x2267   :  { %7694 = vmatprep.subr.bf16.mxu0 %v8531_v24 }
0x2268   :  { %v4339_v40 = vpop.permute.xlu0 %4338 }
0x2269   :  { %v4344_v57 = vsel %vm806_vm7, %v4339_v40, 0 }
0x226a   :  { %7677 = vmatpush3.bf16.msra.mxu1 %v4344_v57 }
0x226b   :  { %7688 = vmatprep.subr.bf16.mxu1 %v8531_v24 }
0x226c   :  { %v4397_v58 = vpop.permute.xlu0 %4396 }
0x226d   :  { %7685 = vmatmul.mubr.msk.bf16.vlgmr.msra.gmra.mrb[96].mxu0 %vm669_vm6, %v4397_v58 }
0x226e   :  { %7696 = vmatprep.mubr.msk.bf16.mxu0 %vm8532_vm5, %v8531_v24 }
0x226f   :  { %v8305_v59 = vpop.eup %8304 }
0x2270   :  { %v4287_v2 = vmul.f32 %v8305_v59, %v8301_v48 }
0x2272   :  { %v4289_v10 = vpack.c.bf16 %v4287_v2, %v4287_v2 }
0x2274   :  { %7679 = vmatmul.mubr.msk.bf16.vlgmr.msra.gmra.mrb[116].mxu1 %vm778_vm8, %v4289_v10 }
0x2275   :  { %7689 = vmatpush3.bf16.xpose.msra.mxu1 %v4454_v11  ;;  %7690 = vmatprep.mubr.msk.bf16.mxu1 %vm8532_vm5, %v8531_v24 }
0x2276   :  { %7700 = vmatprep.subr.bf16.mxu1 %v8531_v24 }
0x227c   :  { %7691 = vmatmul.mubr.msk.bf16.vlgmr.msra.gmra.mrb[120].mxu1 %vm669_vm6, %v4447_v12 }
0x227d   :  { %7702 = vmatprep.mubr.msk.bf16.mxu1 %vm8532_vm5, %v8531_v24 }
0x2338   :  { %v9473_v17 = vpop.f32.mrb[92].mxu0 }
0x2339   :  { %v7674_v18 = vpop.f32.mrb[93].mxu0 }
0x233a   :  { %v4335_v19 = vpop.f32.mrb[94].mxu0 }
0x233b   :  { %v7675_v22 = vpop.f32.mrb[95].mxu0 }
0x2340   :  { %v4440_v25 = vpop.f32.mrb[96].mxu0 }
0x2341   :  { %v4496_v26 = vmul.f32 0.25, %v4440_v25  ;;  %v7686_v29 = vpop.f32.mrb[97].mxu0 }
0x2342   :  { %v4443_v60 = vpop.f32.mrb[98].mxu0 }
0x2343   :  { %v4498_v51 = vadd.f32 %v4496_v26, %v8866_v7  ;;  %v7687_v3 = vpop.f32.mrb[99].mxu0 }
0x2345   :  { %v4500_v55 = vsel %vm778_vm8, %v4498_v51, -inf }
0x2346   :  { %4501 = vmax.xlane.f32.xlu0 %v4500_v55 }
0x2347   :  { %v9477_v15 = vpop.f32.mrb[116].mxu1 }
0x2348   :  { %v7680_v61 = vpop.f32.mrb[117].mxu1 }
0x2349   :  { %v4383_v23 = vpop.f32.mrb[118].mxu1 }
0x234a   :  { %v7681_v30 = vpop.f32.mrb[119].mxu1 }
0x234f   :  { %v4490_v33 = vpop.f32.mrb[120].mxu1 }
0x2350   :  { %v4497_v45 = vmul.f32 0.25, %v4490_v33  ;;  %v7692_v62 = vpop.f32.mrb[121].mxu1 }
0x2351   :  { %v4493_v36 = vpop.f32.mrb[122].mxu1 }
0x2352   :  { %v4499_v41 = vadd.f32 %v4497_v45, %v8871_v16  ;;  %v7693_v20 = vpop.f32.mrb[123].mxu1 }
0x2354   :  { %v4503_v42 = vsel %vm778_vm8, %v4499_v41, -inf }
0x2355   :  { %4504 = vmax.xlane.f32.xlu1 %v4503_v42 }
0x2366   :  { %4524 = vrot.lane.b32.xlu1 %v9343_v6, %s8535_s2 }
0x236a   :  { %4632 = vrot.lane.b32.xlu1 %v9327_v54, %s8528_s15 }
0x236e   :  { %4682 = vrot.lane.b32.xlu1 %v9332_v63, %s8528_s15 }
0x2372   :  { %4680 = vrot.lane.b32.xlu1 %v9345_v9, %s8528_s15 }
0x23d3   :  { %v4502_v31 = vpop.xlane.xlu0 %4501 }
0x23d4   :  { %v4506_v46 = vsub.f32 %v4498_v51, %v4502_v31 }
0x23d6   :  { %v4508_v32 = vmul.f32 1.442695, %v4506_v46 }
0x23d8   :  { %8306 = vpow2.f32 %v4508_v32 }
0x23e2   :  { %v8307_v49 = vpop.eup %8306  ;;  %v4505_v48 = vpop.xlane.xlu1 %4504 }
0x23e3   :  { %v4507_v52 = vsub.f32 %v4499_v41, %v4505_v48  ;;  %v4512_v8 = vsel %vm778_vm8, %v8307_v49, 0.0 }
0x23e4   :  { %4513 = vadd.xlane.f32.xlu0 %v4512_v8 }
0x23e5   :  { %v4510_v14 = vmul.f32 1.442695, %v4507_v52 }
0x23e6   :  { %v4525_v28 = vpop.permute.xlu1 %4524 }
0x23e7   :  { %8308 = vpow2.f32 %v4510_v14  ;;  %v4530_v44 = vsel %vm806_vm7, %v4525_v28, 0 }
0x23e8   :  { %7695 = vmatpush3.bf16.msra.mxu0 %v4530_v44 }
0x23e9   :  { %7706 = vmatprep.subr.bf16.mxu0 %v8531_v24 }
0x23ea   :  { %v4633_v58 = vpop.permute.xlu1 %4632 }
0x23eb   :  { %v4638_v5 = vsel %vm669_vm6, %v4633_v58, 0 }
0x23ee   :  { %v4683_v22 = vpop.permute.xlu1 %4682 }
0x23ef   :  { %v4688_v26 = vsel %vm669_vm6, %v4683_v22, 0 }
0x23f1   :  { %v8309_v53 = vpop.eup %8308 }
0x23f2   :  { %v4515_v38 = vsel %vm778_vm8, %v8309_v53, 0.0  ;;  %v4681_v29 = vpop.permute.xlu1 %4680 }
0x23f3   :  { %4516 = vadd.xlane.f32.xlu0 %v4515_v38 }
0x2409   :  { %4572 = vrot.lane.b32.xlu0 %v9372_v50, %s8535_s2 }
0x240d   :  { %4630 = vrot.lane.b32.xlu0 %v9334_v1, %s8528_s15 }
0x2471   :  { %v4514_v47 = vpop.xlane.xlu0 %4513 }
0x2472   :  { %8310 = vrcp.f32 %v4514_v47 }
0x247c   :  { %v8311_v40 = vpop.eup %8310 }
0x247d   :  { %v4519_v57 = vmul.f32 %v8311_v40, %v8307_v49 }
0x247f   :  { %v4522_v59 = vpack.c.bf16 %v4519_v57, %v4519_v57 }
0x2480   :  { %v4517_v2 = vpop.xlane.xlu0 %4516 }
0x2481   :  { %8312 = vrcp.f32 %v4517_v2  ;;  %7697 = vmatmul.mubr.msk.bf16.vlgmr.msra.gmra.mrb[100].mxu0 %vm778_vm8, %v4522_v59 }
0x2482   :  { %7707 = vmatpush3.bf16.xpose.msra.mxu0 %v4638_v5  ;;  %7708 = vmatprep.mubr.msk.bf16.mxu0 %vm8532_vm5, %v8531_v24 }
0x2483   :  { %7718 = vmatprep.subr.bf16.mxu0 %v8531_v24 }
0x2484   :  { %v4573_v10 = vpop.permute.xlu0 %4572 }
0x2485   :  { %v4578_v11 = vsel %vm806_vm7, %v4573_v10, 0 }
0x2486   :  { %7701 = vmatpush3.bf16.msra.mxu1 %v4578_v11 }
0x2487   :  { %7712 = vmatprep.subr.bf16.mxu1 %v8531_v24 }
0x2488   :  { %v4631_v12 = vpop.permute.xlu0 %4630 }
0x2489   :  { %7709 = vmatmul.mubr.msk.bf16.vlgmr.msra.gmra.mrb[104].mxu0 %vm669_vm6, %v4631_v12 }
0x248a   :  { %7720 = vmatprep.mubr.msk.bf16.mxu0 %vm8532_vm5, %v8531_v24 }
0x248b   :  { %v8313_v18 = vpop.eup %8312 }
0x248c   :  { %v4521_v19 = vmul.f32 %v8313_v18, %v8309_v53 }
0x248e   :  { %v4523_v25 = vpack.c.bf16 %v4521_v19, %v4521_v19 }
0x2490   :  { %7703 = vmatmul.mubr.msk.bf16.vlgmr.msra.gmra.mrb[124].mxu1 %vm778_vm8, %v4523_v25 }
0x2491   :  { %7713 = vmatpush3.bf16.xpose.msra.mxu1 %v4688_v26  ;;  %7714 = vmatprep.mubr.msk.bf16.mxu1 %vm8532_vm5, %v8531_v24 }
0x2492   :  { %7724 = vmatprep.subr.bf16.mxu1 %v8531_v24 }
0x2498   :  { %7715 = vmatmul.mubr.msk.bf16.vlgmr.msra.gmra.mrb[128].mxu1 %vm669_vm6, %v4681_v29 }
0x2499   :  { %7726 = vmatprep.mubr.msk.bf16.mxu1 %vm8532_vm5, %v8531_v24 }
0x2554   :  { %v9515_v60 = vpop.f32.mrb[100].mxu0 }
0x2555   :  { %v7698_v51 = vpop.f32.mrb[101].mxu0 }
0x2556   :  { %v4569_v3 = vpop.f32.mrb[102].mxu0 }
0x2557   :  { %v7699_v55 = vpop.f32.mrb[103].mxu0 }
0x255c   :  { %v4674_v61 = vpop.f32.mrb[104].mxu0 }
0x255d   :  { %v4730_v23 = vmul.f32 0.25, %v4674_v61  ;;  %v7710_v30 = vpop.f32.mrb[105].mxu0 }
0x255e   :  { %v4677_v33 = vpop.f32.mrb[106].mxu0 }
0x255f   :  { %v4732_v45 = vadd.f32 %v4730_v23, %v8866_v7  ;;  %v7711_v62 = vpop.f32.mrb[107].mxu0 }
0x2561   :  { %v4734_v36 = vsel %vm778_vm8, %v4732_v45, -inf }
0x2562   :  { %4735 = vmax.xlane.f32.xlu0 %v4734_v36 }
0x2563   :  { %v9519_v41 = vpop.f32.mrb[124].mxu1 }
0x2564   :  { %v7704_v20 = vpop.f32.mrb[125].mxu1 }
0x2565   :  { %v4617_v42 = vpop.f32.mrb[126].mxu1 }
0x2566   :  { %v7705_v31 = vpop.f32.mrb[127].mxu1 }
0x256b   :  { %v4724_v46 = vpop.f32.mrb[128].mxu1 }
0x256c   :  { %v4731_v32 = vmul.f32 0.25, %v4724_v46  ;;  %v7716_v49 = vpop.f32.mrb[129].mxu1 }
0x256d   :  { %v4727_v48 = vpop.f32.mrb[130].mxu1 }
0x256e   :  { %v4733_v52 = vadd.f32 %v4731_v32, %v8871_v16  ;;  %v7717_v8 = vpop.f32.mrb[131].mxu1 }
0x2570   :  { %v4737_v14 = vsel %vm778_vm8, %v4733_v52, -inf }
0x2571   :  { %4738 = vmax.xlane.f32.xlu1 %v4737_v14 }
0x2582   :  { %4758 = vrot.lane.b32.xlu1 %v9343_v6, %s8528_s15 }
0x2586   :  { %4866 = vrot.lane.b32.xlu1 %v9327_v54, %s8536_s24 }
0x258a   :  { %4916 = vrot.lane.b32.xlu1 %v9332_v63, %s8536_s24 }
0x258e   :  { %4914 = vrot.lane.b32.xlu1 %v9345_v9, %s8536_s24 }
0x25ef   :  { %v4736_v28 = vpop.xlane.xlu0 %4735 }
0x25f0   :  { %v4740_v44 = vsub.f32 %v4732_v45, %v4736_v28 }
0x25f2   :  { %v4742_v53 = vmul.f32 1.442695, %v4740_v44 }
0x25f4   :  { %8314 = vpow2.f32 %v4742_v53 }
0x25fe   :  { %v8315_v38 = vpop.eup %8314  ;;  %v4739_v47 = vpop.xlane.xlu1 %4738 }
0x25ff   :  { %v4741_v40 = vsub.f32 %v4733_v52, %v4739_v47  ;;  %v4746_v57 = vsel %vm778_vm8, %v8315_v38, 0.0 }
0x2600   :  { %4747 = vadd.xlane.f32.xlu0 %v4746_v57 }
0x2601   :  { %v4744_v58 = vmul.f32 1.442695, %v4741_v40 }
0x2602   :  { %v4759_v59 = vpop.permute.xlu1 %4758 }
0x2603   :  { %8316 = vpow2.f32 %v4744_v58  ;;  %v4764_v2 = vsel %vm806_vm7, %v4759_v59, 0 }
0x2604   :  { %7719 = vmatpush3.bf16.msra.mxu0 %v4764_v2 }
0x2605   :  { %7730 = vmatprep.subr.bf16.mxu0 %v8531_v24 }
0x2606   :  { %v4867_v19 = vpop.permute.xlu1 %4866 }
0x2607   :  { %v4872_v26 = vsel %vm669_vm6, %v4867_v19, 0 }
0x260a   :  { %v4917_v23 = vpop.permute.xlu1 %4916 }
0x260b   :  { %v4922_v33 = vsel %vm669_vm6, %v4917_v23, 0 }
0x260d   :  { %v8317_v5 = vpop.eup %8316 }
0x260e   :  { %v4749_v10 = vsel %vm778_vm8, %v8317_v5, 0.0  ;;  %v4915_v45 = vpop.permute.xlu1 %4914 }
0x260f   :  { %4750 = vadd.xlane.f32.xlu0 %v4749_v10 }
0x2625   :  { %4806 = vrot.lane.b32.xlu0 %v9372_v50, %s8528_s15 }
0x2629   :  { %4864 = vrot.lane.b32.xlu0 %v9334_v1, %s8536_s24 }
0x268d   :  { %v4748_v11 = vpop.xlane.xlu0 %4747 }
0x268e   :  { %8318 = vrcp.f32 %v4748_v11 }
0x2698   :  { %v8319_v12 = vpop.eup %8318 }
0x2699   :  { %v4753_v18 = vmul.f32 %v8319_v12, %v8315_v38 }
0x269b   :  { %v4756_v22 = vpack.c.bf16 %v4753_v18, %v4753_v18 }
0x269c   :  { %v4751_v25 = vpop.xlane.xlu0 %4750 }
0x269d   :  { %8320 = vrcp.f32 %v4751_v25  ;;  %7721 = vmatmul.mubr.msk.bf16.vlgmr.msra.gmra.mrb[108].mxu0 %vm778_vm8, %v4756_v22 }
0x269e   :  { %7731 = vmatpush3.bf16.xpose.msra.mxu0 %v4872_v26  ;;  %7732 = vmatprep.mubr.msk.bf16.mxu0 %vm8532_vm5, %v8531_v24 }
0x269f   :  { %7742 = vmatprep.subr.bf16.mxu0 %v8531_v24 }
0x26a0   :  { %v4807_v29 = vpop.permute.xlu0 %4806 }
0x26a1   :  { %v4812_v51 = vsel %vm806_vm7, %v4807_v29, 0 }
0x26a2   :  { %7725 = vmatpush3.bf16.msra.mxu1 %v4812_v51 }
0x26a3   :  { %7736 = vmatprep.subr.bf16.mxu1 %v8531_v24 }
0x26a4   :  { %v4865_v3 = vpop.permute.xlu0 %4864 }
0x26a5   :  { %7733 = vmatmul.mubr.msk.bf16.vlgmr.msra.gmra.mrb[112].mxu0 %vm669_vm6, %v4865_v3 }
0x26a6   :  { %7744 = vmatprep.mubr.msk.bf16.mxu0 %vm8532_vm5, %v8531_v24 }
0x26a7   :  { %v8321_v55 = vpop.eup %8320 }
0x26a8   :  { %v4755_v61 = vmul.f32 %v8321_v55, %v8317_v5 }
0x26aa   :  { %v4757_v30 = vpack.c.bf16 %v4755_v61, %v4755_v61 }
0x26ac   :  { %7727 = vmatmul.mubr.msk.bf16.vlgmr.msra.gmra.mrb[132].mxu1 %vm778_vm8, %v4757_v30 }
0x26ad   :  { %7737 = vmatpush3.bf16.xpose.msra.mxu1 %v4922_v33  ;;  %7738 = vmatprep.mubr.msk.bf16.mxu1 %vm8532_vm5, %v8531_v24 }
0x26ae   :  { %7748 = vmatprep.subr.bf16.mxu1 %v8531_v24 }
0x26b4   :  { %7739 = vmatmul.mubr.msk.bf16.vlgmr.msra.gmra.mrb[136].mxu1 %vm669_vm6, %v4915_v45 }
0x26b5   :  { %7750 = vmatprep.mubr.msk.bf16.mxu1 %vm8532_vm5, %v8531_v24 }
0x2770   :  { %v9557_v62 = vpop.f32.mrb[108].mxu0 }
0x2771   :  { %v7722_v36 = vpop.f32.mrb[109].mxu0 }
0x2772   :  { %v4803_v20 = vpop.f32.mrb[110].mxu0 }
0x2773   :  { %v7723_v42 = vpop.f32.mrb[111].mxu0 }
0x2778   :  { %v4908_v31 = vpop.f32.mrb[112].mxu0 }
0x2779   :  { %v4964_v46 = vmul.f32 0.25, %v4908_v31  ;;  %v7734_v32 = vpop.f32.mrb[113].mxu0 }
0x277a   :  { %v4911_v49 = vpop.f32.mrb[114].mxu0 }
0x277b   :  { %v4966_v48 = vadd.f32 %v4964_v46, %v8866_v7  ;;  %v7735_v52 = vpop.f32.mrb[115].mxu0 }
0x277d   :  { %v4968_v8 = vsel %vm778_vm8, %v4966_v48, -inf }
0x277e   :  { %4969 = vmax.xlane.f32.xlu0 %v4968_v8 }
0x277f   :  { %v9561_v14 = vpop.f32.mrb[132].mxu1 }
0x2780   :  { %v7728_v28 = vpop.f32.mrb[133].mxu1 }
0x2781   :  { %v4851_v44 = vpop.f32.mrb[134].mxu1 }
0x2782   :  { %v7729_v53 = vpop.f32.mrb[135].mxu1 }
0x2787   :  { %v4958_v38 = vpop.f32.mrb[136].mxu1 }
0x2788   :  { %v4965_v47 = vmul.f32 0.25, %v4958_v38  ;;  %v7740_v40 = vpop.f32.mrb[137].mxu1 }
0x2789   :  { %v4961_v57 = vpop.f32.mrb[138].mxu1 }
0x278a   :  { %v4967_v58 = vadd.f32 %v4965_v47, %v8871_v16  ;;  %v7741_v59 = vpop.f32.mrb[139].mxu1 }
0x278c   :  { %v4971_v2 = vsel %vm778_vm8, %v4967_v58, -inf }
0x278d   :  { %4972 = vmax.xlane.f32.xlu1 %v4971_v2 }
0x279e   :  { %4992 = vrot.lane.b32.xlu1 %v9343_v6, %s8536_s24 }
0x27a2   :  { %5100 = vrot.lane.b32.xlu1 %v9327_v54, %s8537_s29 }
0x27a6   :  { %5150 = vrot.lane.b32.xlu1 %v9332_v63, %s8537_s29 }
0x27aa   :  { %5148 = vrot.lane.b32.xlu1 %v9345_v9, %s8537_s29 }
0x280b   :  { %v4970_v5 = vpop.xlane.xlu0 %4969 }
0x280c   :  { %v4974_v10 = vsub.f32 %v4966_v48, %v4970_v5 }
0x280e   :  { %v4976_v11 = vmul.f32 1.442695, %v4974_v10 }
0x2810   :  { %8322 = vpow2.f32 %v4976_v11 }
0x281a   :  { %v8323_v12 = vpop.eup %8322  ;;  %v4973_v18 = vpop.xlane.xlu1 %4972 }
0x281b   :  { %v4975_v19 = vsub.f32 %v4967_v58, %v4973_v18  ;;  %v4980_v22 = vsel %vm778_vm8, %v8323_v12, 0.0 }
0x281c   :  { %4981 = vadd.xlane.f32.xlu0 %v4980_v22 }
0x281d   :  { %v4978_v25 = vmul.f32 1.442695, %v4975_v19 }
0x281e   :  { %v4993_v26 = vpop.permute.xlu1 %4992 }
0x281f   :  { %8324 = vpow2.f32 %v4978_v25  ;;  %v4998_v29 = vsel %vm806_vm7, %v4993_v26, 0 }
0x2820   :  { %7743 = vmatpush3.bf16.msra.mxu0 %v4998_v29 }
0x2821   :  { %7754 = vmatprep.subr.bf16.mxu0 %v8531_v24 }
0x2822   :  { %v5101_v30 = vpop.permute.xlu1 %5100 }
0x2823   :  { %v5106_v36 = vsel %vm669_vm6, %v5101_v30, 0 }
0x2826   :  { %v5151_v49 = vpop.permute.xlu1 %5150 }
0x2827   :  { %v5156_v52 = vsel %vm669_vm6, %v5151_v49, 0 }
0x2829   :  { %v8325_v51 = vpop.eup %8324 }
0x282a   :  { %v4983_v3 = vsel %vm778_vm8, %v8325_v51, 0.0  ;;  %v5149_v8 = vpop.permute.xlu1 %5148 }
0x282b   :  { %4984 = vadd.xlane.f32.xlu0 %v4983_v3 }
0x2841   :  { %5040 = vrot.lane.b32.xlu0 %v9372_v50, %s8536_s24 }
0x2845   :  { %5098 = vrot.lane.b32.xlu0 %v9334_v1, %s8537_s29 }
0x28a9   :  { %v4982_v55 = vpop.xlane.xlu0 %4981 }
0x28aa   :  { %8326 = vrcp.f32 %v4982_v55 }
0x28b4   :  { %v8327_v61 = vpop.eup %8326 }
0x28b5   :  { %v4987_v23 = vmul.f32 %v8327_v61, %v8323_v12 }
0x28b7   :  { %v4990_v33 = vpack.c.bf16 %v4987_v23, %v4987_v23 }
0x28b8   :  { %v4985_v45 = vpop.xlane.xlu0 %4984 }
0x28b9   :  { %8328 = vrcp.f32 %v4985_v45  ;;  %7745 = vmatmul.mubr.msk.bf16.vlgmr.msra.gmra.mrb[116].mxu0 %vm778_vm8, %v4990_v33 }
0x28ba   :  { %7755 = vmatpush3.bf16.xpose.msra.mxu0 %v5106_v36  ;;  %7756 = vmatprep.mubr.msk.bf16.mxu0 %vm8532_vm5, %v8531_v24 }
0x28bb   :  { %7766 = vmatprep.subr.bf16.mxu0 %v8531_v24 }
0x28bc   :  { %v5041_v20 = vpop.permute.xlu0 %5040 }
0x28bd   :  { %v5046_v42 = vsel %vm806_vm7, %v5041_v20, 0 }
0x28be   :  { %7749 = vmatpush3.bf16.msra.mxu1 %v5046_v42 }
0x28bf   :  { %7760 = vmatprep.subr.bf16.mxu1 %v8531_v24 }
0x28c0   :  { %v5099_v31 = vpop.permute.xlu0 %5098 }
0x28c1   :  { %7757 = vmatmul.mubr.msk.bf16.vlgmr.msra.gmra.mrb[120].mxu0 %vm669_vm6, %v5099_v31 }
0x28c2   :  { %7768 = vmatprep.mubr.msk.bf16.mxu0 %vm8532_vm5, %v8531_v24 }
0x28c3   :  { %v8329_v46 = vpop.eup %8328 }
0x28c4   :  { %v4989_v32 = vmul.f32 %v8329_v46, %v8325_v51 }
0x28c6   :  { %v4991_v48 = vpack.c.bf16 %v4989_v32, %v4989_v32 }
0x28c8   :  { %7751 = vmatmul.mubr.msk.bf16.vlgmr.msra.gmra.mrb[140].mxu1 %vm778_vm8, %v4991_v48 }
0x28c9   :  { %7761 = vmatpush3.bf16.xpose.msra.mxu1 %v5156_v52  ;;  %7762 = vmatprep.mubr.msk.bf16.mxu1 %vm8532_vm5, %v8531_v24 }
0x28ca   :  { %7772 = vmatprep.subr.bf16.mxu1 %v8531_v24 }
0x28d0   :  { %7763 = vmatmul.mubr.msk.bf16.vlgmr.msra.gmra.mrb[144].mxu1 %vm669_vm6, %v5149_v8 }
0x28d1   :  { %7774 = vmatprep.mubr.msk.bf16.mxu1 %vm8532_vm5, %v8531_v24 }
0x298c   :  { %v9599_v28 = vpop.f32.mrb[116].mxu0 }
0x298d   :  { %v7746_v44 = vpop.f32.mrb[117].mxu0 }
0x298e   :  { %v5037_v53 = vpop.f32.mrb[118].mxu0 }
0x298f   :  { %v7747_v38 = vpop.f32.mrb[119].mxu0 }
0x2994   :  { %v5142_v47 = vpop.f32.mrb[120].mxu0 }
0x2995   :  { %v5198_v40 = vmul.f32 0.25, %v5142_v47  ;;  %v7758_v57 = vpop.f32.mrb[121].mxu0 }
0x2996   :  { %v5145_v58 = vpop.f32.mrb[122].mxu0 }
0x2997   :  { %v5200_v59 = vadd.f32 %v5198_v40, %v8866_v7  ;;  %v7759_v2 = vpop.f32.mrb[123].mxu0 }
0x2999   :  { %v5202_v5 = vsel %vm778_vm8, %v5200_v59, -inf }
0x299a   :  { %5203 = vmax.xlane.f32.xlu0 %v5202_v5 }
0x299b   :  { %v9603_v10 = vpop.f32.mrb[140].mxu1 }
0x299c   :  { %v7752_v11 = vpop.f32.mrb[141].mxu1 }
0x299d   :  { %v5085_v12 = vpop.f32.mrb[142].mxu1 }
0x299e   :  { %v7753_v18 = vpop.f32.mrb[143].mxu1 }
0x29a3   :  { %v5192_v19 = vpop.f32.mrb[144].mxu1 }
0x29a4   :  { %v5199_v22 = vmul.f32 0.25, %v5192_v19  ;;  %v7764_v25 = vpop.f32.mrb[145].mxu1 }
0x29a5   :  { %v5195_v26 = vpop.f32.mrb[146].mxu1 }
0x29a6   :  { %v5201_v29 = vadd.f32 %v5199_v22, %v8871_v16  ;;  %v7765_v51 = vpop.f32.mrb[147].mxu1 }
0x29a8   :  { %v5205_v3 = vsel %vm778_vm8, %v5201_v29, -inf }
0x29a9   :  { %5206 = vmax.xlane.f32.xlu1 %v5205_v3 }
0x29ba   :  { %5226 = vrot.lane.b32.xlu1 %v9343_v6, %s8537_s29 }
0x29be   :  { %5334 = vrot.lane.b32.xlu1 %v9327_v54, %s8526_s6 }
0x29c2   :  { %5384 = vrot.lane.b32.xlu1 %v9332_v63, %s8526_s6 }
0x29c6   :  { %5382 = vrot.lane.b32.xlu1 %v9345_v9, %s8526_s6 }
0x2a27   :  { %v5204_v55 = vpop.xlane.xlu0 %5203 }
0x2a28   :  { %v5208_v61 = vsub.f32 %v5200_v59, %v5204_v55 }
0x2a2a   :  { %v5210_v23 = vmul.f32 1.442695, %v5208_v61 }
0x2a2c   :  { %8330 = vpow2.f32 %v5210_v23 }
0x2a36   :  { %v8331_v30 = vpop.eup %8330  ;;  %v5207_v33 = vpop.xlane.xlu1 %5206 }
0x2a37   :  { %v5209_v45 = vsub.f32 %v5201_v29, %v5207_v33  ;;  %v5214_v36 = vsel %vm778_vm8, %v8331_v30, 0.0 }
0x2a38   :  { %5215 = vadd.xlane.f32.xlu0 %v5214_v36 }
0x2a39   :  { %v5212_v20 = vmul.f32 1.442695, %v5209_v45 }
0x2a3a   :  { %v5227_v42 = vpop.permute.xlu1 %5226 }
0x2a3b   :  { %8332 = vpow2.f32 %v5212_v20  ;;  %v5232_v54 = vsel %vm806_vm7, %v5227_v42, 0 }
0x2a3c   :  { %7767 = vmatpush3.bf16.msra.mxu0 %v5232_v54 }
0x2a3d   :  { %7778 = vmatprep.subr.bf16.mxu0 %v8531_v24 }
0x2a3e   :  { %v5335_v49 = vpop.permute.xlu1 %5334 }
0x2a3f   :  { %v5340_v8 = vsel %vm669_vm6, %v5335_v49, 0 }
0x2a42   :  { %v5385_v40 = vpop.permute.xlu1 %5384 }
0x2a43   :  { %v5390_v58 = vsel %vm669_vm6, %v5385_v40, 0 }
0x2a45   :  { %v8333_v63 = vpop.eup %8332 }
0x2a46   :  { %v5217_v9 = vsel %vm778_vm8, %v8333_v63, 0.0  ;;  %v5383_v59 = vpop.permute.xlu1 %5382 }
0x2a47   :  { %5218 = vadd.xlane.f32.xlu0 %v5217_v9 }
0x2a5d   :  { %5274 = vrot.lane.b32.xlu0 %v9372_v50, %s8537_s29 }
0x2a61   :  { %5332 = vrot.lane.b32.xlu0 %v9334_v1, %s8526_s6 }
0x2ac5   :  { %v5216_v31 = vpop.xlane.xlu0 %5215 }
0x2ac6   :  { %8334 = vrcp.f32 %v5216_v31 }
0x2ad0   :  { %v8335_v46 = vpop.eup %8334 }
0x2ad1   :  { %v5221_v32 = vmul.f32 %v8335_v46, %v8331_v30 }
0x2ad3   :  { %v5224_v48 = vpack.c.bf16 %v5221_v32, %v5221_v32 }
0x2ad4   :  { %v5219_v52 = vpop.xlane.xlu0 %5218 }
0x2ad5   :  { %8336 = vrcp.f32 %v5219_v52  ;;  %7769 = vmatmul.mubr.msk.bf16.vlgmr.msra.gmra.mrb[124].mxu0 %vm778_vm8, %v5224_v48 }
0x2ad6   :  { %7779 = vmatpush3.bf16.xpose.msra.mxu0 %v5340_v8  ;;  %7780 = vmatprep.mubr.msk.bf16.mxu0 %vm8532_vm5, %v8531_v24 }
0x2ad7   :  { %7790 = vmatprep.subr.bf16.mxu0 %v8531_v24 }
0x2ad8   :  { %v5275_v44 = vpop.permute.xlu0 %5274 }
0x2ad9   :  { %v5280_v1 = vsel %vm806_vm7, %v5275_v44, 0 }
0x2ada   :  { %7773 = vmatpush3.bf16.msra.mxu1 %v5280_v1 }
0x2adb   :  { %7784 = vmatprep.subr.bf16.mxu1 %v8531_v24 }
0x2adc   :  { %v5333_v53 = vpop.permute.xlu0 %5332 }
0x2add   :  { %7781 = vmatmul.mubr.msk.bf16.vlgmr.msra.gmra.mrb[128].mxu0 %vm669_vm6, %v5333_v53 }
0x2ade   :  { %7792 = vmatprep.mubr.msk.bf16.mxu0 %vm8532_vm5, %v8531_v24 }
0x2adf   :  { %v8337_v38 = vpop.eup %8336 }
0x2ae0   :  { %v5223_v47 = vmul.f32 %v8337_v38, %v8333_v63 }
0x2ae2   :  { %v5225_v57 = vpack.c.bf16 %v5223_v47, %v5223_v47 }
0x2ae4   :  { %7775 = vmatmul.mubr.msk.bf16.vlgmr.msra.gmra.mrb[148].mxu1 %vm778_vm8, %v5225_v57 }
0x2ae5   :  { %7785 = vmatpush3.bf16.xpose.msra.mxu1 %v5390_v58  ;;  %7786 = vmatprep.mubr.msk.bf16.mxu1 %vm8532_vm5, %v8531_v24 }
0x2ae6   :  { %7796 = vmatprep.subr.bf16.mxu1 %v8531_v24 }
0x2aec   :  { %7787 = vmatmul.mubr.msk.bf16.vlgmr.msra.gmra.mrb[152].mxu1 %vm669_vm6, %v5383_v59 }
0x2aed   :  { %7798 = vmatprep.mubr.msk.bf16.mxu1 %vm8532_vm5, %v8531_v24 }
0x2ba8   :  { %v9641_v2 = vpop.f32.mrb[124].mxu0 }
0x2ba9   :  { %v7770_v5 = vpop.f32.mrb[125].mxu0 }
0x2baa   :  { %v5271_v11 = vpop.f32.mrb[126].mxu0 }
0x2bab   :  { %v7771_v12 = vpop.f32.mrb[127].mxu0  ;;  %v8102_v11 = vld [vmem:[%s9887_s11 + $0x40] sm:$0xff]  }
0x2bac   :  { %v8103_v12 = vld [vmem:[%s9887_s11 + $0x48] sm:$0xff]  }
0x2bb0   :  { %v5376_v18 = vpop.f32.mrb[128].mxu0 }
0x2bb1   :  { %v5432_v19 = vmul.f32 0.25, %v5376_v18  ;;  %v7782_v22 = vpop.f32.mrb[129].mxu0  ;;  %v8104_v18 = vld [vmem:[%s9887_s11 + $0x50] sm:$0xff]  }
0x2bb2   :  { %v5379_v25 = vpop.f32.mrb[130].mxu0  ;;  %v8106_v22 = vld [vmem:[%s9887_s11 + $0x60] sm:$0xff]  }
0x2bb3   :  { %v5434_v26 = vadd.f32 %v5432_v19, %v8866_v7  ;;  %v7783_v29 = vpop.f32.mrb[131].mxu0  ;;  %v8105_v19 = vld [vmem:[%s9887_s11 + $0x58] sm:$0xff]   ;;  %v8107_v25 = vld [vmem:[%s9887_s11 + $0x68] sm:$0xff]  }
0x2bb5   :  { %v5436_v51 = vsel %vm778_vm8, %v5434_v26, -inf }
0x2bb6   :  { %5437 = vmax.xlane.f32.xlu0 %v5436_v51 }
0x2bb7   :  { %v5316_v3 = vpop.f32.mrb[148].mxu1 }
0x2bb8   :  { %v7776_v55 = vpop.f32.mrb[149].mxu1 }
0x2bb9   :  { %v5319_v61 = vpop.f32.mrb[150].mxu1  ;;  %v8108_v55 = vld [vmem:[%s9887_s11 + $0x70] sm:$0xff]  }
0x2bba   :  { %v7777_v23 = vpop.f32.mrb[151].mxu1  ;;  %v8109_v61 = vld [vmem:[%s9887_s11 + $0x78] sm:$0xff]  }
0x2bbf   :  { %v5426_v30 = vpop.f32.mrb[152].mxu1 }
0x2bc0   :  { %v5433_v33 = vmul.f32 0.25, %v5426_v30  ;;  %v7788_v45 = vpop.f32.mrb[153].mxu1 }
0x2bc1   :  { %v5429_v36 = vpop.f32.mrb[154].mxu1 }
0x2bc2   :  { %v5435_v20 = vadd.f32 %v5433_v33, %v8871_v16  ;;  %v7789_v42 = vpop.f32.mrb[155].mxu1 }
0x2bc4   :  { %v5439_v54 = vsel %vm778_vm8, %v5435_v20, -inf }
0x2bc5   :  { %5440 = vmax.xlane.f32.xlu1 %v5439_v54 }
0x2bd6   :  { %5460 = vrot.lane.b32.xlu1 %v9343_v6, %s8526_s6 }
0x2bda   :  { %4154 = vrot.lane.b32.xlu1 %v9431_v4, %s8526_s6 }
0x2bde   :  { %4156 = vrot.lane.b32.xlu1 %v9435_v27, %s8526_s6 }
0x2be2   :  { %4390 = vrot.lane.b32.xlu1 %v9477_v15, %s8537_s29 }
0x2be6   :  { %4624 = vrot.lane.b32.xlu1 %v9519_v41, %s8536_s24 }
0x2bea   :  { %4858 = vrot.lane.b32.xlu1 %v9561_v14, %s8528_s15 }
0x2bee   :  { %5092 = vrot.lane.b32.xlu1 %v9603_v10, %s8535_s2 }
0x2bf2   :  { %5326 = vrot.lane.b32.xlu1 %v5316_v3, %s8534_s28 }
0x2c43   :  { %v5438_v7 = vpop.xlane.xlu0 %5437 }
0x2c44   :  { %v5442_v16 = vsub.f32 %v5434_v26, %v5438_v7 }
0x2c46   :  { %v5444_v6 = vmul.f32 1.442695, %v5442_v16  ;;  %v6941_v16 = vld [vmem:[%s9888_s12 + $0x1] ss:$0 sm:$0xff] }
0x2c48   :  { %8338 = vpow2.f32 %v5444_v6 }
0x2c52   :  { %v8339_v4 = vpop.eup %8338  ;;  %v5441_v27 = vpop.xlane.xlu1 %5440 }
0x2c53   :  { %v5443_v63 = vsub.f32 %v5435_v20, %v5441_v27  ;;  %v5448_v15 = vsel %vm778_vm8, %v8339_v4, 0.0 }
0x2c54   :  { %5449 = vadd.xlane.f32.xlu0 %v5448_v15 }
0x2c55   :  { %v5446_v9 = vmul.f32 1.442695, %v5443_v63 }
0x2c56   :  { %v5461_v41 = vpop.permute.xlu1 %5460 }
0x2c57   :  { %8340 = vpow2.f32 %v5446_v9  ;;  %v5466_v14 = vsel %vm806_vm7, %v5461_v41, 0 }
0x2c58   :  { %7791 = vmatpush3.bf16.msra.mxu0 %v5466_v14 }
0x2c59   :  { %7802 = vmatprep.subr.bf16.mxu0 %v8531_v24 }
0x2c5a   :  { %v4155_v10 = vpop.permute.xlu1 %4154 }
0x2c5b   :  { %4160 = vst.msk [vmem:[#allocation2] sm:$0xff] %vm1136_vm9, %v4155_v10  ;;  %v8110_v10 = vld [vmem:[#allocation8 + $0x100] ss:$16 sps:$4 sm:$0xff]  }
0x2c5e   :  { %v4157_v31 = vpop.permute.xlu1 %4156 }
0x2c5f   :  { %4161 = vst.msk [vmem:[#allocation2 + $0x8] sm:$0xff] %vm1136_vm9, %v4157_v31  ;;  %v8112_v31 = vld [vmem:[#allocation8 + $0x104] ss:$16 sps:$4 sm:$0xff]  }
0x2c61   :  { %v8341_v46 = vpop.eup %8340 }
0x2c62   :  { %v4391_v32 = vpop.permute.xlu1 %4390  ;;  %v5451_v49 = vsel %vm778_vm8, %v8341_v46, 0.0 }
0x2c63   :  { %4395 = vst.msk [vmem:[#allocation2 + $0x8] sm:$0xff] %vm1371_vm10, %v4391_v32  ;;  %5452 = vadd.xlane.f32.xlu0 %v5451_v49  ;;  %v8118_v32 = vld [vmem:[#allocation8 + $0x124] ss:$16 sps:$4 sm:$0xff]   ;;  %v8121_v49 = vld [vmem:[#allocation8 + $0x12c] ss:$16 sps:$4 sm:$0xff]  }
0x2c66   :  { %v4625_v48 = vpop.permute.xlu1 %4624 }
0x2c67   :  { %4629 = vst.msk [vmem:[#allocation2 + $0x8] sm:$0xff] %vm1606_vm11, %v4625_v48  ;;  %v8116_v48 = vld [vmem:[#allocation8 + $0x120] ss:$16 sps:$4 sm:$0xff]  }
0x2c6a   :  { %v4859_v52 = vpop.permute.xlu1 %4858 }
0x2c6b   :  { %4863 = vst.msk [vmem:[#allocation2 + $0x8] sm:$0xff] %vm1841_vm12, %v4859_v52  ;;  %v8119_v52 = vld [vmem:[#allocation8 + $0x128] ss:$16 sps:$4 sm:$0xff]  }
0x2c6e   :  { %v5093_v8 = vpop.permute.xlu1 %5092 }
0x2c6f   :  { %5097 = vst.msk [vmem:[#allocation2 + $0x8] sm:$0xff] %vm2076_vm13, %v5093_v8 }
0x2c72   :  { %v5327_v44 = vpop.permute.xlu1 %5326 }
0x2c73   :  { %5331 = vst.msk [vmem:[#allocation2 + $0x8] sm:$0xff] %vm2311_vm14, %v5327_v44 }
0x2c79   :  { %5508 = vrot.lane.b32.xlu0 %v9372_v50, %s8526_s6 }
0x2c7d   :  { %4388 = vrot.lane.b32.xlu0 %v9473_v17, %s8537_s29 }
0x2c81   :  { %4622 = vrot.lane.b32.xlu0 %v9515_v60, %s8536_s24 }
0x2c85   :  { %4856 = vrot.lane.b32.xlu0 %v9557_v62, %s8528_s15 }
0x2c89   :  { %5090 = vrot.lane.b32.xlu0 %v9599_v28, %s8535_s2 }
0x2c8d   :  { %5324 = vrot.lane.b32.xlu0 %v9641_v2, %s8534_s28 }
0x2ce1   :  { %v5450_v1 = vpop.xlane.xlu0 %5449 }
0x2ce2   :  { %8342 = vrcp.f32 %v5450_v1 }
0x2cec   :  { %v8343_v53 = vpop.eup %8342 }
0x2ced   :  { %v5455_v38 = vmul.f32 %v8343_v53, %v8339_v4 }
0x2cef   :  { %v5458_v50 = vpack.c.bf16 %v5455_v38, %v5455_v38 }
0x2cf0   :  { %v5453_v47 = vpop.xlane.xlu0 %5452 }
0x2cf1   :  { %8344 = vrcp.f32 %v5453_v47  ;;  %7793 = vmatmul.mubr.msk.bf16.vlgmr.msra.gmra.mrb[132].mxu0 %vm778_vm8, %v5458_v50  ;;  %v8124_v47 = vld [vmem:[#allocation8 + $0x144] ss:$16 sps:$4 sm:$0xff]  }
0x2cf2   :  { %7818 = vmatprep.mubr.msk.bf16.mxu0 %vm8532_vm5, %v8531_v24  ;;  %7803 = vmatpush3.bf16.msra.mxu0 %v8102_v11  ;;  %v8137_v11 = vld [vmem:[#allocation8 + $0x188] ss:$16 sps:$4 sm:$0xff]  }
0x2cf3   :  { %7804 = vmatprep.subr.bf16.mxu0 %v8531_v24 }
0x2cf4   :  { %v5509_v17 = vpop.permute.xlu0 %5508 }
0x2cf5   :  { %v5514_v60 = vsel %vm806_vm7, %v5509_v17, 0  ;;  %v8127_v17 = vld [vmem:[#allocation8 + $0x14c] ss:$16 sps:$4 sm:$0xff]  }
0x2cf6   :  { %7797 = vmatpush3.bf16.msra.mxu1 %v5514_v60  ;;  %7805 = vmatpush3.bf16.msra.mxu0 %v8103_v12  ;;  %v8122_v60 = vld [vmem:[#allocation8 + $0x140] ss:$16 sps:$4 sm:$0xff]   ;;  %v8142_v12 = vld [vmem:[#allocation8 + $0x1a4] ss:$16 sps:$4 sm:$0xff]  }
0x2cf7   :  { %7806 = vmatprep.subr.bf16.mxu0 %v8531_v24  ;;  %5944 = vmatprep.subr.bf16.mxu1 %v8112_v31  ;;  %v8160_v31 = vld [vmem:[#allocation9 + $0x100] sm:$0xff]  }
0x2cf8   :  { %v4389_v62 = vpop.permute.xlu0 %4388 }
0x2cf9   :  { %4394 = vst.msk [vmem:[#allocation2] sm:$0xff] %vm1371_vm10, %v4389_v62  ;;  %v8125_v62 = vld [vmem:[#allocation8 + $0x148] ss:$16 sps:$4 sm:$0xff]  }
0x2cfa   :  { %7807 = vmatpush3.bf16.msra.mxu0 %v8104_v18  ;;  %v8145_v18 = vld [vmem:[#allocation8 + $0x1ac] ss:$16 sps:$4 sm:$0xff]  }
0x2cfb   :  { %v8345_v28 = vpop.eup %8344  ;;  %7808 = vmatprep.subr.bf16.mxu0 %v8531_v24 }
0x2cfc   :  { %v5457_v40 = vmul.f32 %v8345_v28, %v8341_v46  ;;  %v4623_v57 = vpop.permute.xlu0 %4622  ;;  %v8113_v46 = vld [vmem:[#allocation8 + $0x108] ss:$16 sps:$4 sm:$0xff]   ;;  %v8130_v28 = vld [vmem:[#allocation8 + $0x164] ss:$16 sps:$4 sm:$0xff]  }
0x2cfd   :  { %4628 = vst.msk [vmem:[#allocation2] sm:$0xff] %vm1606_vm11, %v4623_v57  ;;  %v8128_v57 = vld [vmem:[#allocation8 + $0x160] ss:$16 sps:$4 sm:$0xff]  }
0x2cfe   :  { %v5459_v58 = vpack.c.bf16 %v5457_v40, %v5457_v40  ;;  %7809 = vmatpush3.bf16.msra.mxu0 %v8105_v19  ;;  %v8133_v40 = vld [vmem:[#allocation8 + $0x16c] ss:$16 sps:$4 sm:$0xff]   ;;  %v8140_v19 = vld [vmem:[#allocation8 + $0x1a0] ss:$16 sps:$4 sm:$0xff]  }
0x2cff   :  { %7810 = vmatprep.subr.bf16.mxu0 %v8531_v24 }
0x2d00   :  { %7799 = vmatmul.mubr.msk.bf16.vlgmr.msra.gmra.mrb[156].mxu1 %vm778_vm8, %v5459_v58  ;;  %v4857_v59 = vpop.permute.xlu0 %4856  ;;  %v8131_v58 = vld [vmem:[#allocation8 + $0x168] ss:$16 sps:$4 sm:$0xff]  }
0x2d01   :  { %4862 = vst.msk [vmem:[#allocation2] sm:$0xff] %vm1841_vm12, %v4857_v59  ;;  %5976 = vmatprep.mubr.bf16.mxu1 %v8530_v0  ;;  %5945 = vmatpush1.bf16.msra.mxu1 %v8110_v10  ;;  %v8136_v59 = vld [vmem:[#allocation8 + $0x184] ss:$16 sps:$4 sm:$0xff]  }
0x2d02   :  { %7811 = vmatpush3.bf16.msra.mxu0 %v8106_v22  ;;  %5946 = vmatprep.subr.bf16.mxu1 %v8118_v32  ;;  %v8143_v22 = vld [vmem:[#allocation8 + $0x1a8] ss:$16 sps:$4 sm:$0xff]  }
0x2d03   :  { %7812 = vmatprep.subr.bf16.mxu0 %v8531_v24  ;;  %v8162_v32 = vld [vmem:[#allocation9 + $0x148] sm:$0xff]  }
0x2d04   :  { %v5091_v2 = vpop.permute.xlu0 %5090 }
0x2d05   :  { %5096 = vst.msk [vmem:[#allocation2] sm:$0xff] %vm2076_vm13, %v5091_v2  ;;  %5947 = vmatpush1.bf16.msra.mxu1 %v8116_v48  ;;  %v8139_v2 = vld [vmem:[#allocation8 + $0x18c] ss:$16 sps:$4 sm:$0xff]  }
0x2d06   :  { %7813 = vmatpush3.bf16.msra.mxu0 %v8107_v25  ;;  %5948 = vmatprep.subr.bf16.mxu1 %v8124_v47  ;;  %v8148_v25 = vld [vmem:[#allocation8 + $0x1c4] ss:$16 sps:$4 sm:$0xff]   ;;  %v8164_v48 = vld [vmem:[#allocation9 + $0x108] sm:$0xff]  }
0x2d07   :  { %7814 = vmatprep.subr.bf16.mxu0 %v8531_v24  ;;  %v8174_v47 = vld [vmem:[#allocation9 + $0x160] sm:$0xff]  }
0x2d08   :  { %v5325_v5 = vpop.permute.xlu0 %5324 }
0x2d09   :  { %5330 = vst.msk [vmem:[#allocation2] sm:$0xff] %vm2311_vm14, %v5325_v5  ;;  %5949 = vmatpush1.bf16.msra.mxu1 %v8122_v60  ;;  %v8134_v5 = vld [vmem:[#allocation8 + $0x180] ss:$16 sps:$4 sm:$0xff]  }
0x2d0a   :  { %7815 = vmatpush3.bf16.msra.mxu0 %v8108_v55  ;;  %5950 = vmatprep.subr.bf16.mxu1 %v8130_v28  ;;  %v8157_v55 = vld [vmem:[#allocation8 + $0x1ec] ss:$16 sps:$4 sm:$0xff]   ;;  %v8176_v60 = vld [vmem:[#allocation9 + $0x120] sm:$0xff]  }
0x2d0b   :  { %7816 = vmatprep.subr.bf16.mxu0 %v8531_v24  ;;  %v8178_v28 = vld [vmem:[#allocation9 + $0x168] sm:$0xff]  }
0x2d0d   :  { %5951 = vmatpush1.bf16.msra.mxu1 %v8128_v57  ;;  %v8180_v57 = vld [vmem:[#allocation9 + $0x128] sm:$0xff]  }
0x2d0e   :  { %7817 = vmatpush3.bf16.msra.mxu0 %v8109_v61  ;;  %5952 = vmatprep.subr.bf16.mxu1 %v8136_v59  ;;  %v8152_v61 = vld [vmem:[#allocation8 + $0x1e0] ss:$16 sps:$4 sm:$0xff]  }
0x2d0f   :  { %v8182_v59 = vld [vmem:[#allocation9 + $0x170] sm:$0xff]  }
0x2d11   :  { %5953 = vmatpush1.bf16.msra.mxu1 %v8134_v5  ;;  %v8184_v5 = vld [vmem:[#allocation9 + $0x130] sm:$0xff]  }
0x2d12   :  { %5954 = vmatprep.subr.bf16.mxu1 %v8142_v12  ;;  %v8186_v12 = vld [vmem:[#allocation9 + $0x178] sm:$0xff]  }
0x2d15   :  { %5955 = vmatpush1.bf16.msra.mxu1 %v8140_v19  ;;  %v8188_v19 = vld [vmem:[#allocation9 + $0x138] sm:$0xff]  }
0x2d16   :  { %5956 = vmatprep.subr.bf16.mxu1 %v8148_v25  ;;  %v6954_v25 = vld [vmem:[%s9892_s16 + $0x4] sm:$0xf] }
0x2dc4   :  { %v5502_v26 = vpop.f32.mrb[132].mxu0 }
0x2dc5   :  { %5558 = vrot.lane.b32.xlu0 %v5502_v26, %s8533_s27  ;;  %v7794_v29 = vpop.f32.mrb[133].mxu0  ;;  %v8151_v26 = vld [vmem:[#allocation8 + $0x1cc] ss:$16 sps:$4 sm:$0xff]  }
0x2dc6   :  { %v5505_v51 = vpop.f32.mrb[134].mxu0  ;;  %v8146_v29 = vld [vmem:[#allocation8 + $0x1c0] ss:$16 sps:$4 sm:$0xff]  }
0x2dc7   :  { %v7795_v3 = vpop.f32.mrb[135].mxu0  ;;  %v8149_v51 = vld [vmem:[#allocation8 + $0x1c8] ss:$16 sps:$4 sm:$0xff]   ;;  %5957 = vmatpush1.bf16.msra.mxu1 %v8146_v29  ;;  %v5775_v29 = vrot.slane %v6954_v25, %v8822_v37 }
0x2dc8   :  { %v8154_v3 = vld [vmem:[#allocation8 + $0x1e4] ss:$16 sps:$4 sm:$0xff]  }
0x2dc9   :  { %5958 = vmatprep.subr.bf16.mxu1 %v8154_v3  ;;  %v5779_v3 = vrot.slane %v6954_v25, %v2755_v13 }
0x2dcb   :  { %5959 = vmatpush1.bf16.msra.mxu1 %v8152_v61 }
0x2dd3   :  { %v5550_v23 = vpop.f32.mrb[156].mxu1 }
0x2dd4   :  { %5560 = vrot.lane.b32.xlu1 %v5550_v23, %s8533_s27  ;;  %v7800_v30 = vpop.f32.mrb[157].mxu1  ;;  %v8155_v23 = vld [vmem:[#allocation8 + $0x1e8] ss:$16 sps:$4 sm:$0xff]  }
0x2dd5   :  { %v5553_v33 = vpop.f32.mrb[158].mxu1  ;;  %v8158_v30 = vld [vmem:[#allocation9 + $0x140] sm:$0xff]  }
0x2dd6   :  { %v7801_v45 = vpop.f32.mrb[159].mxu1  ;;  %v8159_v33 = vld [vmem:[#allocation9 + $0x1c0] sm:$0xff]   ;;  %7256 = vmatprep.subr.bf16.mxu1 %v8158_v30 }
0x2e37   :  { %v5559_v36 = vpop.permute.xlu0 %5558 }
0x2e38   :  { %5564 = vst.msk [vmem:[#allocation2] sm:$0xff] %vm2546_vm15, %v5559_v36 }
0x2e3f   :  { %v5566_v42 = vld [vmem:[#allocation2] sm:$0xff] }
0x2e46   :  { %v5561_v20 = vpop.permute.xlu1 %5560 }
0x2e47   :  { %5565 = vst.msk [vmem:[#allocation2 + $0x8] sm:$0xff] %vm2546_vm15, %v5561_v20 }
0x2e4e   :  { %v5567_v54 = vld [vmem:[#allocation2 + $0x8] sm:$0xff] }
0x2e4f   :  { %v5568_v7 = vpack.c.bf16 %v5567_v54, %v5566_v42 }
0x2e51   :  { %7819 = vmatmul.mubr.bf16.vlgmr.msra.gmra.mrb[136].mxu0 %v5568_v7 }
0x2e52   :  { %6019 = vmatprep.mubr.bf16.mxu0 %v8530_v0  ;;  %v8115_v0 = vld [vmem:[#allocation8 + $0x10c] ss:$16 sps:$4 sm:$0xff]  }
0x2e53   :  { %5987 = vmatprep.subr.bf16.mxu0 %v8115_v0 }
0x2e54   :  { %5988 = vmatpush1.bf16.msra.mxu0 %v8113_v46  ;;  %v8161_v46 = vld [vmem:[#allocation9 + $0x180] sm:$0xff]  }
0x2e55   :  { %5989 = vmatprep.subr.bf16.mxu0 %v8121_v49  ;;  %v8163_v49 = vld [vmem:[#allocation9 + $0x1c8] sm:$0xff]  }
0x2e58   :  { %5990 = vmatpush1.bf16.msra.mxu0 %v8119_v52  ;;  %v8165_v52 = vld [vmem:[#allocation9 + $0x188] sm:$0xff]  }
0x2e59   :  { %5991 = vmatprep.subr.bf16.mxu0 %v8127_v17  ;;  %v8175_v17 = vld [vmem:[#allocation9 + $0x1e0] sm:$0xff]  }
0x2e5c   :  { %5992 = vmatpush1.bf16.msra.mxu0 %v8125_v62  ;;  %v8177_v62 = vld [vmem:[#allocation9 + $0x1a0] sm:$0xff]  }
0x2e5d   :  { %5993 = vmatprep.subr.bf16.mxu0 %v8133_v40  ;;  %v8179_v40 = vld [vmem:[#allocation9 + $0x1e8] sm:$0xff]  }
0x2e60   :  { %5994 = vmatpush1.bf16.msra.mxu0 %v8131_v58  ;;  %v8181_v58 = vld [vmem:[#allocation9 + $0x1a8] sm:$0xff]  }
0x2e61   :  { %5995 = vmatprep.subr.bf16.mxu0 %v8139_v2  ;;  %v8183_v2 = vld [vmem:[#allocation9 + $0x1f0] sm:$0xff]  }
0x2e64   :  { %5996 = vmatpush1.bf16.msra.mxu0 %v8137_v11  ;;  %v8185_v11 = vld [vmem:[#allocation9 + $0x1b0] sm:$0xff]  }
0x2e65   :  { %5997 = vmatprep.subr.bf16.mxu0 %v8145_v18  ;;  %v8187_v18 = vld [vmem:[#allocation9 + $0x1f8] sm:$0xff]  }
0x2e68   :  { %5998 = vmatpush1.bf16.msra.mxu0 %v8143_v22  ;;  %v8189_v22 = vld [vmem:[#allocation9 + $0x1b8] sm:$0xff]  }
0x2e69   :  { %5999 = vmatprep.subr.bf16.mxu0 %v8151_v26  ;;  %v5767_v26 = vrot.slane %v6954_v25, %v8826_v39 }
0x2e6c   :  { %6000 = vmatpush1.bf16.msra.mxu0 %v8149_v51  ;;  %v5771_v51 = vrot.slane %v6954_v25, %v8816_v35 }
0x2e6d   :  { %6001 = vmatprep.subr.bf16.mxu0 %v8157_v55 }
0x2e70   :  { %6002 = vmatpush1.bf16.msra.mxu0 %v8155_v23 }
0x2e71   :  { %7278 = vmatprep.subr.bf16.mxu0 %v8159_v33 }
0x2f24   :  { %v5676_v6 = vpop.f32.mrb[136].mxu0 }
0x2f25   :  { %v5677_v4 = vadd.f32 %v6941_v16, %v5676_v6  ;;  %v7820_v27 = vpop.f32.mrb[137].mxu0 }
0x2f26   :  { %v5679_v63 = vpop.f32.mrb[138].mxu0 }
0x2f27   :  { %v5683_v15 = vadd.f32 %v5677_v4, %v9309_v43  ;;  %v5680_v9 = vadd.f32 %v6941_v16, %v5679_v63  ;;  %v7821_v41 = vpop.f32.mrb[139].mxu0  ;;  %v6952_v4 = vld [vmem:[%s9889_s13 + $0x1] ss:$0 sm:$0xff] }
0x2f29   :  { %v5684_v14 = vadd.f32 %v5680_v9, %v9311_v56  ;;  %5689 = vadd.xlane.f32.xlu0 %v5683_v15  ;;  %v6953_v9 = vld [vmem:[%s9890_s14 + $0x1] ss:$0 sm:$0xff] }
0x2f2b   :  { %5691 = vadd.xlane.f32.xlu1 %v5684_v14 }
0x2fb6   :  { %v5690_v43 = vpop.xlane.xlu0 %5689 }
0x2fb7   :  { %v5693_v56 = vmul.f32 0.0078125, %v5690_v43  ;;  %v8166_v43 = vld [vmem:[#allocation9 + $0x150] sm:$0xff]  }
0x2fb8   :  { %v5692_v8 = vpop.xlane.xlu1 %5691 }
0x2fb9   :  { %v9737_v44 = vsub.f32 %v5683_v15, %v5693_v56  ;;  %v5694_v1 = vmul.f32 0.0078125, %v5692_v8  ;;  %v8167_v56 = vld [vmem:[#allocation9 + $0x1d0] sm:$0xff]  }
0x2fba   :  { %v8168_v8 = vld [vmem:[#allocation9 + $0x110] sm:$0xff]  }
0x2fbb   :  { %v9739_v53 = vsub.f32 %v5684_v14, %v5694_v1  ;;  %v5697_v38 = vmul.f32 %v9737_v44, %v9737_v44  ;;  %v8170_v1 = vld [vmem:[#allocation9 + $0x158] sm:$0xff]  }
0x2fbd   :  { %5699 = vadd.xlane.f32.xlu0 %v5697_v38  ;;  %v5698_v50 = vmul.f32 %v9739_v53, %v9739_v53  ;;  %v8172_v38 = vld [vmem:[#allocation9 + $0x118] sm:$0xff]  }
0x2fc1   :  { %5701 = vadd.xlane.f32.xlu0 %v5698_v50  ;;  %v8173_v50 = vld [vmem:[#allocation9 + $0x198] sm:$0xff]  }
0x304a   :  { %v5700_v45 = vpop.xlane.xlu0 %5699 }
0x304b   :  { %v5703_v36 = vmul.f32 0.0078125, %v5700_v45 }
0x304d   :  { %v5705_v20 = vadd.f32 1e-05, %v5703_v36 }
0x304e   :  { %v5702_v42 = vpop.xlane.xlu0 %5701 }
0x304f   :  { %8346 = vrsqrt.f32 %v5705_v20  ;;  %v5704_v54 = vmul.f32 0.0078125, %v5702_v42 }
0x3051   :  { %v5706_v7 = vadd.f32 1e-05, %v5704_v54 }
0x3053   :  { %8348 = vrsqrt.f32 %v5706_v7 }
0x3059   :  { %v8347_v16 = vpop.eup %8346 }
0x305a   :  { %v5709_v6 = vmul.f32 %v8347_v16, %v9737_v44  ;;  %v8169_v44 = vld [vmem:[#allocation9 + $0x190] sm:$0xff]  }
0x305c   :  { %v5717_v15 = vmul.f32 %v6952_v4, %v5709_v6 }
0x305d   :  { %v8349_v27 = vpop.eup %8348 }
0x305e   :  { %v5710_v63 = vmul.f32 %v8349_v27, %v9739_v53  ;;  %v9753_v14 = vadd.f32 %v6953_v9, %v5717_v15  ;;  %v8171_v53 = vld [vmem:[#allocation9 + $0x1d8] sm:$0xff]  }
0x3060   :  { %v5718_v41 = vmul.f32 %v6952_v4, %v5710_v63 }
0x3062   :  { %v9755_v10 = vadd.f32 %v6953_v9, %v5718_v41 }
0x3064   :  { %v5727_v0 = vpack.c.bf16 %v9755_v10, %v9753_v14 }
0x3066   :  { %5977 = vmatmul.mubr.bf16.vlgmr.msra.gmra.mrb[160].mxu1 %v5727_v0  ;;  %6020 = vmatmul.mubr.bf16.vlgmr.msra.gmra.mrb[140].mxu0 %v5727_v0 }
0x3067   :  { %7257 = vmatpush3.bf16.msra.mxu1 %v8160_v31  ;;  %7279 = vmatpush3.bf16.msra.mxu0 %v8161_v46 }
0x3068   :  { %7258 = vmatprep.subr.bf16.mxu1 %v8162_v32  ;;  %7280 = vmatprep.subr.bf16.mxu0 %v8163_v49 }
0x306b   :  { %7259 = vmatpush3.bf16.msra.mxu1 %v8164_v48  ;;  %7281 = vmatpush3.bf16.msra.mxu0 %v8165_v52 }
0x306c   :  { %7260 = vmatprep.subr.bf16.mxu1 %v8166_v43  ;;  %7282 = vmatprep.subr.bf16.mxu0 %v8167_v56 }
0x306f   :  { %7261 = vmatpush3.bf16.msra.mxu1 %v8168_v8  ;;  %7283 = vmatpush3.bf16.msra.mxu0 %v8169_v44 }
0x3070   :  { %7262 = vmatprep.subr.bf16.mxu1 %v8170_v1  ;;  %7284 = vmatprep.subr.bf16.mxu0 %v8171_v53 }
0x3073   :  { %7263 = vmatpush3.bf16.msra.mxu1 %v8172_v38  ;;  %7285 = vmatpush3.bf16.msra.mxu0 %v8173_v50 }
0x3074   :  { %7264 = vmatprep.subr.bf16.mxu1 %v8174_v47  ;;  %7286 = vmatprep.subr.bf16.mxu0 %v8175_v17 }
0x3077   :  { %7265 = vmatpush3.bf16.msra.mxu1 %v8176_v60  ;;  %7287 = vmatpush3.bf16.msra.mxu0 %v8177_v62 }
0x3078   :  { %7266 = vmatprep.subr.bf16.mxu1 %v8178_v28  ;;  %7288 = vmatprep.subr.bf16.mxu0 %v8179_v40 }
0x307b   :  { %7267 = vmatpush3.bf16.msra.mxu1 %v8180_v57  ;;  %7289 = vmatpush3.bf16.msra.mxu0 %v8181_v58 }
0x307c   :  { %7268 = vmatprep.subr.bf16.mxu1 %v8182_v59  ;;  %7290 = vmatprep.subr.bf16.mxu0 %v8183_v2 }
0x307f   :  { %7269 = vmatpush3.bf16.msra.mxu1 %v8184_v5  ;;  %7291 = vmatpush3.bf16.msra.mxu0 %v8185_v11 }
0x3080   :  { %7270 = vmatprep.subr.bf16.mxu1 %v8186_v12  ;;  %7292 = vmatprep.subr.bf16.mxu0 %v8187_v18 }
0x3083   :  { %7271 = vmatpush3.bf16.msra.mxu1 %v8188_v19  ;;  %7293 = vmatpush3.bf16.msra.mxu0 %v8189_v22 }
0x3139   :  { %v5978_v55 = vpop.f32.mrb[160].mxu1  ;;  %v6021_v61 = vpop.f32.mrb[140].mxu0 }
0x313a   :  { %v5979_v23 = vadd.f32 %v5978_v55, %v5767_v26  ;;  %v6022_v30 = vadd.f32 %v6021_v61, %v5775_v29  ;;  %v5980_v33 = vpop.f32.mrb[161].mxu1  ;;  %v6023_v45 = vpop.f32.mrb[141].mxu0 }
0x313b   :  { %v5981_v36 = vadd.f32 %v5980_v33, %v5771_v51  ;;  %v6024_v20 = vadd.f32 %v6023_v45, %v5779_v3  ;;  %v5982_v42 = vpop.f32.mrb[162].mxu1  ;;  %v6025_v54 = vpop.f32.mrb[142].mxu0 }
0x313c   :  { %v6038_v7 = vmul.f32 0.70710677, %v5979_v23  ;;  %v6040_v16 = vmul.f32 0.70710677, %v6022_v30  ;;  %v5983_v37 = vadd.f32 %v5982_v42, %v5767_v26  ;;  %v6026_v35 = vadd.f32 %v6025_v54, %v5775_v29  ;;  %v5984_v4 = vpop.f32.mrb[163].mxu1  ;;  %v6027_v27 = vpop.f32.mrb[143].mxu0 }
0x313d   :  { %v6039_v39 = vmul.f32 0.70710677, %v5981_v36  ;;  %v6041_v6 = vmul.f32 0.70710677, %v6024_v20  ;;  %v5985_v13 = vadd.f32 %v5984_v4, %v5771_v51  ;;  %v6028_v63 = vadd.f32 %v6027_v27, %v5779_v3 }
0x313e   :  { %8350 = verf.f32 %v6038_v7  ;;  %v6042_v15 = vmul.f32 0.70710677, %v5983_v37  ;;  %v6044_v9 = vmul.f32 0.70710677, %v6026_v35  ;;  %v6030_v43 = vmul.f32 0.5, %v5979_v23 }
0x313f   :  { %8352 = verf.f32 %v6040_v16  ;;  %v6043_v41 = vmul.f32 0.70710677, %v5985_v13  ;;  %v6045_v31 = vmul.f32 0.70710677, %v6028_v63  ;;  %v6032_v56 = vmul.f32 0.5, %v6022_v30 }
0x3140   :  { %8354 = verf.f32 %v6039_v39  ;;  %v6031_v1 = vmul.f32 0.5, %v5981_v36  ;;  %v6034_v38 = vmul.f32 0.5, %v5983_v37  ;;  %v6033_v17 = vmul.f32 0.5, %v6024_v20  ;;  %v6988_v30 = vld [vmem:[%s9894_s18 + $0x1] ss:$0 sm:$0xff] }
0x3141   :  { %8356 = verf.f32 %v6041_v6  ;;  %v6036_v62 = vmul.f32 0.5, %v6026_v35  ;;  %v6035_v59 = vmul.f32 0.5, %v5985_v13  ;;  %v6037_v12 = vmul.f32 0.5, %v6028_v63 }
0x3142   :  { %8358 = verf.f32 %v6042_v15 }
0x3143   :  { %8360 = verf.f32 %v6044_v9 }
0x3144   :  { %8362 = verf.f32 %v6043_v41 }
0x3145   :  { %8364 = verf.f32 %v6045_v31 }
0x3148   :  { %v8351_v46 = vpop.eup %8350 }
0x3149   :  { %v8353_v0 = vpop.eup %8352  ;;  %v6054_v48 = vadd.f32 1.0, %v8351_v46 }
0x314a   :  { %v8355_v32 = vpop.eup %8354  ;;  %v6056_v8 = vadd.f32 1.0, %v8353_v0 }
0x314b   :  { %v8357_v49 = vpop.eup %8356  ;;  %v6055_v53 = vadd.f32 1.0, %v8355_v32  ;;  %v6062_v57 = vmul.f32 %v6054_v48, %v6030_v43  ;;  %v8538_v48 = vmov 0.0|0.0  }
0x314c   :  { %v8359_v52 = vpop.eup %8358  ;;  %v6057_v60 = vadd.f32 1.0, %v8357_v49  ;;  %v6064_v5 = vmul.f32 %v6056_v8, %v6032_v56  ;;  %7896 = vmatprep.subr.bf16.mxu1 %v8538_v48 }
0x314d   :  { %v8361_v44 = vpop.eup %8360  ;;  %v6058_v50 = vadd.f32 1.0, %v8359_v52  ;;  %v6063_v19 = vmul.f32 %v6055_v53, %v6031_v1  ;;  %v7023_v1 = vld [vmem:[%s9895_s19 + $0x1] ss:$0 sm:$0xff] }
0x314e   :  { %v8363_v47 = vpop.eup %8362  ;;  %v6060_v28 = vadd.f32 1.0, %v8361_v44  ;;  %v6065_v26 = vmul.f32 %v6057_v60, %v6033_v17  ;;  %v7024_v17 = vld [vmem:[%s9896_s20 + $0x1] ss:$0 sm:$0xff]  ;;  %v6467_v60 = vmul.u32 8, %v8813_v34  ;;  %v6546_v34 = vld [vmem:[%s9897_s21 + $0x10] sm:$0xff] }
0x314f   :  { %v8365_v40 = vpop.eup %8364  ;;  %v6066_v58 = vmul.f32 %v6058_v50, %v6034_v38  ;;  %v6059_v2 = vadd.f32 1.0, %v8363_v47 }
0x3150   :  { %v6068_v11 = vmul.f32 %v6060_v28, %v6036_v62  ;;  %v6061_v18 = vadd.f32 1.0, %v8365_v40  ;;  %vm6468_vm0 = vcmp.eq.s32.totalorder %v8739_v21, %v6467_v60  ;;  %v6547_v21 = vld [vmem:[%s9897_s21 + $0x18] sm:$0xff] }
0x3151   :  { %v6070_v22 = vpack.c.bf16 %v6066_v58, %v6062_v57  ;;  %v6067_v25 = vmul.f32 %v6059_v2, %v6035_v59  ;;  %v6544_v57 = vld [vmem:[%s9897_s21] sm:$0xff]  ;;  %v6545_v58 = vld [vmem:[%s9897_s21 + $0x8] sm:$0xff]  ;;  %v7025_v2 = vsel %vm6468_vm0, 1.0, %v8531_v24 }
0x3152   :  { %v6072_v29 = vpack.c.bf16 %v6068_v11, %v6064_v5  ;;  %v6069_v51 = vmul.f32 %v6061_v18, %v6037_v12  ;;  %v7900_v5 = vpack.c.bf16 %v6545_v58, %v6544_v57  ;;  %v7903_v11 = vpack.c.bf16 %v6547_v21, %v6546_v34  ;;  %v6548_v12 = vld [vmem:[%s9897_s21 + $0x20] sm:$0xff]  ;;  %v6549_v18 = vld [vmem:[%s9897_s21 + $0x28] sm:$0xff] }
0x3153   :  { %v6071_v3 = vpack.c.bf16 %v6067_v25, %v6063_v19  ;;  %v7906_v19 = vpack.c.bf16 %v6549_v18, %v6548_v12 }
0x3154   :  { %v6073_v55 = vpack.c.bf16 %v6069_v51, %v6065_v26  ;;  %v6552_v26 = vld [vmem:[%s9897_s21 + $0x40] sm:$0xff] }
0x3155   :  { %6371 = vmatprep.mubr.bf16.mxu1 %v6071_v3  ;;  %v6554_v3 = vld [vmem:[%s9897_s21 + $0x50] sm:$0xff] }
0x3156   :  { %6412 = vmatprep.mubr.bf16.mxu0 %v6073_v55  ;;  %6372 = vmatmul.mubr.bf16.vlgmr.msra.gmra.mrb[164].mxu1 %v6070_v22  ;;  %v6550_v22 = vld [vmem:[%s9897_s21 + $0x30] sm:$0xff]  ;;  %v6555_v55 = vld [vmem:[%s9897_s21 + $0x58] sm:$0xff] }
0x3157   :  { %6413 = vmatmul.mubr.bf16.vlgmr.msra.gmra.mrb[144].mxu0 %v6072_v29  ;;  %7826 = vmatprep.mubr.msk.f32.mxu1 %vm8532_vm5, %v8531_v24  ;;  %v6553_v29 = vld [vmem:[%s9897_s21 + $0x48] sm:$0xff] }
0x3158   :  { %v7912_v51 = vpack.c.bf16 %v6553_v29, %v6552_v26 }
0x3229   :  { %v7272_v61 = vpop.f32.mrb[164].mxu1 }
0x322a   :  { %v7294_v23 = vpop.f32.mrb[144].mxu0  ;;  %v7273_v33 = vpop.f32.mrb[165].mxu1 }
0x322b   :  { %v7274_v45 = vadd.f32 %v7273_v33, %v7272_v61  ;;  %v7295_v36 = vpop.f32.mrb[145].mxu0  ;;  %v7275_v20 = vpop.f32.mrb[166].mxu1  ;;  %v7915_v61 = vpack.c.bf16 %v6555_v55, %v6554_v3 }
0x322c   :  { %v7296_v42 = vadd.f32 %v7295_v36, %v7294_v23  ;;  %v7297_v54 = vpop.f32.mrb[146].mxu0  ;;  %v7276_v7 = vpop.f32.mrb[167].mxu1  ;;  %v6556_v23 = vld [vmem:[%s9897_s21 + $0x60] sm:$0xff]  ;;  %v6559_v36 = vld [vmem:[%s9897_s21 + $0x78] sm:$0xff] }
0x322d   :  { %v6374_v16 = vadd.f32 %v7274_v45, %v6988_v30  ;;  %v7277_v39 = vadd.f32 %v7276_v7, %v7275_v20  ;;  %v7298_v6 = vpop.f32.mrb[147].mxu0  ;;  %v6558_v45 = vld [vmem:[%s9897_s21 + $0x70] sm:$0xff]  ;;  %v7027_v7 = vld [vmem:[%s9898_s22] ss:$0 sm:$0xff]  ;;  %s8539_s22 = smov [#allocation11]  }
0x322e   :  { %v7299_v37 = vadd.f32 %v7298_v6, %v7297_v54  ;;  %v7921_v20 = vpack.c.bf16 %v6559_v36, %v6558_v45  ;;  %s6697_s1 = sshll.u32 %s8539_s22, 4  ;;  %s6698_s1 = int_to_ptr.vmem [resolvable:$true] %s6697_s1 }
0x322f   :  { %v6415_v35 = vadd.f32 %v7296_v42, %v6374_v16  ;;  %v6377_v4 = vadd.f32 %v7277_v39, %v6988_v30  ;;  %v6557_v30 = vld [vmem:[%s9897_s21 + $0x68] sm:$0xff]  ;;  %s8464_s4 = scalar_lea.vmem %s6698_s1, 32  ;;  %p8469_p5 = scmp.lt.s32.totalorder %s6698_s1, %s6698_s1 }
0x3230   :  { %v7918_v33 = vpack.c.bf16 %v6557_v30, %v6556_v23  ;;  %p8465_p4 = scmp.ne.s32.totalorder %s6698_s1, %s8464_s4  ;;  %p8470_p6 = scmp.lt.s32.totalorder %s8464_s4, %s8464_s4 }
0x3231   :  { %v6418_v27 = vadd.f32 %v7299_v37, %v6377_v4  ;;  %v6421_v13 = vadd.f32 %v6415_v35, %v9753_v14 }
0x3232   :  { %p8471_p7 = por %p8470_p6, %p8469_p5 }
0x3233   :  { %6427 = vadd.xlane.f32.xlu1 %v6421_v13  ;;  %v6422_v63 = vadd.f32 %v6418_v27, %v9755_v10  ;;  %v6639_v27 = vld [vmem:[%s9925_s8] sm:$0x3] }
0x3234   :  { %p8472_p8 = pnand %p8471_p7, %p8465_p4 }
0x3235   :  { %6429 = vadd.xlane.f32.xlu0 %v6422_v63 }
0x32c0   :  { %v6428_v15 = vpop.xlane.xlu1 %6427 }
0x32c1   :  { %v6431_v9 = vmul.f32 0.0078125, %v6428_v15  ;;  %v6670_v15 = vmul.f32 0.9, %v6639_v27 }
0x32c2   :  { %v6430_v41 = vpop.xlane.xlu0 %6429 }
0x32c3   :  { %v6433_v31 = vsub.f32 %v6421_v13, %v6431_v9  ;;  %v6432_v46 = vmul.f32 0.0078125, %v6430_v41  ;;  %v6671_v9 = vadd.f32 0.05, %v6670_v15 }
0x32c5   :  { %v6434_v0 = vsub.f32 %v6422_v63, %v6432_v46  ;;  %v6435_v32 = vmul.f32 %v6433_v31, %v6433_v31 }
0x32c7   :  { %6437 = vadd.xlane.f32.xlu1 %v6435_v32  ;;  %v6436_v49 = vmul.f32 %v6434_v0, %v6434_v0 }
0x32c9   :  { %6439 = vadd.xlane.f32.xlu0 %v6436_v49 }
0x3354   :  { %v6438_v52 = vpop.xlane.xlu1 %6437 }
0x3355   :  { %v6441_v43 = vmul.f32 0.0078125, %v6438_v52 }
0x3356   :  { %v6440_v14 = vpop.xlane.xlu0 %6439 }
0x3357   :  { %v6443_v56 = vadd.f32 1e-05, %v6441_v43  ;;  %v6442_v8 = vmul.f32 0.0078125, %v6440_v14 }
0x3359   :  { %8366 = vrsqrt.f32 %v6443_v56  ;;  %v6444_v10 = vadd.f32 1e-05, %v6442_v8 }
0x335b   :  { %8368 = vrsqrt.f32 %v6444_v10 }
0x3363   :  { %v8367_v44 = vpop.eup %8366 }
0x3364   :  { %v6447_v53 = vmul.f32 %v8367_v44, %v6433_v31 }
0x3365   :  { %v8369_v38 = vpop.eup %8368 }
0x3366   :  { %v6448_v50 = vmul.f32 %v8369_v38, %v6434_v0  ;;  %v6455_v47 = vmul.f32 %v7023_v1, %v6447_v53 }
0x3368   :  { %v6456_v62 = vmul.f32 %v7023_v1, %v6448_v50  ;;  %v6463_v28 = vadd.f32 %v7024_v17, %v6455_v47 }
0x336a   :  { %v6464_v40 = vadd.f32 %v7024_v17, %v6456_v62 }
0x336c   :  { %v7897_v59 = vpack.c.bf16 %v6464_v40, %v6463_v28 }
0x336e   :  { %7898 = vmatpush3.bf16.msra.mxu1 %v7897_v59 }
0x336f   :  { %7899 = vmatprep.subr.bf16.mxu1 %v8538_v48 }
0x3371   :  { %7827 = vmatmul.mubr.msk.f32.vlgmr.msra.gmra.mrb[168].mxu1 %vm669_vm6, %v7025_v2 }
0x3372   :  { %7901 = vmatpush3.bf16.msra.mxu1 %v7900_v5  ;;  %7861 = vmatprep.mubr.msk.f32.mxu1 %vm8532_vm5, %v8531_v24  ;;  %v6551_v24 = vld [vmem:[%s9897_s21 + $0x38] sm:$0xff] }
0x3373   :  { %7902 = vmatprep.subr.bf16.mxu1 %v8538_v48  ;;  %v7909_v25 = vpack.c.bf16 %v6551_v24, %v6550_v22 }
0x3376   :  { %7904 = vmatpush3.bf16.msra.mxu1 %v7903_v11 }
0x3377   :  { %7905 = vmatprep.subr.bf16.mxu1 %v8538_v48 }
0x337a   :  { %7907 = vmatpush3.bf16.msra.mxu1 %v7906_v19 }
0x337b   :  { %7908 = vmatprep.subr.bf16.mxu1 %v8538_v48 }
0x337e   :  { %7910 = vmatpush3.bf16.msra.mxu1 %v7909_v25 }
0x337f   :  { %7911 = vmatprep.subr.bf16.mxu1 %v8538_v48 }
0x3382   :  { %7913 = vmatpush3.bf16.msra.mxu1 %v7912_v51 }
0x3383   :  { %7914 = vmatprep.subr.bf16.mxu1 %v8538_v48 }
0x3386   :  { %7916 = vmatpush3.bf16.msra.mxu1 %v7915_v61 }
0x3387   :  { %7917 = vmatprep.subr.bf16.mxu1 %v8538_v48 }
0x338a   :  { %7919 = vmatpush3.bf16.msra.mxu1 %v7918_v33 }
0x338b   :  { %7920 = vmatprep.subr.bf16.mxu1 %v8538_v48 }
0x338e   :  { %7922 = vmatpush3.bf16.msra.mxu1 %v7921_v20 }
0x3444   :  { %v6540_v42 = vpop.f32.mrb[168].mxu1 }
0x3445   :  { %7862 = vmatmul.mubr.f32.vlgmr.msra.gmra.mrb[170].mxu1 %v6540_v42  ;;  %v7828_v54 = vpop.f32.mrb[169].mxu1 }
0x3518   :  { %v6633_v16 = vpop.f32.mrb[170].mxu1 }
0x3519   :  { %v6634_v39 = vadd.f32 %v7027_v7, %v6633_v16  ;;  %v7863_v6 = vpop.f32.mrb[171].mxu1 }
0x351b   :  { %v6643_v37 = vand.u32 2147483647, %v6634_v39  ;;  %6638 = vst.msk [vmem:[#allocation11] sm:$0x3] %vm6637_vm1, %v6634_v39  ;;  %v6640_v41 = vmax.f32 %v6634_v39, 0.0  ;;  %v6672_v31 = vmul.f32 %v6671_v9, %v6634_v39  ;;  %v6641_v46 = vmul.f32 %v6639_v27, %v6634_v39 }
0x351d   :  { %v6644_v35 = vsub.f32 0.0, %v6643_v37  ;;  %v6673_v49 = vsub.f32 %v6640_v41, %v6672_v31  ;;  %v6642_v48 = vsub.f32 %v6640_v41, %v6641_v46 }
0x351f   :  { %v6645_v4 = vmul.f32 1.442695, %v6644_v35 }
0x3521   :  { %8370 = vpow2.f32 %v6645_v4 }
0x352b   :  { %v8371_v13 = vpop.eup %8370 }
0x352c   :  { %v6647_v63 = vadd.f32 1.0, %v8371_v13 }
0x352e   :  { %8372 = vlog2.f32 %v6647_v63 }
0x3538   :  { %v8373_v0 = vpop.eup %8372 }
0x3539   :  { %v6649_v32 = vmul.f32 0.6931472, %v8373_v0 }
0x353b   :  { %v6674_v52 = vadd.f32 %v6673_v49, %v6649_v32  ;;  %v6650_v43 = vadd.f32 %v6649_v32, %v6642_v48 }
0x353d   :  { %v6675_v14 = vsel %vm6637_vm1, %v6674_v52, 0.0  ;;  %v6651_v56 = vsub.f32 0.0, %v6650_v43 }
0x353e   :  { %6676 = vadd.xlane.f32.xlu0 %v6675_v14 }
0x353f   :  { %v6652_v8 = vmul.f32 1.442695, %v6651_v56 }
0x3541   :  { %8374 = vpow2.f32 %v6652_v8 }
0x354b   :  { %v8375_v10 = vpop.eup %8374 }
0x354c   :  { %v6654_v44 = vsub.f32 1.0, %v8375_v10 }
0x354e   :  { %v6655_v1 = vmul.f32 %v6654_v44, %v6654_v44 }
0x3550   :  { %v6656_v53 = vmul.f32 %v6655_v1, %v6650_v43 }
0x3552   :  { %v6657_v38 = vsel %vm6637_vm1, %v6656_v53, 0.0 }
0x3553   :  { %6658 = vadd.xlane.f32.xlu1 %v6657_v38 }
0x3554   :  { %8475 = shalt.err (!%p8472_p8)
}
0x3555   :  { %s8476_s5 = scalar_lea.hbm %s9899_s23, 32 }
0x3556   :  { %p8477_p9 = scmp.ne.s32.totalorder %s9899_s23, %s8476_s5  ;;  %p8480_p10 = scmp.lt.u32.totalorder %s8476_s5, %s9899_s23 }
0x3558   :  { %p8482_p11 = pnand %p8480_p10, %p8477_p9 }
0x355a   :  { %8485 = shalt.err (!%p8482_p11)
}
0x355b   :  { %6700 = dma.vmem_to_hbm [thread:$0]  %s6698_s1, 32, %s9899_s23, [#allocation5]   ;;  %vm6660_vm2 = vcmask 1041408   ;;  %vm6689_vm3 = vcmask 0  }
0x355c   :  { %s8540_s23 = smov [#allocation12]  }
0x355d   :  { %s6707_s25 = sshll.u32 %s8540_s23, 4  ;;  %s6708_s25 = int_to_ptr.vmem [resolvable:$true] %s6707_s25 }
0x355e   :  { %s8486_s13 = scalar_lea.vmem %s6708_s25, 16  ;;  %s8490_s14 = scalar_lea.vmem %s6708_s25, 32 }
0x355f   :  { %p8487_p12 = scmp.ne.s32.totalorder %s6708_s25, %s8486_s13  ;;  %p8491_p13 = scmp.lt.s32.totalorder %s6708_s25, %s6708_s25 }
0x3560   :  { %p8492_p0 = scmp.lt.s32.totalorder %s8490_s14, %s8486_s13 }
0x3562   :  { %p8493_p1 = por %p8492_p0, %p8491_p13 }
0x3564   :  { %p8494_p2 = pnand %p8493_p1, %p8487_p12 }
0x35cb   :  { %v6677_v50 = vpop.xlane.xlu0 %6676 }
0x35cc   :  { %v6678_v47 = vsel %vm6660_vm2, %v6677_v50, 0.0 }
0x35cd   :  { %v6679_v17 = vrot.slane %v6678_v47, 4 }
0x35cf   :  { %v6680_v60 = vadd.f32 %v6679_v17, %v6678_v47 }
0x35d1   :  { %v6681_v62 = vrot.slane %v6680_v60, 2 }
0x35d3   :  { %v6682_v28 = vadd.f32 %v6681_v62, %v6680_v60 }
0x35d5   :  { %v6683_v59 = vrot.slane %v6682_v28, 1 }
0x35d7   :  { %v6684_v34 = vadd.f32 %v6683_v59, %v6682_v28 }
0x35d9   :  { %v6685_v12 = vmul.f32 0.0625, %v6684_v34 }
0x35db   :  { %v6687_v22 = vmul.f32 0.3, %v6685_v12 }
0x35e0   :  { %v6659_v40 = vpop.xlane.xlu1 %6658 }
0x35e1   :  { %v6661_v57 = vsel %vm6660_vm2, %v6659_v40, 0.0 }
0x35e2   :  { %v6662_v58 = vrot.slane %v6661_v57, 4 }
0x35e4   :  { %v6663_v2 = vadd.f32 %v6662_v58, %v6661_v57 }
0x35e6   :  { %v6664_v5 = vrot.slane %v6663_v2, 2 }
0x35e8   :  { %v6665_v21 = vadd.f32 %v6664_v5, %v6663_v2 }
0x35ea   :  { %v6666_v11 = vrot.slane %v6665_v21, 1 }
0x35ec   :  { %v6667_v18 = vadd.f32 %v6666_v11, %v6665_v21 }
0x35ee   :  { %v6669_v19 = vmul.f32 0.0625, %v6667_v18 }
0x35f0   :  { %v6686_v24 = vmul.f32 0.7, %v6669_v19 }
0x35f2   :  { %v6688_v25 = vadd.f32 %v6687_v22, %v6686_v24 }
0x35f4   :  { %6690 = vst.msk [vmem:[#allocation12] sm:$0x1] %vm6689_vm3, %v6688_v25 }
0x35f5   :  { %8497 = shalt.err (!%p8494_p2)
}
0x35f6   :  { %s9926_s18 = sld [smem:[#allocation28_spill]] }
0x35fc   :  { %s8498_s6 = scalar_lea.hbm %s9926_s18, 16 }
0x35fd   :  { %p8499_p3 = scmp.ne.s32.totalorder %s9926_s18, %s8498_s6  ;;  %p8502_p4 = scmp.lt.u32.totalorder %s8498_s6, %s9926_s18 }
0x35ff   :  { %p8504_p5 = pnand %p8502_p4, %p8499_p3 }
0x3601   :  { %8507 = shalt.err (!%p8504_p5)
}
0x3602   :  { %6710 = dma.vmem_to_hbm [thread:$0]  %s6708_s25, 16, %s9926_s18, [#allocation13]  }
0x3603   :  { %8514 = dma.done.wait [#allocation5], 32  }
0x3604   :  { %8515 = vsyncadd [#allocation5], 4294967264 }
0x3605   :  { %8516 = dma.done.wait [#allocation13], 16  }
0x3606   :  { %8517 = vsyncadd [#allocation13], 4294967280 }
0x3607   :  { %6717 = vsyncpa [#allocation4], 1 }
0x3608   :  { %6718 = vsyncpa [#allocation7], 1 }
0x3609   :  { %6719 = vsyncpa [#allocation10], 1 }
0x360a   :  { %6720 = vsyncpa [#allocation5], 1 }
0x360b   :  { %6721 = vsyncpa [#allocation13], 1 }

</bundles_post_ra>
